<compile_context>
chip_gen: v7x
topology: tpu7x:2x2x1
jax: 0.10.0
libtpu: 0.0.40
codegen_flags: <defaults>
</compile_context>

<pallas_src>
import jax
import jax.numpy as jnp
from jax.experimental import pallas as pl
from jax.experimental.pallas import tpu as pltpu

# ---- problem constants (from the PyTorch module) -------------------------
INPUT_DIM_PER_POINT = 2
NUM_POINTS_PER_SAMPLE = 100
OUTPUT_DIM_PER_POINT = 1
INPUT_DIM = NUM_POINTS_PER_SAMPLE * (INPUT_DIM_PER_POINT + OUTPUT_DIM_PER_POINT)  # 300
LATENT_DIM = 20
HIDDEN = (512, 256, 128)

# ---- TPU-friendly padded dims / tiling ------------------------------------
K_PAD = 384          # 300 -> 384 (multiple of 128: clean MXU K-tiles)
OUT_PAD = 128        # 20  -> 128 (lane-dense output stores, no vst.msk)
TB = 256             # batch tile: fills the 256-row MXU on v6e/v7x (2x128 on v5e)

PAD_DIMS = (K_PAD,) + HIDDEN + (OUT_PAD,)   # (384, 512, 256, 128, 128)


# ---- Pallas kernel: full 4-layer MLP forward on the MXU/VPU ---------------
def encoder_kernel(x_ref,
                   w1_ref, b1_ref,
                   w2_ref, b2_ref,
                   w3_ref, b3_ref,
                   w4_ref, b4_ref,
                   o_ref):
    # bf16 operands into the MXU, f32 accumulation; bias + ReLU in f32 on the
    # VPU (v5e has no bf16 VALU), re-cast to bf16 only at the next MXU input.
    h = x_ref[...]                                                       # (TB, 384) bf16

    h = jnp.dot(h, w1_ref[...], preferred_element_type=jnp.float32) + b1_ref[...]
    h = jnp.maximum(h, 0.0).astype(jnp.bfloat16)                         # (TB, 512)

    h = jnp.dot(h, w2_ref[...], preferred_element_type=jnp.float32) + b2_ref[...]
    h = jnp.maximum(h, 0.0).astype(jnp.bfloat16)                         # (TB, 256)

    h = jnp.dot(h, w3_ref[...], preferred_element_type=jnp.float32) + b3_ref[...]
    h = jnp.maximum(h, 0.0).astype(jnp.bfloat16)                         # (TB, 128)

    z = jnp.dot(h, w4_ref[...], preferred_element_type=jnp.float32) + b4_ref[...]
    o_ref[...] = z.astype(o_ref.dtype)                                   # (TB, 128) f32


def encoder_forward(x, params, *, tb=TB):
    """x: (B, INPUT_DIM) float32.
    params: [w1,b1,w2,b2,w3,b3,w4,b4] already padded to PAD_DIMS, weights bf16,
    biases f32. Returns (B, LATENT_DIM) float32."""
    B = x.shape[0]
    Bp = pl.cdiv(B, tb) * tb

    # Pad batch to a tile multiple, pad features 300 -> 384, cast to bf16.
    xp = jnp.zeros((Bp, K_PAD), jnp.bfloat16)
    xp = xp.at[:B, :INPUT_DIM].set(x.astype(jnp.bfloat16))

    w1, b1, w2, b2, w3, b3, w4, b4 = params
    const = lambda i: (0, 0)   # weights/biases: same block every grid step

    flops = 2 * Bp * (K_PAD * 512 + 512 * 256 + 256 * 128 + 128 * OUT_PAD)
    weight_bytes = sum(int(p.size) * p.dtype.itemsize for p in params)
    bytes_accessed = Bp * K_PAD * 2 + Bp * OUT_PAD * 4 + weight_bytes

    out = pl.pallas_call(
        encoder_kernel,
        out_shape=jax.ShapeDtypeStruct((Bp, OUT_PAD), jnp.float32),
        grid_spec=pltpu.PrefetchScalarGridSpec(
            num_scalar_prefetch=0,
            grid=(Bp // tb,),
            in_specs=[
                pl.BlockSpec((tb, K_PAD), lambda i: (i, 0)),
                pl.BlockSpec(w1.shape, const), pl.BlockSpec(b1.shape, const),
                pl.BlockSpec(w2.shape, const), pl.BlockSpec(b2.shape, const),
                pl.BlockSpec(w3.shape, const), pl.BlockSpec(b3.shape, const),
                pl.BlockSpec(w4.shape, const), pl.BlockSpec(b4.shape, const),
            ],
            out_specs=pl.BlockSpec((tb, OUT_PAD), lambda i: (i, 0)),
        ),
        compiler_params=pltpu.CompilerParams(
            dimension_semantics=("parallel",),        # shard batch tiles over v7x's 2 TCs
            vmem_limit_bytes=64 * 1024 * 1024,
        ),
        cost_estimate=pl.CostEstimate(
            flops=flops, transcendentals=0, bytes_accessed=bytes_accessed),
    )(xp, w1, b1, w2, b2, w3, b3, w4, b4)

    return out[:B, :LATENT_DIM]


# ---- deterministic parameter init (synthetic, PyTorch-like uniform) -------
def init_params(key):
    """Weights padded to MXU-friendly shapes, stored bf16; biases f32."""
    dims = (INPUT_DIM,) + HIDDEN + (LATENT_DIM,)
    params = []
    for i in range(len(dims) - 1):
        fan_in, fan_out = dims[i], dims[i + 1]
        key, kw, kb = jax.random.split(key, 3)
        bound = 1.0 / (fan_in ** 0.5)
        w = jax.random.uniform(kw, (fan_in, fan_out), jnp.float32, -bound, bound)
        b = jax.random.uniform(kb, (1, fan_out), jnp.float32, -bound, bound)
        wp = jnp.zeros((PAD_DIMS[i], PAD_DIMS[i + 1]), jnp.float32)
        wp = wp.at[:fan_in, :fan_out].set(w)
        bp = jnp.zeros((1, PAD_DIMS[i + 1]), jnp.float32).at[:, :fan_out].set(b)
        params += [wp.astype(jnp.bfloat16), bp]
    return params


def reference_forward(x, params):
    """Pure-JAX reference mirroring the kernel numerics (bf16 MXU inputs,
    f32 accumulation / bias / ReLU)."""
    h = jnp.zeros((x.shape[0], K_PAD), jnp.float32).at[:, :INPUT_DIM].set(x)
    h = h.astype(jnp.bfloat16)
    n_layers = len(params) // 2
    for i in range(n_layers):
        w, b = params[2 * i], params[2 * i + 1]
        acc = jnp.dot(h.astype(jnp.float32), w.astype(jnp.float32)) + b
        if i < n_layers - 1:
            h = jnp.maximum(acc, 0.0).astype(jnp.bfloat16)
        else:
            h = acc
    return h[:, :LATENT_DIM]


if __name__ == "__main__":
    key = jax.random.PRNGKey(0)
    key, kx = jax.random.split(key)

    B = 8
    x = jax.random.normal(kx, (B, INPUT_DIM), jnp.float32)
    params = init_params(key)

    z = encoder_forward(x, params)
    z = jax.block_until_ready(z)

    z_ref = reference_forward(x, params)
    assert z.shape == (B, LATENT_DIM), z.shape
    assert jnp.allclose(z, z_ref, atol=2e-3, rtol=2e-3), "mismatch vs JAX reference"

    print("KERNEL_OK")
</pallas_src>

<mosaic_0001>
module attributes {stable_mosaic.version = 11 : i64} {
  func.func @encoder_kernel(%arg0: i32, %arg1: memref<256x384xbf16, #tpu.memory_space<vmem>>, %arg2: memref<384x512xbf16, #tpu.memory_space<vmem>>, %arg3: memref<1x512xf32, #tpu.memory_space<vmem>>, %arg4: memref<512x256xbf16, #tpu.memory_space<vmem>>, %arg5: memref<1x256xf32, #tpu.memory_space<vmem>>, %arg6: memref<256x128xbf16, #tpu.memory_space<vmem>>, %arg7: memref<1x128xf32, #tpu.memory_space<vmem>>, %arg8: memref<128x128xbf16, #tpu.memory_space<vmem>>, %arg9: memref<1x128xf32, #tpu.memory_space<vmem>>, %arg10: memref<256x128xf32, #tpu.memory_space<vmem>>) attributes {dimension_semantics = [#tpu.dimension_semantics<parallel>], iteration_bounds = array<i64: 1>, scalar_prefetch = 0 : i64, scratch_operands = 0 : i64, tpu.core_type = #tpu.core_type<tc>, window_params = [{transform_indices = @transform_0, window_bounds = array<i64: 256, 384>}, {pipeline_mode = #tpu.pipeline_mode<synchronous>, transform_indices = @transform_1, window_bounds = array<i64: 384, 512>}, {pipeline_mode = #tpu.pipeline_mode<synchronous>, transform_indices = @transform_2, window_bounds = array<i64: 1, 512>}, {pipeline_mode = #tpu.pipeline_mode<synchronous>, transform_indices = @transform_3, window_bounds = array<i64: 512, 256>}, {pipeline_mode = #tpu.pipeline_mode<synchronous>, transform_indices = @transform_4, window_bounds = array<i64: 1, 256>}, {pipeline_mode = #tpu.pipeline_mode<synchronous>, transform_indices = @transform_5, window_bounds = array<i64: 256, 128>}, {pipeline_mode = #tpu.pipeline_mode<synchronous>, transform_indices = @transform_6, window_bounds = array<i64: 1, 128>}, {pipeline_mode = #tpu.pipeline_mode<synchronous>, transform_indices = @transform_7, window_bounds = array<i64: 128, 128>}, {pipeline_mode = #tpu.pipeline_mode<synchronous>, transform_indices = @transform_8, window_bounds = array<i64: 1, 128>}, {transform_indices = @transform_9, window_bounds = array<i64: 256, 128>}]} {
    %c0 = arith.constant 0 : index
    %c0_0 = arith.constant 0 : index
    %0 = vector.load %arg1[%c0, %c0_0] : memref<256x384xbf16, #tpu.memory_space<vmem>>, vector<256x384xbf16>
    %c0_1 = arith.constant 0 : index
    %c0_2 = arith.constant 0 : index
    %1 = vector.load %arg2[%c0_1, %c0_2] : memref<384x512xbf16, #tpu.memory_space<vmem>>, vector<384x512xbf16>
    %cst = arith.constant dense<0.000000e+00> : vector<256x512xf32>
    %2 = tpu.matmul %0, %1, %cst {dimension_numbers = #tpu.dot_dimension_numbers<[1], [0], [0], [1], [0, 0, 1, 1], [], []>} : vector<256x384xbf16>, vector<384x512xbf16>, vector<256x512xf32> -> vector<256x512xf32>
    %c0_3 = arith.constant 0 : index
    %c0_4 = arith.constant 0 : index
    %3 = vector.load %arg3[%c0_3, %c0_4] : memref<1x512xf32, #tpu.memory_space<vmem>>, vector<1x512xf32>
    %4 = vector.broadcast %3 : vector<1x512xf32> to vector<256x512xf32>
    %5 = arith.addf %2, %4 : vector<256x512xf32>
    %cst_5 = arith.constant 0.000000e+00 : f32
    %6 = vector.broadcast %cst_5 : f32 to vector<256x512xf32>
    %7 = arith.maximumf %5, %6 : vector<256x512xf32>
    %8 = arith.truncf %7 : vector<256x512xf32> to vector<256x512xbf16>
    %c0_6 = arith.constant 0 : index
    %c0_7 = arith.constant 0 : index
    %9 = vector.load %arg4[%c0_6, %c0_7] : memref<512x256xbf16, #tpu.memory_space<vmem>>, vector<512x256xbf16>
    %cst_8 = arith.constant dense<0.000000e+00> : vector<256x256xf32>
    %10 = tpu.matmul %8, %9, %cst_8 {dimension_numbers = #tpu.dot_dimension_numbers<[1], [0], [0], [1], [0, 0, 1, 1], [], []>} : vector<256x512xbf16>, vector<512x256xbf16>, vector<256x256xf32> -> vector<256x256xf32>
    %c0_9 = arith.constant 0 : index
    %c0_10 = arith.constant 0 : index
    %11 = vector.load %arg5[%c0_9, %c0_10] : memref<1x256xf32, #tpu.memory_space<vmem>>, vector<1x256xf32>
    %12 = vector.broadcast %11 : vector<1x256xf32> to vector<256x256xf32>
    %13 = arith.addf %10, %12 : vector<256x256xf32>
    %cst_11 = arith.constant 0.000000e+00 : f32
    %14 = vector.broadcast %cst_11 : f32 to vector<256x256xf32>
    %15 = arith.maximumf %13, %14 : vector<256x256xf32>
    %16 = arith.truncf %15 : vector<256x256xf32> to vector<256x256xbf16>
    %c0_12 = arith.constant 0 : index
    %c0_13 = arith.constant 0 : index
    %17 = vector.load %arg6[%c0_12, %c0_13] : memref<256x128xbf16, #tpu.memory_space<vmem>>, vector<256x128xbf16>
    %cst_14 = arith.constant dense<0.000000e+00> : vector<256x128xf32>
    %18 = tpu.matmul %16, %17, %cst_14 {dimension_numbers = #tpu.dot_dimension_numbers<[1], [0], [0], [1], [0, 0, 1, 1], [], []>} : vector<256x256xbf16>, vector<256x128xbf16>, vector<256x128xf32> -> vector<256x128xf32>
    %c0_15 = arith.constant 0 : index
    %c0_16 = arith.constant 0 : index
    %19 = vector.load %arg7[%c0_15, %c0_16] : memref<1x128xf32, #tpu.memory_space<vmem>>, vector<1x128xf32>
    %20 = vector.broadcast %19 : vector<1x128xf32> to vector<256x128xf32>
    %21 = arith.addf %18, %20 : vector<256x128xf32>
    %cst_17 = arith.constant 0.000000e+00 : f32
    %22 = vector.broadcast %cst_17 : f32 to vector<256x128xf32>
    %23 = arith.maximumf %21, %22 : vector<256x128xf32>
    %24 = arith.truncf %23 : vector<256x128xf32> to vector<256x128xbf16>
    %c0_18 = arith.constant 0 : index
    %c0_19 = arith.constant 0 : index
    %25 = vector.load %arg8[%c0_18, %c0_19] : memref<128x128xbf16, #tpu.memory_space<vmem>>, vector<128x128xbf16>
    %cst_20 = arith.constant dense<0.000000e+00> : vector<256x128xf32>
    %26 = tpu.matmul %24, %25, %cst_20 {dimension_numbers = #tpu.dot_dimension_numbers<[1], [0], [0], [1], [0, 0, 1, 1], [], []>} : vector<256x128xbf16>, vector<128x128xbf16>, vector<256x128xf32> -> vector<256x128xf32>
    %c0_21 = arith.constant 0 : index
    %c0_22 = arith.constant 0 : index
    %27 = vector.load %arg9[%c0_21, %c0_22] : memref<1x128xf32, #tpu.memory_space<vmem>>, vector<1x128xf32>
    %28 = vector.broadcast %27 : vector<1x128xf32> to vector<256x128xf32>
    %29 = arith.addf %26, %28 : vector<256x128xf32>
    %c0_23 = arith.constant 0 : index
    %c0_24 = arith.constant 0 : index
    %30 = vector.load %arg10[%c0_23, %c0_24] : memref<256x128xf32, #tpu.memory_space<vmem>>, vector<256x128xf32>
    tpu.vector_store %arg10[%c0_23, %c0_24], %29 {strides = array<i32>} : memref<256x128xf32, #tpu.memory_space<vmem>>, vector<256x128xf32>,
    return
  }
  func.func @transform_0(%arg0: i32) -> (i32, i32) {
    %c0_i32 = arith.constant 0 : i32
    %c0_i32_0 = arith.constant 0 : i32
    return %arg0, %c0_i32 : i32, i32
  }
  func.func @transform_1(%arg0: i32) -> (i32, i32) {
    %c0_i32 = arith.constant 0 : i32
    %c0_i32_0 = arith.constant 0 : i32
    %c0_i32_1 = arith.constant 0 : i32
    return %c0_i32, %c0_i32_0 : i32, i32
  }
  func.func @transform_2(%arg0: i32) -> (i32, i32) {
    %c0_i32 = arith.constant 0 : i32
    %c0_i32_0 = arith.constant 0 : i32
    %c0_i32_1 = arith.constant 0 : i32
    return %c0_i32, %c0_i32_0 : i32, i32
  }
  func.func @transform_3(%arg0: i32) -> (i32, i32) {
    %c0_i32 = arith.constant 0 : i32
    %c0_i32_0 = arith.constant 0 : i32
    %c0_i32_1 = arith.constant 0 : i32
    return %c0_i32, %c0_i32_0 : i32, i32
  }
  func.func @transform_4(%arg0: i32) -> (i32, i32) {
    %c0_i32 = arith.constant 0 : i32
    %c0_i32_0 = arith.constant 0 : i32
    %c0_i32_1 = arith.constant 0 : i32
    return %c0_i32, %c0_i32_0 : i32, i32
  }
  func.func @transform_5(%arg0: i32) -> (i32, i32) {
    %c0_i32 = arith.constant 0 : i32
    %c0_i32_0 = arith.constant 0 : i32
    %c0_i32_1 = arith.constant 0 : i32
    return %c0_i32, %c0_i32_0 : i32, i32
  }
  func.func @transform_6(%arg0: i32) -> (i32, i32) {
    %c0_i32 = arith.constant 0 : i32
    %c0_i32_0 = arith.constant 0 : i32
    %c0_i32_1 = arith.constant 0 : i32
    return %c0_i32, %c0_i32_0 : i32, i32
  }
  func.func @transform_7(%arg0: i32) -> (i32, i32) {
    %c0_i32 = arith.constant 0 : i32
    %c0_i32_0 = arith.constant 0 : i32
    %c0_i32_1 = arith.constant 0 : i32
    return %c0_i32, %c0_i32_0 : i32, i32
  }
  func.func @transform_8(%arg0: i32) -> (i32, i32) {
    %c0_i32 = arith.constant 0 : i32
    %c0_i32_0 = arith.constant 0 : i32
    %c0_i32_1 = arith.constant 0 : i32
    return %c0_i32, %c0_i32_0 : i32, i32
  }
  func.func @transform_9(%arg0: i32) -> (i32, i32) {
    %c0_i32 = arith.constant 0 : i32
    %c0_i32_0 = arith.constant 0 : i32
    return %arg0, %c0_i32 : i32, i32
  }
}

</mosaic_0001>

<bundles_post_ra>
// kernel: tpu_custom_call.1
= control target key start
LH: loop header
LB: loop body
LE: loop exit
PB: predicated region body
PF: predicated region fallthrough
CT: control target
= control target key end

     0   :  { %14 = vsyncpa [#allocation3], 0  ;;  %s5829_s0 = inlined_call_operand.hbm [shape: bf16[256,384], index: 0, kind: input, shape index: {}]   ;;  %s5830_s1 = inlined_call_operand.hbm [shape: bf16[384,512], index: 1, kind: input, shape index: {}]   ;;  %s5831_s2 = inlined_call_operand.hbm [shape: f32[1,512], index: 2, kind: input, shape index: {}]   ;;  %s5832_s3 = inlined_call_operand.hbm [shape: bf16[512,256], index: 3, kind: input, shape index: {}]   ;;  %s5833_s4 = inlined_call_operand.hbm [shape: f32[1,256], index: 4, kind: input, shape index: {}]   ;;  %s5834_s5 = inlined_call_operand.hbm [shape: bf16[256,128], index: 5, kind: input, shape index: {}]   ;;  %s5835_s6 = inlined_call_operand.hbm [shape: f32[1,128], index: 6, kind: input, shape index: {}]   ;;  %s5836_s7 = inlined_call_operand.hbm [shape: bf16[128,128], index: 7, kind: input, shape index: {}]   ;;  %s5837_s8 = inlined_call_operand.hbm [shape: f32[1,128], index: 8, kind: input, shape index: {}]   ;;  %s5838_s9 = inlined_call_operand.hbm [shape: f32[256,128], index: 9, kind: output, shape index: {}]  }
   0x1   :  { %15 = vsyncpa [#allocation6], 0 }
   0x2   :  { %16 = vsyncpa [#allocation9], 0 }
   0x3   :  { %17 = vsyncpa [#allocation12], 0 }
   0x4   :  { %18 = vsyncpa [#allocation15], 0 }
   0x5   :  { %19 = vsyncpa [#allocation4], 0  ;;  %s4954_s30 = smov [#allocation5]   ;;  %s4722_s13 = scalar_lea.hbm %s5830_s1, 12288 }
   0x6   :  { %s37_s10 = sshll.u32 %s4954_s30, 4  ;;  %p4723_p0 = scmp.ne.s32.totalorder %s5830_s1, %s4722_s13  ;;  %s38_s10 = int_to_ptr.vmem [resolvable:$true] %s37_s10 }
   0x7   :  { %p4726_p1 = scmp.lt.u32.totalorder %s4722_s13, %s5830_s1 }
   0x9   :  { %p4728_p2 = pnand %p4726_p1, %p4723_p0 }
   0xb   :  { %4731 = shalt.err (!%p4728_p2)
}
   0xc   :  { %s4732_s18 = scalar_lea.vmem %s38_s10, 12288  ;;  %p4737_p4 = scmp.lt.s32.totalorder %s38_s10, %s38_s10 }
   0xd   :  { %p4733_p3 = scmp.ne.s32.totalorder %s38_s10, %s4732_s18  ;;  %p4738_p5 = scmp.lt.s32.totalorder %s4732_s18, %s4732_s18 }
   0xf   :  { %p4739_p6 = por %p4738_p5, %p4737_p4 }
  0x11   :  { %p4740_p7 = pnand %p4739_p6, %p4733_p3 }
  0x13   :  { %4743 = shalt.err (!%p4740_p7)
}
  0x14   :  { %s4955_s19 = smov 256   ;;  %s4956_s20 = smov 16  }
  0x15   :  { %43 = dma.hbm_to_vmem [thread:$0]  %s5830_s1, 12288, %s38_s10, [#allocation6], %s4955_s19, %s4955_s19, %s4956_s20  }
  0x16   :  { %s4957_s23 = smov [#allocation8]   ;;  %s4744_s27 = scalar_lea.hbm %s5832_s3, 8192 }
  0x17   :  { %s59_s24 = sshll.u32 %s4957_s23, 4  ;;  %p4745_p8 = scmp.ne.s32.totalorder %s5832_s3, %s4744_s27  ;;  %s60_s24 = int_to_ptr.vmem [resolvable:$true] %s59_s24 }
  0x18   :  { %p4748_p9 = scmp.lt.u32.totalorder %s4744_s27, %s5832_s3 }
  0x1a   :  { %p4750_p10 = pnand %p4748_p9, %p4745_p8 }
  0x1c   :  { %4753 = shalt.err (!%p4750_p10)
}
  0x1d   :  { %s4754_s12 = scalar_lea.vmem %s60_s24, 8192  ;;  %p4759_p12 = scmp.lt.s32.totalorder %s60_s24, %s60_s24 }
  0x1e   :  { %p4755_p11 = scmp.ne.s32.totalorder %s60_s24, %s4754_s12  ;;  %p4760_p13 = scmp.lt.s32.totalorder %s4754_s12, %s4754_s12 }
  0x20   :  { %p4761_p0 = por %p4760_p13, %p4759_p12 }
  0x22   :  { %p4762_p1 = pnand %p4761_p0, %p4755_p11 }
  0x24   :  { %4765 = shalt.err (!%p4762_p1)
}
  0x25   :  { %s4958_s1 = smov 128   ;;  %s4959_s10 = smov 8  }
  0x26   :  { %65 = dma.hbm_to_vmem [thread:$0]  %s5832_s3, 8192, %s60_s24, [#allocation9], %s4958_s1, %s4958_s1, %s4959_s10  }
  0x27   :  { %s4960_s15 = smov [#allocation11]   ;;  %s4766_s19 = scalar_lea.hbm %s5834_s5, 2048 }
  0x28   :  { %s81_s16 = sshll.u32 %s4960_s15, 4  ;;  %p4767_p2 = scmp.ne.s32.totalorder %s5834_s5, %s4766_s19  ;;  %s82_s16 = int_to_ptr.vmem [resolvable:$true] %s81_s16 }
  0x29   :  { %p4770_p3 = scmp.lt.u32.totalorder %s4766_s19, %s5834_s5 }
  0x2b   :  { %p4772_p4 = pnand %p4770_p3, %p4767_p2 }
  0x2d   :  { %4775 = shalt.err (!%p4772_p4)
}
  0x2e   :  { %s4776_s25 = scalar_lea.vmem %s82_s16, 2048  ;;  %p4781_p6 = scmp.lt.s32.totalorder %s82_s16, %s82_s16 }
  0x2f   :  { %p4777_p5 = scmp.ne.s32.totalorder %s82_s16, %s4776_s25  ;;  %p4782_p7 = scmp.lt.s32.totalorder %s4776_s25, %s4776_s25 }
  0x31   :  { %p4783_p8 = por %p4782_p7, %p4781_p6 }
  0x33   :  { %p4784_p9 = pnand %p4783_p8, %p4777_p5 }
  0x35   :  { %4787 = shalt.err (!%p4784_p9)
}
  0x36   :  { %s4961_s3 = smov 64   ;;  %s4962_s24 = smov 4  }
  0x37   :  { %87 = dma.hbm_to_vmem [thread:$0]  %s5834_s5, 2048, %s82_s16, [#allocation12], %s4961_s3, %s4961_s3, %s4962_s24  }
  0x38   :  { %s4963_s28 = smov [#allocation14]   ;;  %s4964_s30 = smov [#allocation2]  }
  0x39   :  { %s103_s29 = sshll.u32 %s4963_s28, 4  ;;  %s25_s11 = sshll.u32 %s4964_s30, 4  ;;  %s104_s29 = int_to_ptr.vmem [resolvable:$true] %s103_s29  ;;  %s26_s11 = int_to_ptr.vmem [resolvable:$true] %s25_s11 }
  0x3a   :  { %s4788_s14 = scalar_lea.hbm %s5836_s7, 1024 }
  0x3b   :  { %p4789_p10 = scmp.ne.s32.totalorder %s5836_s7, %s4788_s14  ;;  %p4792_p11 = scmp.lt.u32.totalorder %s4788_s14, %s5836_s7 }
  0x3d   :  { %p4794_p12 = pnand %p4792_p11, %p4789_p10 }
  0x3f   :  { %4797 = shalt.err (!%p4794_p12)
}
  0x40   :  { %s4798_s5 = scalar_lea.vmem %s104_s29, 1024  ;;  %p4803_p0 = scmp.lt.s32.totalorder %s104_s29, %s104_s29 }
  0x41   :  { %p4799_p13 = scmp.ne.s32.totalorder %s104_s29, %s4798_s5  ;;  %p4804_p1 = scmp.lt.s32.totalorder %s4798_s5, %s4798_s5 }
  0x43   :  { %p4805_p2 = por %p4804_p1, %p4803_p0 }
  0x45   :  { %p4806_p3 = pnand %p4805_p2, %p4799_p13 }
  0x47   :  { %4809 = shalt.err (!%p4806_p3)
}
  0x48   :  { %109 = dma.hbm_to_vmem [thread:$0]  %s5836_s7, 1024, %s104_s29, [#allocation15], %s4961_s3, %s4961_s3, %s4962_s24  }
  0x49   :  { %s4810_s23 = scalar_lea.hbm %s5829_s0, 6144 }
  0x4a   :  { %p4811_p4 = scmp.ne.s32.totalorder %s5829_s0, %s4810_s23  ;;  %p4814_p5 = scmp.lt.u32.totalorder %s4810_s23, %s5829_s0 }
  0x4c   :  { %p4816_p6 = pnand %p4814_p5, %p4811_p4 }
  0x4e   :  { %4819 = shalt.err (!%p4816_p6)
}
  0x4f   :  { %s4820_s30 = scalar_lea.vmem %s26_s11, 6144  ;;  %p4825_p8 = scmp.lt.s32.totalorder %s26_s11, %s26_s11 }
  0x50   :  { %p4821_p7 = scmp.ne.s32.totalorder %s26_s11, %s4820_s30  ;;  %p4826_p9 = scmp.lt.s32.totalorder %s4820_s30, %s4820_s30 }
  0x52   :  { %p4827_p10 = por %p4826_p9, %p4825_p8 }
  0x54   :  { %p4828_p11 = pnand %p4827_p10, %p4821_p7 }
  0x56   :  { %4831 = shalt.err (!%p4828_p11)
}
  0x57   :  { %s4965_s7 = smov 192   ;;  %s4966_s3 = smov 12  }
  0x58   :  { %31 = dma.hbm_to_vmem [thread:$0]  %s5829_s0, 6144, %s26_s11, [#allocation3], %s4965_s7, %s4965_s7, %s4966_s3  }
  0x59   :  { %s4967_s12 = smov [#allocation7]   ;;  %s4968_s14 = smov [#allocation10]  }
  0x5a   :  { %s50_s13 = sshll.u32 %s4967_s12, 4  ;;  %s72_s15 = sshll.u32 %s4968_s14, 4  ;;  %s51_s13 = int_to_ptr.vmem [resolvable:$true] %s50_s13  ;;  %s73_s15 = int_to_ptr.vmem [resolvable:$true] %s72_s15 }
  0x5b   :  { %s4832_s19 = scalar_lea.hbm %s5831_s2, 64 }
  0x5c   :  { %p4833_p12 = scmp.ne.s32.totalorder %s5831_s2, %s4832_s19  ;;  %p4836_p13 = scmp.lt.u32.totalorder %s4832_s19, %s5831_s2 }
  0x5e   :  { %p4838_p0 = pnand %p4836_p13, %p4833_p12 }
  0x60   :  { %4841 = shalt.err (!%p4838_p0)
}
  0x61   :  { %s4842_s0 = scalar_lea.vmem %s51_s13, 64  ;;  %p4847_p2 = scmp.lt.s32.totalorder %s51_s13, %s51_s13 }
  0x62   :  { %p4843_p1 = scmp.ne.s32.totalorder %s51_s13, %s4842_s0  ;;  %p4848_p3 = scmp.lt.s32.totalorder %s4842_s0, %s4842_s0 }
  0x64   :  { %p4849_p4 = por %p4848_p3, %p4847_p2 }
  0x66   :  { %p4850_p5 = pnand %p4849_p4, %p4843_p1 }
  0x68   :  { %4853 = shalt.err (!%p4850_p5)
}
  0x69   :  { %53 = dma.hbm_to_vmem [thread:$0]  %s5831_s2, 64, %s51_s13, [#allocation6]  }
  0x6a   :  { %s4854_s26 = scalar_lea.hbm %s5833_s4, 32 }
  0x6b   :  { %p4855_p6 = scmp.ne.s32.totalorder %s5833_s4, %s4854_s26  ;;  %p4858_p7 = scmp.lt.u32.totalorder %s4854_s26, %s5833_s4 }
  0x6d   :  { %p4860_p8 = pnand %p4858_p7, %p4855_p6 }
  0x6f   :  { %4863 = shalt.err (!%p4860_p8)
}
  0x70   :  { %s4864_s3 = scalar_lea.vmem %s73_s15, 32  ;;  %p4869_p10 = scmp.lt.s32.totalorder %s73_s15, %s73_s15 }
  0x71   :  { %p4865_p9 = scmp.ne.s32.totalorder %s73_s15, %s4864_s3  ;;  %p4870_p11 = scmp.lt.s32.totalorder %s4864_s3, %s4864_s3 }
  0x73   :  { %p4871_p12 = por %p4870_p11, %p4869_p10 }
  0x75   :  { %p4872_p13 = pnand %p4871_p12, %p4865_p9 }
  0x77   :  { %4875 = shalt.err (!%p4872_p13)
}
  0x78   :  { %75 = dma.hbm_to_vmem [thread:$0]  %s5833_s4, 32, %s73_s15, [#allocation9]  }
  0x79   :  { %s4969_s29 = smov [#allocation13]   ;;  %s4970_s13 = smov [#allocation16]  }
  0x7a   :  { %s94_s12 = sshll.u32 %s4969_s29, 4  ;;  %s116_s14 = sshll.u32 %s4970_s13, 4  ;;  %s95_s12 = int_to_ptr.vmem [resolvable:$true] %s94_s12  ;;  %s117_s14 = int_to_ptr.vmem [resolvable:$true] %s116_s14 }
  0x7b   :  { %s4876_s19 = scalar_lea.hbm %s5835_s6, 16 }
  0x7c   :  { %p4877_p0 = scmp.ne.s32.totalorder %s5835_s6, %s4876_s19  ;;  %p4880_p1 = scmp.lt.u32.totalorder %s4876_s19, %s5835_s6 }
  0x7e   :  { %p4882_p2 = pnand %p4880_p1, %p4877_p0 }
  0x80   :  { %4885 = shalt.err (!%p4882_p2)
}
  0x81   :  { %s4886_s4 = scalar_lea.vmem %s95_s12, 16  ;;  %s4890_s15 = scalar_lea.vmem %s95_s12, 32 }
  0x82   :  { %p4887_p3 = scmp.ne.s32.totalorder %s95_s12, %s4886_s4  ;;  %p4891_p4 = scmp.lt.s32.totalorder %s95_s12, %s95_s12 }
  0x83   :  { %p4892_p5 = scmp.lt.s32.totalorder %s4890_s15, %s4886_s4 }
  0x85   :  { %p4893_p6 = por %p4892_p5, %p4891_p4 }
  0x87   :  { %p4894_p7 = pnand %p4893_p6, %p4887_p3 }
  0x89   :  { %4897 = shalt.err (!%p4894_p7)
}
  0x8a   :  { %97 = dma.hbm_to_vmem [thread:$0]  %s5835_s6, 16, %s95_s12, [#allocation12]  }
  0x8b   :  { %s4898_s25 = scalar_lea.hbm %s5837_s8, 16 }
  0x8c   :  { %p4899_p8 = scmp.ne.s32.totalorder %s5837_s8, %s4898_s25  ;;  %p4902_p9 = scmp.lt.u32.totalorder %s4898_s25, %s5837_s8 }
  0x8e   :  { %p4904_p10 = pnand %p4902_p9, %p4899_p8 }
  0x90   :  { %4907 = shalt.err (!%p4904_p10)
}
  0x91   :  { %s4908_s7 = scalar_lea.vmem %s117_s14, 16  ;;  %s4912_s3 = scalar_lea.vmem %s117_s14, 32 }
  0x92   :  { %p4909_p11 = scmp.ne.s32.totalorder %s117_s14, %s4908_s7  ;;  %p4913_p12 = scmp.lt.s32.totalorder %s117_s14, %s117_s14 }
  0x93   :  { %p4914_p13 = scmp.lt.s32.totalorder %s4912_s3, %s4908_s7 }
  0x95   :  { %p4915_p0 = por %p4914_p13, %p4913_p12 }
  0x97   :  { %p4916_p1 = pnand %p4915_p0, %p4909_p11 }
  0x99   :  { %4919 = shalt.err (!%p4916_p1)
}
  0x9a   :  { %119 = dma.hbm_to_vmem [thread:$0]  %s5837_s8, 16, %s117_s14, [#allocation15]  }
  0x9b   :  { %4942 = dma.done.wait [#allocation3], 6144  }
  0x9c   :  { %4943 = vsyncadd [#allocation3], 4294961152 }
  0x9d   :  { %4944 = dma.done.wait [#allocation6], 12352  }
  0x9e   :  { %4945 = vsyncadd [#allocation6], 4294954944 }
  0x9f   :  { %4946 = dma.done.wait [#allocation9], 8224  }
  0xa0   :  { %4947 = vsyncadd [#allocation9], 4294959072 }
  0xa1   :  { %4948 = dma.done.wait [#allocation12], 2064  }
  0xa2   :  { %4949 = vsyncadd [#allocation12], 4294965232 }
  0xa3   :  { %4950 = dma.done.wait [#allocation15], 1040  }
  0xa4   :  { %4951 = vsyncadd [#allocation15], 4294966256  ;;  %v4971_v0 = vmov 0   ;;  %v4390_v1 = vld [vmem:[#allocation5 + $0x4] ss:$16 sps:$4 sm:$0xff]   ;;  %s4972_s8 = smov [#allocation17]  }
  0xa5   :  { %1371 = vmatprep.mubr.bf16.mxu1 %v4971_v0  ;;  %v5135_v2 = vld [vmem:[#allocation5 + $0x204] ss:$16 sps:$4 sm:$0xff]   ;;  %1066 = vmatprep.subr.bf16.mxu0 %v4390_v1  ;;  %v4394_v3 = vld [vmem:[#allocation5] ss:$16 sps:$4 sm:$0xff]   ;;  %v4443_v34 = vld [vmem:[#allocation5 + $0xc] ss:$16 sps:$4 sm:$0xff]  }
  0xa6   :  { %v5137_v4 = vld [vmem:[#allocation5 + $0x200] ss:$16 sps:$4 sm:$0xff]   ;;  %3955 = vmatprep.subr.bf16.mxu1 %v5135_v2  ;;  %v4396_v5 = vld [vmem:[#allocation5 + $0x24] ss:$16 sps:$4 sm:$0xff]   ;;  %1067 = vmatpush1.bf16.msra.mxu0 %v4394_v3  ;;  %v4441_v36 = vld [vmem:[#allocation5 + $0x8] ss:$16 sps:$4 sm:$0xff]  }
  0xa7   :  { %3963 = vmatpush1.bf16.msra.mxu1 %v5137_v4  ;;  %v5141_v6 = vld [vmem:[#allocation5 + $0x224] ss:$16 sps:$4 sm:$0xff]   ;;  %v4400_v7 = vld [vmem:[#allocation5 + $0x20] ss:$16 sps:$4 sm:$0xff]   ;;  %1068 = vmatprep.subr.bf16.mxu0 %v4396_v5  ;;  %v4449_v39 = vld [vmem:[#allocation5 + $0x2c] ss:$16 sps:$4 sm:$0xff]  }
  0xa8   :  { %v5143_v8 = vld [vmem:[#allocation5 + $0x220] ss:$16 sps:$4 sm:$0xff]   ;;  %3956 = vmatprep.subr.bf16.mxu1 %v5141_v6  ;;  %v4402_v9 = vld [vmem:[#allocation5 + $0x44] ss:$16 sps:$4 sm:$0xff]   ;;  %v4447_v40 = vld [vmem:[#allocation5 + $0x28] ss:$16 sps:$4 sm:$0xff]  }
  0xa9   :  { %v5146_v10 = vld [vmem:[#allocation5 + $0x244] ss:$16 sps:$4 sm:$0xff]   ;;  %v4406_v11 = vld [vmem:[#allocation5 + $0x40] ss:$16 sps:$4 sm:$0xff]   ;;  %v4456_v43 = vld [vmem:[#allocation5 + $0x4c] ss:$16 sps:$4 sm:$0xff]  }
  0xaa   :  { %v5148_v12 = vld [vmem:[#allocation5 + $0x240] ss:$16 sps:$4 sm:$0xff]   ;;  %1069 = vmatpush1.bf16.msra.mxu0 %v4400_v7  ;;  %v4408_v13 = vld [vmem:[#allocation5 + $0x64] ss:$16 sps:$4 sm:$0xff]   ;;  %v4454_v45 = vld [vmem:[#allocation5 + $0x48] ss:$16 sps:$4 sm:$0xff]  }
  0xab   :  { %3964 = vmatpush1.bf16.msra.mxu1 %v5143_v8  ;;  %1070 = vmatprep.subr.bf16.mxu0 %v4402_v9  ;;  %v5152_v14 = vld [vmem:[#allocation5 + $0x264] ss:$16 sps:$4 sm:$0xff]   ;;  %v4412_v15 = vld [vmem:[#allocation5 + $0x60] ss:$16 sps:$4 sm:$0xff]   ;;  %v4462_v48 = vld [vmem:[#allocation5 + $0x6c] ss:$16 sps:$4 sm:$0xff]  }
  0xac   :  { %3957 = vmatprep.subr.bf16.mxu1 %v5146_v10  ;;  %v5155_v16 = vld [vmem:[#allocation5 + $0x260] ss:$16 sps:$4 sm:$0xff]   ;;  %v4414_v17 = vld [vmem:[#allocation5 + $0x84] ss:$16 sps:$4 sm:$0xff]   ;;  %v4460_v49 = vld [vmem:[#allocation5 + $0x68] ss:$16 sps:$4 sm:$0xff]  }
  0xad   :  { %v5158_v18 = vld [vmem:[#allocation5 + $0x284] ss:$16 sps:$4 sm:$0xff]   ;;  %v4418_v19 = vld [vmem:[#allocation5 + $0x80] ss:$16 sps:$4 sm:$0xff]   ;;  %v4469_v52 = vld [vmem:[#allocation5 + $0x8c] ss:$16 sps:$4 sm:$0xff]  }
  0xae   :  { %1071 = vmatpush1.bf16.msra.mxu0 %v4406_v11  ;;  %v5160_v20 = vld [vmem:[#allocation5 + $0x280] ss:$16 sps:$4 sm:$0xff]   ;;  %v4420_v21 = vld [vmem:[#allocation5 + $0xa4] ss:$16 sps:$4 sm:$0xff]   ;;  %v4467_v54 = vld [vmem:[#allocation5 + $0x88] ss:$16 sps:$4 sm:$0xff]  }
  0xaf   :  { %3965 = vmatpush1.bf16.msra.mxu1 %v5148_v12  ;;  %1072 = vmatprep.subr.bf16.mxu0 %v4408_v13  ;;  %v5164_v22 = vld [vmem:[#allocation5 + $0x2a4] ss:$16 sps:$4 sm:$0xff]   ;;  %v4424_v23 = vld [vmem:[#allocation5 + $0xa0] ss:$16 sps:$4 sm:$0xff]   ;;  %v4475_v58 = vld [vmem:[#allocation5 + $0xac] ss:$16 sps:$4 sm:$0xff]  }
  0xb0   :  { %3958 = vmatprep.subr.bf16.mxu1 %v5152_v14  ;;  %v5167_v24 = vld [vmem:[#allocation5 + $0x2a0] ss:$16 sps:$4 sm:$0xff]   ;;  %v4426_v25 = vld [vmem:[#allocation5 + $0xc4] ss:$16 sps:$4 sm:$0xff]   ;;  %v4473_v59 = vld [vmem:[#allocation5 + $0xa8] ss:$16 sps:$4 sm:$0xff]  }
  0xb1   :  { %v5170_v26 = vld [vmem:[#allocation5 + $0x2c4] ss:$16 sps:$4 sm:$0xff]   ;;  %v4430_v27 = vld [vmem:[#allocation5 + $0xc0] ss:$16 sps:$4 sm:$0xff]   ;;  %v4482_v62 = vld [vmem:[#allocation5 + $0xcc] ss:$16 sps:$4 sm:$0xff]  }
  0xb2   :  { %1073 = vmatpush1.bf16.msra.mxu0 %v4412_v15  ;;  %v5173_v28 = vld [vmem:[#allocation5 + $0x2c0] ss:$16 sps:$4 sm:$0xff]   ;;  %v4432_v29 = vld [vmem:[#allocation5 + $0xe4] ss:$16 sps:$4 sm:$0xff]   ;;  %v4480_v1 = vld [vmem:[#allocation5 + $0xc8] ss:$16 sps:$4 sm:$0xff]  }
  0xb3   :  { %3966 = vmatpush1.bf16.msra.mxu1 %v5155_v16  ;;  %1074 = vmatprep.subr.bf16.mxu0 %v4414_v17  ;;  %v5176_v30 = vld [vmem:[#allocation5 + $0x2e4] ss:$16 sps:$4 sm:$0xff]   ;;  %v4436_v31 = vld [vmem:[#allocation5 + $0xe0] ss:$16 sps:$4 sm:$0xff]   ;;  %v4488_v7 = vld [vmem:[#allocation5 + $0xec] ss:$16 sps:$4 sm:$0xff]  }
  0xb4   :  { %3959 = vmatprep.subr.bf16.mxu1 %v5158_v18  ;;  %v5178_v32 = vld [vmem:[#allocation5 + $0x2e0] ss:$16 sps:$4 sm:$0xff]   ;;  %v4438_v33 = vld [vmem:[#allocation5 + $0x104] ss:$16 sps:$4 sm:$0xff]   ;;  %v4486_v9 = vld [vmem:[#allocation5 + $0xe8] ss:$16 sps:$4 sm:$0xff]  }
  0xb5   :  { %v4440_v35 = vld [vmem:[#allocation2 + $0xc8] ss:$12 sps:$4 sm:$0xff]   ;;  %v4444_v37 = vld [vmem:[#allocation5 + $0x100] ss:$16 sps:$4 sm:$0xff]   ;;  %v4466_v53 = vld [vmem:[#allocation2 + $0xf8] ss:$12 sps:$4 sm:$0xff]  }
  0xb6   :  { %1075 = vmatpush1.bf16.msra.mxu0 %v4418_v19  ;;  %v4445_v38 = vld [vmem:[#allocation5 + $0x124] ss:$16 sps:$4 sm:$0xff]   ;;  %v4450_v41 = vld [vmem:[#allocation5 + $0x120] ss:$16 sps:$4 sm:$0xff]   ;;  %v4496_v13 = vld [vmem:[#allocation5 + $0x10c] ss:$16 sps:$4 sm:$0xff]  }
  0xb7   :  { %3967 = vmatpush1.bf16.msra.mxu1 %v5160_v20  ;;  %1076 = vmatprep.subr.bf16.mxu0 %v4420_v21  ;;  %v4451_v42 = vld [vmem:[#allocation5 + $0x144] ss:$16 sps:$4 sm:$0xff]   ;;  %v4453_v44 = vld [vmem:[#allocation2 + $0xe0] ss:$12 sps:$4 sm:$0xff]   ;;  %v4479_v63 = vld [vmem:[#allocation2 + $0x110] ss:$12 sps:$4 sm:$0xff]  }
  0xb8   :  { %3960 = vmatprep.subr.bf16.mxu1 %v5164_v22  ;;  %v4457_v46 = vld [vmem:[#allocation5 + $0x140] ss:$16 sps:$4 sm:$0xff]   ;;  %v4458_v47 = vld [vmem:[#allocation5 + $0x164] ss:$16 sps:$4 sm:$0xff]   ;;  %v4494_v19 = vld [vmem:[#allocation5 + $0x108] ss:$16 sps:$4 sm:$0xff]  }
  0xb9   :  { %v4463_v50 = vld [vmem:[#allocation5 + $0x160] ss:$16 sps:$4 sm:$0xff]   ;;  %v4464_v51 = vld [vmem:[#allocation5 + $0x184] ss:$16 sps:$4 sm:$0xff]   ;;  %v4499_v21 = vld [vmem:[#allocation5 + $0x12c] ss:$16 sps:$4 sm:$0xff]  }
  0xba   :  { %1077 = vmatpush1.bf16.msra.mxu0 %v4424_v23  ;;  %v4470_v55 = vld [vmem:[#allocation5 + $0x180] ss:$16 sps:$4 sm:$0xff]   ;;  %v4471_v57 = vld [vmem:[#allocation5 + $0x1a4] ss:$16 sps:$4 sm:$0xff]   ;;  %v5195_v23 = vld [vmem:[#allocation2 + $0x1c] ss:$12 sps:$4 sm:$0xff]  }
  0xbb   :  { %3968 = vmatpush1.bf16.msra.mxu1 %v5167_v24  ;;  %1078 = vmatprep.subr.bf16.mxu0 %v4426_v25  ;;  %v5185_v56 = vld [vmem:[#allocation2 + $0x4] ss:$12 sps:$4 sm:$0xff]   ;;  %v5189_v15 = vld [vmem:[#allocation2] ss:$12 sps:$4 sm:$0xff]   ;;  %v5192_v17 = vld [vmem:[#allocation2 + $0x128] ss:$12 sps:$4 sm:$0xff]  }
  0xbc   :  { %3961 = vmatprep.subr.bf16.mxu1 %v5170_v26  ;;  %1098 = vmatprep.mubr.bf16.mxu0 %v5185_v56  ;;  %v4476_v60 = vld [vmem:[#allocation5 + $0x1a0] ss:$16 sps:$4 sm:$0xff]   ;;  %v4477_v61 = vld [vmem:[#allocation5 + $0x1c4] ss:$16 sps:$4 sm:$0xff]   ;;  %v4497_v25 = vld [vmem:[#allocation5 + $0x128] ss:$16 sps:$4 sm:$0xff]  }
  0xbd   :  { %v4483_v3 = vld [vmem:[#allocation5 + $0x1c0] ss:$16 sps:$4 sm:$0xff]   ;;  %v4484_v5 = vld [vmem:[#allocation5 + $0x1e4] ss:$16 sps:$4 sm:$0xff]   ;;  %s3521_s24 = sshll.u32 %s4972_s8, 4  ;;  %s3522_s24 = int_to_ptr.vmem [resolvable:$true] %s3521_s24 }
  0xbe   :  { %1079 = vmatpush1.bf16.msra.mxu0 %v4430_v27  ;;  %v4489_v11 = vld [vmem:[#allocation5 + $0x1e0] ss:$16 sps:$4 sm:$0xff]   ;;  %v4506_v27 = vld [vmem:[#allocation5 + $0x14c] ss:$16 sps:$4 sm:$0xff]   ;;  %s4920_s29 = scalar_lea.vmem %s3522_s24, 4096  ;;  %p4925_p3 = scmp.lt.s32.totalorder %s3522_s24, %s3522_s24 }
  0xbf   :  { %3969 = vmatpush1.bf16.msra.mxu1 %v5173_v28  ;;  %1080 = vmatprep.subr.bf16.mxu0 %v4432_v29  ;;  %v5202_v29 = vld [vmem:[#allocation2 + $0x18] ss:$12 sps:$4 sm:$0xff]   ;;  %p4921_p2 = scmp.ne.s32.totalorder %s3522_s24, %s4920_s29  ;;  %p4926_p4 = scmp.lt.s32.totalorder %s4920_s29, %s4920_s29 }
  0xc0   :  { %3962 = vmatprep.subr.bf16.mxu1 %v5176_v30 }
  0xc1   :  { %p4927_p5 = por %p4926_p4, %p4925_p3 }
  0xc2   :  { %1081 = vmatpush1.bf16.msra.mxu0 %v4436_v31  ;;  %v4504_v31 = vld [vmem:[#allocation5 + $0x148] ss:$16 sps:$4 sm:$0xff]  }
  0xc3   :  { %3970 = vmatpush1.bf16.msra.mxu1 %v5178_v32  ;;  %1082 = vmatprep.subr.bf16.mxu0 %v4438_v33  ;;  %v5207_v33 = vld [vmem:[#allocation2 + $0x34] ss:$12 sps:$4 sm:$0xff]   ;;  %p4928_p6 = pnand %p4927_p5, %p4921_p2 }
  0xc4   :  { %1452 = vmatprep.subr.bf16.mxu1 %v4443_v34  ;;  %v4507_v34 = vld [vmem:[#allocation5 + $0x168] ss:$16 sps:$4 sm:$0xff]  }
  0xc6   :  { %1372 = vmatmul.mubr.bf16.vlgmr.msra.gmra.mrb[0].mxu1 %v4440_v35  ;;  %1083 = vmatpush1.bf16.msra.mxu0 %v4444_v37  ;;  %v5215_v35 = vld [vmem:[#allocation2 + $0x30] ss:$12 sps:$4 sm:$0xff]  }
  0xc7   :  { %1453 = vmatpush1.bf16.msra.mxu1 %v4441_v36  ;;  %1084 = vmatprep.subr.bf16.mxu0 %v4445_v38  ;;  %v4514_v36 = vld [vmem:[#allocation5 + $0x188] ss:$16 sps:$4 sm:$0xff]   ;;  %v4519_v37 = vld [vmem:[#allocation5 + $0x1ac] ss:$16 sps:$4 sm:$0xff]  }
  0xc8   :  { %1454 = vmatprep.subr.bf16.mxu1 %v4449_v39  ;;  %1381 = vmatprep.mubr.bf16.mxu1 %v4971_v0  ;;  %v4517_v38 = vld [vmem:[#allocation5 + $0x1a8] ss:$16 sps:$4 sm:$0xff]   ;;  %v5231_v39 = vld [vmem:[#allocation2 + $0x170] ss:$12 sps:$4 sm:$0xff]  }
  0xca   :  { %1085 = vmatpush1.bf16.msra.mxu0 %v4450_v41  ;;  %v4529_v41 = vld [vmem:[#allocation5 + $0x1ec] ss:$16 sps:$4 sm:$0xff]  }
  0xcb   :  { %1455 = vmatpush1.bf16.msra.mxu1 %v4447_v40  ;;  %1086 = vmatprep.subr.bf16.mxu0 %v4451_v42  ;;  %v5234_v40 = vld [vmem:[#allocation2 + $0x64] ss:$12 sps:$4 sm:$0xff]   ;;  %v4527_v42 = vld [vmem:[#allocation5 + $0x1e8] ss:$16 sps:$4 sm:$0xff]  }
  0xcc   :  { %1456 = vmatprep.subr.bf16.mxu1 %v4456_v43  ;;  %v4567_v43 = vld [vmem:[#allocation5 + $0x208] ss:$16 sps:$4 sm:$0xff]  }
  0xce   :  { %1382 = vmatmul.mubr.bf16.gmra.mrb[4].mxu1 %v4453_v44  ;;  %1087 = vmatpush1.bf16.msra.mxu0 %v4457_v46  ;;  %v4572_v44 = vld [vmem:[#allocation5 + $0x22c] ss:$16 sps:$4 sm:$0xff]  }
  0xcf   :  { %1457 = vmatpush1.bf16.msra.mxu1 %v4454_v45  ;;  %1088 = vmatprep.subr.bf16.mxu0 %v4458_v47  ;;  %v4570_v45 = vld [vmem:[#allocation5 + $0x228] ss:$16 sps:$4 sm:$0xff]   ;;  %v4576_v46 = vld [vmem:[#allocation5 + $0x24c] ss:$16 sps:$4 sm:$0xff]  }
  0xd0   :  { %1458 = vmatprep.subr.bf16.mxu1 %v4462_v48  ;;  %1391 = vmatprep.mubr.bf16.mxu1 %v4971_v0  ;;  %v4535_v47 = vld [vmem:[#allocation2 + $0x78] ss:$12 sps:$4 sm:$0xff]   ;;  %v4579_v48 = vld [vmem:[#allocation5 + $0x26c] ss:$16 sps:$4 sm:$0xff]  }
  0xd2   :  { %1089 = vmatpush1.bf16.msra.mxu0 %v4463_v50  ;;  %v4538_v50 = vld [vmem:[#allocation2 + $0x90] ss:$12 sps:$4 sm:$0xff]  }
  0xd3   :  { %1459 = vmatpush1.bf16.msra.mxu1 %v4460_v49  ;;  %1090 = vmatprep.subr.bf16.mxu0 %v4464_v51  ;;  %v4583_v49 = vld [vmem:[#allocation5 + $0x28c] ss:$16 sps:$4 sm:$0xff]   ;;  %v4581_v51 = vld [vmem:[#allocation5 + $0x288] ss:$16 sps:$4 sm:$0xff]  }
  0xd4   :  { %1460 = vmatprep.subr.bf16.mxu1 %v4469_v52  ;;  %v4586_v52 = vld [vmem:[#allocation5 + $0x2ac] ss:$16 sps:$4 sm:$0xff]  }
  0xd6   :  { %1392 = vmatmul.mubr.bf16.gmra.mrb[8].mxu1 %v4466_v53  ;;  %1091 = vmatpush1.bf16.msra.mxu0 %v4470_v55  ;;  %v4590_v53 = vld [vmem:[#allocation5 + $0x2cc] ss:$16 sps:$4 sm:$0xff]   ;;  %v4542_v55 = vld [vmem:[#allocation2 + $0xc4] ss:$12 sps:$4 sm:$0xff]  }
  0xd7   :  { %1461 = vmatpush1.bf16.msra.mxu1 %v4467_v54  ;;  %1092 = vmatprep.subr.bf16.mxu0 %v4471_v57  ;;  %v4541_v54 = vld [vmem:[#allocation2 + $0xa8] ss:$12 sps:$4 sm:$0xff]   ;;  %v4593_v57 = vld [vmem:[#allocation5 + $0x2ec] ss:$16 sps:$4 sm:$0xff]  }
  0xd8   :  { %1462 = vmatprep.subr.bf16.mxu1 %v4475_v58  ;;  %1401 = vmatprep.mubr.bf16.mxu1 %v4971_v0  ;;  %v4591_v58 = vld [vmem:[#allocation5 + $0x2e8] ss:$16 sps:$4 sm:$0xff]  }
  0xda   :  { %1093 = vmatpush1.bf16.msra.mxu0 %v4476_v60  ;;  %v4545_v60 = vld [vmem:[#allocation2 + $0xdc] ss:$12 sps:$4 sm:$0xff]  }
  0xdb   :  { %1463 = vmatpush1.bf16.msra.mxu1 %v4473_v59  ;;  %1094 = vmatprep.subr.bf16.mxu0 %v4477_v61  ;;  %v4544_v59 = vld [vmem:[#allocation2 + $0xc0] ss:$12 sps:$4 sm:$0xff]   ;;  %v4547_v61 = vld [vmem:[#allocation2 + $0xd8] ss:$12 sps:$4 sm:$0xff]  }
  0xdc   :  { %1464 = vmatprep.subr.bf16.mxu1 %v4482_v62  ;;  %v4548_v62 = vld [vmem:[#allocation2 + $0xf4] ss:$12 sps:$4 sm:$0xff]  }
  0xde   :  { %1402 = vmatmul.mubr.bf16.gmra.mrb[12].mxu1 %v4479_v63  ;;  %1095 = vmatpush1.bf16.msra.mxu0 %v4483_v3  ;;  %v4550_v63 = vld [vmem:[#allocation2 + $0xf0] ss:$12 sps:$4 sm:$0xff]   ;;  %v4553_v3 = vld [vmem:[#allocation2 + $0x108] ss:$12 sps:$4 sm:$0xff]  }
  0xdf   :  { %1465 = vmatpush1.bf16.msra.mxu1 %v4480_v1  ;;  %1096 = vmatprep.subr.bf16.mxu0 %v4484_v5  ;;  %v4551_v1 = vld [vmem:[#allocation2 + $0x10c] ss:$12 sps:$4 sm:$0xff]   ;;  %v4554_v5 = vld [vmem:[#allocation2 + $0x124] ss:$12 sps:$4 sm:$0xff]  }
  0xe0   :  { %1466 = vmatprep.subr.bf16.mxu1 %v4488_v7  ;;  %1411 = vmatprep.mubr.bf16.mxu1 %v4971_v0  ;;  %v4556_v7 = vld [vmem:[#allocation2 + $0x120] ss:$12 sps:$4 sm:$0xff]  }
  0xe2   :  { %1097 = vmatpush1.bf16.msra.mxu0 %v4489_v11  ;;  %v4559_v11 = vld [vmem:[#allocation2 + $0x138] ss:$12 sps:$4 sm:$0xff]  }
  0xe3   :  { %1467 = vmatpush1.bf16.msra.mxu1 %v4486_v9  ;;  %1259 = vmatprep.subr.bf16.mxu0 %v5135_v2  ;;  %v5205_v2 = vld [vmem:[#allocation2 + $0x140] ss:$12 sps:$4 sm:$0xff]   ;;  %v4557_v9 = vld [vmem:[#allocation2 + $0x13c] ss:$12 sps:$4 sm:$0xff]  }
  0xe4   :  { %1468 = vmatprep.subr.bf16.mxu1 %v4496_v13  ;;  %v4560_v13 = vld [vmem:[#allocation2 + $0x154] ss:$12 sps:$4 sm:$0xff]  }
  0xe5   :  { %1099 = vmatmul.mubr.bf16.vlgmr.msra.gmra.mrb[0].mxu0 %v5189_v15 }
  0xe6   :  { %1412 = vmatmul.mubr.bf16.gmra.mrb[16].mxu1 %v5192_v17  ;;  %1260 = vmatpush1.bf16.msra.mxu0 %v5137_v4  ;;  %v4509_v4 = vld [vmem:[#allocation5 + $0x16c] ss:$16 sps:$4 sm:$0xff]  }
  0xe7   :  { %1469 = vmatpush1.bf16.msra.mxu1 %v4494_v19  ;;  %1108 = vmatprep.mubr.bf16.mxu0 %v5195_v23  ;;  %v4563_v19 = vld [vmem:[#allocation2 + $0x16c] ss:$12 sps:$4 sm:$0xff]  }
  0xe8   :  { %1470 = vmatprep.subr.bf16.mxu1 %v4499_v21  ;;  %1421 = vmatprep.mubr.bf16.mxu1 %v4971_v0  ;;  %v4565_v21 = vld [vmem:[#allocation2 + $0x168] ss:$12 sps:$4 sm:$0xff]  }
  0xe9   :  { %1261 = vmatprep.subr.bf16.mxu0 %v5141_v6  ;;  %v4516_v6 = vld [vmem:[#allocation5 + $0x18c] ss:$16 sps:$4 sm:$0xff]  }
  0xea   :  { %1262 = vmatpush1.bf16.msra.mxu0 %v5143_v8  ;;  %v5218_v8 = vld [vmem:[#allocation2 + $0x158] ss:$12 sps:$4 sm:$0xff]  }
  0xeb   :  { %1471 = vmatpush1.bf16.msra.mxu1 %v4497_v25  ;;  %1263 = vmatprep.subr.bf16.mxu0 %v5146_v10  ;;  %v5221_v10 = vld [vmem:[#allocation2 + $0x4c] ss:$12 sps:$4 sm:$0xff]  }
  0xec   :  { %1472 = vmatprep.subr.bf16.mxu1 %v4506_v27  ;;  %v4573_v25 = vld [vmem:[#allocation2 + $0x20] ss:$12 sps:$4 sm:$0xff]   ;;  %v4580_v27 = vld [vmem:[#allocation2 + $0x38] ss:$12 sps:$4 sm:$0xff]  }
  0xed   :  { %1109 = vmatmul.mubr.bf16.gmra.mrb[4].mxu0 %v5202_v29 }
  0xee   :  { %1422 = vmatmul.mubr.bf16.gmra.mrb[20].mxu1 %v5205_v2  ;;  %1118 = vmatprep.mubr.bf16.mxu0 %v5207_v33 }
  0xef   :  { %1473 = vmatpush1.bf16.msra.mxu1 %v4504_v31  ;;  %1431 = vmatprep.mubr.bf16.mxu1 %v4971_v0  ;;  %v4594_v31 = vld [vmem:[#allocation2 + $0x68] ss:$12 sps:$4 sm:$0xff]  }
  0xf0   :  { %1474 = vmatprep.subr.bf16.mxu1 %v4509_v4  ;;  %1264 = vmatpush1.bf16.msra.mxu0 %v5148_v12  ;;  %v4526_v12 = vld [vmem:[#allocation5 + $0x1cc] ss:$16 sps:$4 sm:$0xff]  }
  0xf1   :  { %1265 = vmatprep.subr.bf16.mxu0 %v5152_v14  ;;  %v5228_v14 = vld [vmem:[#allocation2 + $0x48] ss:$12 sps:$4 sm:$0xff]   ;;  %v4598_v4 = vld [vmem:[#allocation8] ss:$8 sps:$4 sm:$0xff]  }
  0xf3   :  { %1475 = vmatpush1.bf16.msra.mxu1 %v4507_v34  ;;  %v4603_v34 = vld [vmem:[#allocation8 + $0x14] ss:$8 sps:$4 sm:$0xff]  }
  0xf4   :  { %1476 = vmatprep.subr.bf16.mxu1 %v4516_v6  ;;  %1266 = vmatpush1.bf16.msra.mxu0 %v5155_v16  ;;  %v4524_v16 = vld [vmem:[#allocation5 + $0x1c8] ss:$16 sps:$4 sm:$0xff]   ;;  %v4601_v6 = vld [vmem:[#allocation8 + $0x10] ss:$8 sps:$4 sm:$0xff]  }
  0xf5   :  { %1119 = vmatmul.mubr.bf16.gmra.mrb[8].mxu0 %v5215_v35  ;;  %1267 = vmatprep.subr.bf16.mxu0 %v5158_v18  ;;  %v4569_v18 = vld [vmem:[#allocation5 + $0x20c] ss:$16 sps:$4 sm:$0xff]  }
  0xf6   :  { %1432 = vmatmul.mubr.bf16.gmra.mrb[24].mxu1 %v5218_v8  ;;  %1128 = vmatprep.mubr.bf16.mxu0 %v5221_v10 }
  0xf7   :  { %1477 = vmatpush1.bf16.msra.mxu1 %v4514_v36  ;;  %1441 = vmatprep.mubr.bf16.mxu1 %v4971_v0  ;;  %v4606_v36 = vld [vmem:[#allocation8 + $0x24] ss:$8 sps:$4 sm:$0xff]  }
  0xf8   :  { %1478 = vmatprep.subr.bf16.mxu1 %v4519_v37  ;;  %1268 = vmatpush1.bf16.msra.mxu0 %v5160_v20  ;;  %v4532_v20 = vld [vmem:[#allocation2 + $0x60] ss:$12 sps:$4 sm:$0xff]  }
  0xf9   :  { %1269 = vmatprep.subr.bf16.mxu0 %v5164_v22  ;;  %v4533_v22 = vld [vmem:[#allocation2 + $0x7c] ss:$12 sps:$4 sm:$0xff]   ;;  %v4609_v37 = vld [vmem:[#allocation8 + $0x34] ss:$8 sps:$4 sm:$0xff]  }
  0xfb   :  { %1479 = vmatpush1.bf16.msra.mxu1 %v4517_v38  ;;  %v4607_v38 = vld [vmem:[#allocation8 + $0x30] ss:$8 sps:$4 sm:$0xff]  }
  0xfc   :  { %1480 = vmatprep.subr.bf16.mxu1 %v4526_v12  ;;  %1270 = vmatpush1.bf16.msra.mxu0 %v5167_v24  ;;  %v4536_v24 = vld [vmem:[#allocation2 + $0x94] ss:$12 sps:$4 sm:$0xff]   ;;  %v5267_v12 = vld [vmem:[#allocation2 + $0x98] ss:$12 sps:$4 sm:$0xff]  }
  0xfd   :  { %1129 = vmatmul.mubr.bf16.gmra.mrb[12].mxu0 %v5228_v14  ;;  %1271 = vmatprep.subr.bf16.mxu0 %v5170_v26  ;;  %v4574_v26 = vld [vmem:[#allocation5 + $0x248] ss:$16 sps:$4 sm:$0xff]  }
  0xfe   :  { %1442 = vmatmul.mubr.bf16.gmra.mrb[28].mxu1 %v5231_v39  ;;  %1138 = vmatprep.mubr.bf16.mxu0 %v5234_v40 }
  0xff   :  { %1481 = vmatpush1.bf16.msra.mxu1 %v4524_v16  ;;  %1484 = vmatprep.mubr.bf16.mxu1 %v5185_v56  ;;  %v4588_v56 = vld [vmem:[#allocation5 + $0x2c8] ss:$16 sps:$4 sm:$0xff]   ;;  %v4610_v16 = vld [vmem:[#allocation8 + $0x40] ss:$8 sps:$4 sm:$0xff]  }
 0x100   :  { %1482 = vmatprep.subr.bf16.mxu1 %v4529_v41  ;;  %1272 = vmatpush1.bf16.msra.mxu0 %v5173_v28  ;;  %v4577_v28 = vld [vmem:[#allocation5 + $0x268] ss:$16 sps:$4 sm:$0xff]   ;;  %v4613_v41 = vld [vmem:[#allocation8 + $0x50] ss:$8 sps:$4 sm:$0xff]  }
 0x101   :  { %1273 = vmatprep.subr.bf16.mxu0 %v5176_v30  ;;  %v4539_v30 = vld [vmem:[#allocation2 + $0xac] ss:$12 sps:$4 sm:$0xff]  }
 0x103   :  { %1483 = vmatpush1.bf16.msra.mxu1 %v4527_v42 }
 0x104   :  { %1645 = vmatprep.subr.bf16.mxu1 %v4569_v18  ;;  %1274 = vmatpush1.bf16.msra.mxu0 %v5178_v32  ;;  %v4584_v32 = vld [vmem:[#allocation5 + $0x2a8] ss:$16 sps:$4 sm:$0xff]   ;;  %v5274_v18 = vld [vmem:[#allocation2 + $0xb0] ss:$12 sps:$4 sm:$0xff]  }
 0x105   :  { %1139 = vmatmul.mubr.bf16.gmra.mrb[16].mxu0 %v4532_v20 }
 0x106   :  { %1485 = vmatmul.mubr.bf16.vlgmr.msra.gmra.mrb[32].mxu1 %v5189_v15  ;;  %1148 = vmatprep.mubr.bf16.mxu0 %v4533_v22  ;;  %v4562_v15 = vld [vmem:[#allocation2 + $0x150] ss:$12 sps:$4 sm:$0xff]  }
 0x107   :  { %1494 = vmatprep.mubr.bf16.mxu1 %v5195_v23  ;;  %1646 = vmatpush1.bf16.msra.mxu1 %v4567_v43  ;;  %v4566_v23 = vld [vmem:[#allocation2 + $0x8] ss:$12 sps:$4 sm:$0xff]  }
 0x108   :  { %1647 = vmatprep.subr.bf16.mxu1 %v4572_v44  ;;  %v4616_v44 = vld [vmem:[#allocation8 + $0x60] ss:$8 sps:$4 sm:$0xff]  }
 0x10b   :  { %1648 = vmatpush1.bf16.msra.mxu1 %v4570_v45 }
 0x10c   :  { %1649 = vmatprep.subr.bf16.mxu1 %v4576_v46  ;;  %v4621_v46 = vld [vmem:[#allocation8 + $0x74] ss:$8 sps:$4 sm:$0xff]  }
 0x10d   :  { %1149 = vmatmul.mubr.bf16.gmra.mrb[20].mxu0 %v4535_v47 }
 0x10e   :  { %1495 = vmatmul.mubr.bf16.gmra.mrb[36].mxu1 %v5202_v29  ;;  %1158 = vmatprep.mubr.bf16.mxu0 %v4536_v24  ;;  %v4587_v29 = vld [vmem:[#allocation2 + $0x50] ss:$12 sps:$4 sm:$0xff]  }
 0x10f   :  { %1504 = vmatprep.mubr.bf16.mxu1 %v5207_v33  ;;  %1650 = vmatpush1.bf16.msra.mxu1 %v4574_v26  ;;  %v4600_v33 = vld [vmem:[#allocation8 + $0x4] ss:$8 sps:$4 sm:$0xff]  }
 0x110   :  { %1651 = vmatprep.subr.bf16.mxu1 %v4579_v48  ;;  %2426 = vmatprep.subr.bf16.mxu0 %v4600_v33  ;;  %v4624_v48 = vld [vmem:[#allocation8 + $0x84] ss:$8 sps:$4 sm:$0xff]  }
 0x111   :  { %v4718_v33 = vld [vmem:[#allocation2 + $0xc8] ss:$12 sps:$4 sm:$0xff]  }
 0x113   :  { %1652 = vmatpush1.bf16.msra.mxu1 %v4577_v28 }
 0x114   :  { %1653 = vmatprep.subr.bf16.mxu1 %v4583_v49  ;;  %v4622_v49 = vld [vmem:[#allocation8 + $0x80] ss:$8 sps:$4 sm:$0xff]  }
 0x115   :  { %1159 = vmatmul.mubr.bf16.gmra.mrb[24].mxu0 %v4538_v50 }
 0x116   :  { %1505 = vmatmul.mubr.bf16.gmra.mrb[40].mxu1 %v5215_v35  ;;  %1168 = vmatprep.mubr.bf16.mxu0 %v4539_v30  ;;  %v5262_v35 = vld [vmem:[#allocation2 + $0x80] ss:$12 sps:$4 sm:$0xff]  }
 0x117   :  { %1514 = vmatprep.mubr.bf16.mxu1 %v5221_v10  ;;  %1654 = vmatpush1.bf16.msra.mxu1 %v4581_v51  ;;  %v4604_v10 = vld [vmem:[#allocation8 + $0x20] ss:$8 sps:$4 sm:$0xff]   ;;  %v4625_v51 = vld [vmem:[#allocation8 + $0x90] ss:$8 sps:$4 sm:$0xff]  }
 0x118   :  { %1655 = vmatprep.subr.bf16.mxu1 %v4586_v52 }
 0x11b   :  { %1656 = vmatpush1.bf16.msra.mxu1 %v4584_v32 }
 0x11c   :  { %1657 = vmatprep.subr.bf16.mxu1 %v4590_v53  ;;  %v4630_v53 = vld [vmem:[#allocation8 + $0xa4] ss:$8 sps:$4 sm:$0xff]  }
 0x11d   :  { %1169 = vmatmul.mubr.bf16.gmra.mrb[28].mxu0 %v4541_v54 }
 0x11e   :  { %1515 = vmatmul.mubr.bf16.gmra.mrb[44].mxu1 %v5228_v14  ;;  %1178 = vmatprep.mubr.bf16.mxu0 %v4542_v55  ;;  %v4612_v14 = vld [vmem:[#allocation8 + $0x44] ss:$8 sps:$4 sm:$0xff]  }
 0x11f   :  { %1524 = vmatprep.mubr.bf16.mxu1 %v5234_v40  ;;  %1658 = vmatpush1.bf16.msra.mxu1 %v4588_v56  ;;  %v4615_v40 = vld [vmem:[#allocation8 + $0x54] ss:$8 sps:$4 sm:$0xff]  }
 0x120   :  { %1659 = vmatprep.subr.bf16.mxu1 %v4593_v57  ;;  %v4633_v57 = vld [vmem:[#allocation8 + $0xb4] ss:$8 sps:$4 sm:$0xff]  }
 0x123   :  { %1660 = vmatpush1.bf16.msra.mxu1 %v4591_v58  ;;  %v4631_v58 = vld [vmem:[#allocation8 + $0xb0] ss:$8 sps:$4 sm:$0xff]  }
 0x125   :  { %1179 = vmatmul.mubr.bf16.gmra.mrb[32].mxu0 %v4544_v59 }
 0x126   :  { %1525 = vmatmul.mubr.bf16.gmra.mrb[48].mxu1 %v4532_v20  ;;  %1188 = vmatprep.mubr.bf16.mxu0 %v4545_v60 }
 0x127   :  { %1534 = vmatprep.mubr.bf16.mxu1 %v4533_v22  ;;  %v4618_v22 = vld [vmem:[#allocation8 + $0x64] ss:$8 sps:$4 sm:$0xff]  }
 0x12d   :  { %1189 = vmatmul.mubr.bf16.gmra.mrb[36].mxu0 %v4547_v61 }
 0x12e   :  { %1535 = vmatmul.mubr.bf16.gmra.mrb[52].mxu1 %v4535_v47  ;;  %1198 = vmatprep.mubr.bf16.mxu0 %v4548_v62  ;;  %v4619_v47 = vld [vmem:[#allocation8 + $0x70] ss:$8 sps:$4 sm:$0xff]  }
 0x12f   :  { %1544 = vmatprep.mubr.bf16.mxu1 %v4536_v24 }
 0x135   :  { %1199 = vmatmul.mubr.bf16.gmra.mrb[40].mxu0 %v4550_v63 }
 0x136   :  { %1545 = vmatmul.mubr.bf16.gmra.mrb[56].mxu1 %v4538_v50  ;;  %1208 = vmatprep.mubr.bf16.mxu0 %v4551_v1 }
 0x137   :  { %1554 = vmatprep.mubr.bf16.mxu1 %v4539_v30  ;;  %v4627_v30 = vld [vmem:[#allocation8 + $0x94] ss:$8 sps:$4 sm:$0xff]  }
 0x13d   :  { %1209 = vmatmul.mubr.bf16.gmra.mrb[44].mxu0 %v4553_v3 }
 0x13e   :  { %1555 = vmatmul.mubr.bf16.gmra.mrb[60].mxu1 %v4541_v54  ;;  %1218 = vmatprep.mubr.bf16.mxu0 %v4554_v5 }
 0x13f   :  { %1564 = vmatprep.mubr.bf16.mxu1 %v4542_v55  ;;  %v4628_v55 = vld [vmem:[#allocation8 + $0xa0] ss:$8 sps:$4 sm:$0xff]  }
 0x145   :  { %1219 = vmatmul.mubr.bf16.gmra.mrb[48].mxu0 %v4556_v7 }
 0x146   :  { %1565 = vmatmul.mubr.bf16.gmra.mrb[64].mxu1 %v4544_v59  ;;  %1228 = vmatprep.mubr.bf16.mxu0 %v4557_v9 }
 0x147   :  { %1574 = vmatprep.mubr.bf16.mxu1 %v4545_v60 }
 0x14d   :  { %1229 = vmatmul.mubr.bf16.gmra.mrb[52].mxu0 %v4559_v11 }
 0x14e   :  { %1575 = vmatmul.mubr.bf16.gmra.mrb[68].mxu1 %v4547_v61  ;;  %1238 = vmatprep.mubr.bf16.mxu0 %v4560_v13  ;;  %v4636_v61 = vld [vmem:[#allocation8 + $0xc4] ss:$8 sps:$4 sm:$0xff]  }
 0x14f   :  { %1584 = vmatprep.mubr.bf16.mxu1 %v4548_v62 }
 0x155   :  { %1239 = vmatmul.mubr.bf16.gmra.mrb[56].mxu0 %v4562_v15 }
 0x156   :  { %1585 = vmatmul.mubr.bf16.gmra.mrb[72].mxu1 %v4550_v63  ;;  %1248 = vmatprep.mubr.bf16.mxu0 %v4563_v19  ;;  %v4634_v63 = vld [vmem:[#allocation8 + $0xc0] ss:$8 sps:$4 sm:$0xff]  }
 0x157   :  { %1594 = vmatprep.mubr.bf16.mxu1 %v4551_v1 }
 0x15d   :  { %1249 = vmatmul.mubr.bf16.gmra.mrb[60].mxu0 %v4565_v21 }
 0x15e   :  { %1595 = vmatmul.mubr.bf16.gmra.mrb[76].mxu1 %v4553_v3  ;;  %1291 = vmatprep.mubr.bf16.mxu0 %v4971_v0  ;;  %v4639_v3 = vld [vmem:[#allocation8 + $0xd4] ss:$8 sps:$4 sm:$0xff]  }
 0x15f   :  { %1604 = vmatprep.mubr.bf16.mxu1 %v4554_v5  ;;  %v4637_v5 = vld [vmem:[#allocation8 + $0xd0] ss:$8 sps:$4 sm:$0xff]  }
 0x165   :  { %1292 = vmatmul.mubr.bf16.vlgmr.msra.gmra.mrb[0].mxu0 %v4566_v23 }
 0x166   :  { %1605 = vmatmul.mubr.bf16.gmra.mrb[80].mxu1 %v4556_v7  ;;  %1301 = vmatprep.mubr.bf16.mxu0 %v4971_v0 }
 0x167   :  { %1614 = vmatprep.mubr.bf16.mxu1 %v4557_v9  ;;  %2427 = vmatpush1.bf16.msra.mxu0 %v4598_v4 }
 0x168   :  { %2428 = vmatprep.subr.bf16.mxu0 %v4603_v34  ;;  %v4648_v34 = vld [vmem:[#allocation8 + $0x104] ss:$8 sps:$4 sm:$0xff]  }
 0x16b   :  { %2429 = vmatpush1.bf16.msra.mxu0 %v4601_v6 }
 0x16c   :  { %2430 = vmatprep.subr.bf16.mxu0 %v4606_v36 }
 0x16d   :  { %1302 = vmatmul.mubr.bf16.gmra.mrb[4].mxu0 %v4573_v25 }
 0x16e   :  { %1615 = vmatmul.mubr.bf16.gmra.mrb[84].mxu1 %v4559_v11  ;;  %1311 = vmatprep.mubr.bf16.mxu0 %v4971_v0  ;;  %v4642_v11 = vld [vmem:[#allocation8 + $0xe4] ss:$8 sps:$4 sm:$0xff]  }
 0x16f   :  { %1624 = vmatprep.mubr.bf16.mxu1 %v4560_v13  ;;  %2431 = vmatpush1.bf16.msra.mxu0 %v4604_v10  ;;  %v4719_v10 = vld [vmem:[#allocation2 + $0xe0] ss:$12 sps:$4 sm:$0xff]  }
 0x170   :  { %2432 = vmatprep.subr.bf16.mxu0 %v4609_v37 }
 0x173   :  { %2433 = vmatpush1.bf16.msra.mxu0 %v4607_v38 }
 0x174   :  { %2434 = vmatprep.subr.bf16.mxu0 %v4612_v14 }
 0x175   :  { %1312 = vmatmul.mubr.bf16.gmra.mrb[8].mxu0 %v4580_v27 }
 0x176   :  { %1625 = vmatmul.mubr.bf16.gmra.mrb[88].mxu1 %v4562_v15  ;;  %1321 = vmatprep.mubr.bf16.mxu0 %v4971_v0  ;;  %v4640_v15 = vld [vmem:[#allocation8 + $0xe0] ss:$8 sps:$4 sm:$0xff]  }
 0x177   :  { %1634 = vmatprep.mubr.bf16.mxu1 %v4563_v19  ;;  %2435 = vmatpush1.bf16.msra.mxu0 %v4610_v16  ;;  %v4720_v16 = vld [vmem:[#allocation2 + $0xf8] ss:$12 sps:$4 sm:$0xff]  }
 0x178   :  { %2436 = vmatprep.subr.bf16.mxu0 %v4615_v40  ;;  %v4721_v40 = vld [vmem:[#allocation2 + $0x110] ss:$12 sps:$4 sm:$0xff]  }
 0x17b   :  { %2437 = vmatpush1.bf16.msra.mxu0 %v4613_v41  ;;  %v310_v41 = vlaneseq }
 0x17c   :  { %2438 = vmatprep.subr.bf16.mxu0 %v4618_v22 }
 0x17d   :  { %1322 = vmatmul.mubr.bf16.gmra.mrb[12].mxu0 %v4587_v29 }
 0x17e   :  { %1635 = vmatmul.mubr.bf16.gmra.mrb[92].mxu1 %v4565_v21  ;;  %1331 = vmatprep.mubr.bf16.mxu0 %v4971_v0  ;;  %v4645_v21 = vld [vmem:[#allocation8 + $0xf4] ss:$8 sps:$4 sm:$0xff]  }
 0x17f   :  { %1677 = vmatprep.mubr.bf16.mxu1 %v4971_v0  ;;  %2439 = vmatpush1.bf16.msra.mxu0 %v4616_v44  ;;  %v5358_v44 = vld [vmem:[#allocation7] sm:$0xf] }
 0x180   :  { %2440 = vmatprep.subr.bf16.mxu0 %v4621_v46 }
 0x183   :  { %2441 = vmatpush1.bf16.msra.mxu0 %v4619_v47 }
 0x184   :  { %2442 = vmatprep.subr.bf16.mxu0 %v4624_v48 }
 0x185   :  { %1332 = vmatmul.mubr.bf16.gmra.mrb[16].mxu0 %v4594_v31 }
 0x186   :  { %1678 = vmatmul.mubr.bf16.vlgmr.msra.gmra.mrb[32].mxu1 %v4566_v23  ;;  %1341 = vmatprep.mubr.bf16.mxu0 %v4971_v0  ;;  %v4643_v23 = vld [vmem:[#allocation8 + $0xf0] ss:$8 sps:$4 sm:$0xff]  }
 0x187   :  { %1687 = vmatprep.mubr.bf16.mxu1 %v4971_v0  ;;  %2443 = vmatpush1.bf16.msra.mxu0 %v4622_v49 }
 0x188   :  { %2444 = vmatprep.subr.bf16.mxu0 %v4627_v30 }
 0x18b   :  { %2445 = vmatpush1.bf16.msra.mxu0 %v4625_v51 }
 0x18c   :  { %2446 = vmatprep.subr.bf16.mxu0 %v4630_v53 }
 0x18d   :  { %1342 = vmatmul.mubr.bf16.gmra.mrb[20].mxu0 %v5262_v35 }
 0x18e   :  { %1688 = vmatmul.mubr.bf16.gmra.mrb[36].mxu1 %v4573_v25  ;;  %1351 = vmatprep.mubr.bf16.mxu0 %v4971_v0 }
 0x18f   :  { %1697 = vmatprep.mubr.bf16.mxu1 %v4971_v0  ;;  %2447 = vmatpush1.bf16.msra.mxu0 %v4628_v55 }
 0x190   :  { %2448 = vmatprep.subr.bf16.mxu0 %v4633_v57 }
 0x193   :  { %2449 = vmatpush1.bf16.msra.mxu0 %v4631_v58 }
 0x194   :  { %2450 = vmatprep.subr.bf16.mxu0 %v4636_v61 }
 0x195   :  { %1352 = vmatmul.mubr.bf16.gmra.mrb[24].mxu0 %v5267_v12 }
 0x196   :  { %1698 = vmatmul.mubr.bf16.gmra.mrb[40].mxu1 %v4580_v27  ;;  %1361 = vmatprep.mubr.bf16.mxu0 %v4971_v0 }
 0x197   :  { %1707 = vmatprep.mubr.bf16.mxu1 %v4971_v0  ;;  %2451 = vmatpush1.bf16.msra.mxu0 %v4634_v63 }
 0x198   :  { %2452 = vmatprep.subr.bf16.mxu0 %v4639_v3 }
 0x199   :  { %v5272_v42 = vpop.f32.mrb[0].mxu1 }
 0x19a   :  { %v5276_v20 = vpop.f32.mrb[1].mxu1 }
 0x19b   :  { %v5278_v43 = vpop.f32.mrb[2].mxu1  ;;  %2453 = vmatpush1.bf16.msra.mxu0 %v4637_v5 }
 0x19c   :  { %v5280_v45 = vpop.f32.mrb[3].mxu1  ;;  %2454 = vmatprep.subr.bf16.mxu0 %v4642_v11 }
 0x19d   :  { %1362 = vmatmul.mubr.bf16.gmra.mrb[28].mxu0 %v5274_v18 }
 0x19e   :  { %1708 = vmatmul.mubr.bf16.gmra.mrb[44].mxu1 %v4587_v29 }
 0x19f   :  { %1717 = vmatprep.mubr.bf16.mxu1 %v4971_v0  ;;  %2455 = vmatpush1.bf16.msra.mxu0 %v4640_v15 }
 0x1a0   :  { %2456 = vmatprep.subr.bf16.mxu0 %v4645_v21 }
 0x1a1   :  { %v5284_v24 = vpop.f32.mrb[4].mxu1 }
 0x1a2   :  { %v5286_v26 = vpop.f32.mrb[5].mxu1 }
 0x1a3   :  { %v5288_v28 = vpop.f32.mrb[6].mxu1  ;;  %2457 = vmatpush1.bf16.msra.mxu0 %v4643_v23 }
 0x1a4   :  { %v5290_v50 = vpop.f32.mrb[7].mxu1  ;;  %2619 = vmatprep.subr.bf16.mxu0 %v4648_v34 }
 0x1a6   :  { %1718 = vmatmul.mubr.bf16.gmra.mrb[48].mxu1 %v4594_v31 }
 0x1a7   :  { %1727 = vmatprep.mubr.bf16.mxu1 %v4971_v0 }
 0x1a9   :  { %v5293_v52 = vpop.f32.mrb[8].mxu1 }
 0x1aa   :  { %v5295_v32 = vpop.f32.mrb[9].mxu1 }
 0x1ab   :  { %v5297_v54 = vpop.f32.mrb[10].mxu1 }
 0x1ac   :  { %v5299_v56 = vpop.f32.mrb[11].mxu1 }
 0x1ae   :  { %1728 = vmatmul.mubr.bf16.gmra.mrb[52].mxu1 %v5262_v35 }
 0x1af   :  { %1737 = vmatprep.mubr.bf16.mxu1 %v4971_v0 }
 0x1b1   :  { %v5303_v59 = vpop.f32.mrb[12].mxu1 }
 0x1b2   :  { %v5305_v60 = vpop.f32.mrb[13].mxu1 }
 0x1b3   :  { %v5307_v62 = vpop.f32.mrb[14].mxu1 }
 0x1b4   :  { %v5309_v1 = vpop.f32.mrb[15].mxu1 }
 0x1b6   :  { %1738 = vmatmul.mubr.bf16.gmra.mrb[56].mxu1 %v5267_v12 }
 0x1b7   :  { %1747 = vmatprep.mubr.bf16.mxu1 %v4971_v0 }
 0x1b9   :  { %v5313_v7 = vpop.f32.mrb[16].mxu1 }
 0x1ba   :  { %v5315_v9 = vpop.f32.mrb[17].mxu1 }
 0x1bb   :  { %v5317_v13 = vpop.f32.mrb[18].mxu1 }
 0x1bc   :  { %v5319_v19 = vpop.f32.mrb[19].mxu1 }
 0x1be   :  { %1748 = vmatmul.mubr.bf16.gmra.mrb[60].mxu1 %v5274_v18  ;;  %v5354_v18 = vshrl.u32 %v310_v41, 7 }
 0x1bf   :  { %1757 = vmatprep.mubr.bf16.mxu1 %v4971_v0 }
 0x1c0   :  { %v312_v22 = vsub.s32 0, %v5354_v18  ;;  %v316_v46 = vsub.s32 1, %v5354_v18 }
 0x1c1   :  { %v5323_v25 = vpop.f32.mrb[20].mxu1 }
 0x1c2   :  { %v5325_v27 = vpop.f32.mrb[21].mxu1 }
 0x1c3   :  { %v5327_v29 = vpop.f32.mrb[22].mxu1 }
 0x1c4   :  { %v5329_v31 = vpop.f32.mrb[23].mxu1 }
 0x1c6   :  { %1758 = vmatmul.mubr.bf16.gmra.mrb[64].mxu1 %v4718_v33 }
 0x1c7   :  { %1767 = vmatprep.mubr.bf16.mxu1 %v4971_v0 }
 0x1c9   :  { %v5332_v4 = vpop.f32.mrb[24].mxu1 }
 0x1ca   :  { %v5334_v6 = vpop.f32.mrb[25].mxu1 }
 0x1cb   :  { %v5336_v35 = vpop.f32.mrb[26].mxu1 }
 0x1cc   :  { %v5338_v36 = vpop.f32.mrb[27].mxu1 }
 0x1ce   :  { %1768 = vmatmul.mubr.bf16.gmra.mrb[68].mxu1 %v4719_v10 }
 0x1cf   :  { %1777 = vmatprep.mubr.bf16.mxu1 %v4971_v0 }
 0x1d1   :  { %v5341_v37 = vpop.f32.mrb[28].mxu1 }
 0x1d2   :  { %v5343_v38 = vpop.f32.mrb[29].mxu1 }
 0x1d3   :  { %v5345_v12 = vpop.f32.mrb[30].mxu1 }
 0x1d4   :  { %v5347_v14 = vpop.f32.mrb[31].mxu1 }
 0x1d6   :  { %1778 = vmatmul.mubr.bf16.gmra.mrb[72].mxu1 %v4720_v16 }
 0x1d7   :  { %1787 = vmatprep.mubr.bf16.mxu1 %v4971_v0 }
 0x1de   :  { %1788 = vmatmul.mubr.bf16.gmra.mrb[76].mxu1 %v4721_v40 }
 0x1df   :  { %1797 = vmatprep.mubr.bf16.mxu1 %v4971_v0 }
 0x1e6   :  { %1798 = vmatmul.mubr.bf16.gmra.mrb[80].mxu1 %v5192_v17  ;;  %v5365_v17 = vrot.slane %v5358_v44, %v312_v22 }
 0x1e7   :  { %1807 = vmatprep.mubr.bf16.mxu1 %v4971_v0 }
 0x1ee   :  { %1808 = vmatmul.mubr.bf16.gmra.mrb[84].mxu1 %v5205_v2  ;;  %v5370_v2 = vrot.slane %v5358_v44, %v316_v46 }
 0x1ef   :  { %1817 = vmatprep.mubr.bf16.mxu1 %v4971_v0 }
 0x1f6   :  { %1818 = vmatmul.mubr.bf16.gmra.mrb[88].mxu1 %v5218_v8 }
 0x1f7   :  { %1827 = vmatprep.mubr.bf16.mxu1 %v4971_v0 }
 0x1f8   :  { %v1180_v47 = vpop.f32.mrb[32].mxu0 }
 0x1f9   :  { %v1181_v48 = vadd.f32 %v1180_v47, %v5365_v17  ;;  %v1182_v49 = vpop.f32.mrb[33].mxu0 }
 0x1fa   :  { %v1183_v30 = vadd.f32 %v1182_v49, %v5370_v2  ;;  %v1184_v51 = vpop.f32.mrb[34].mxu0 }
 0x1fb   :  { %v1374_v8 = vadd.f32 %v5272_v42, %v1181_v48  ;;  %v1185_v53 = vadd.f32 %v1184_v51, %v5365_v17  ;;  %v1186_v55 = vpop.f32.mrb[35].mxu0 }
 0x1fc   :  { %v1376_v57 = vadd.f32 %v5276_v20, %v1183_v30  ;;  %v1187_v58 = vadd.f32 %v1186_v55, %v5370_v2 }
 0x1fd   :  { %v1378_v61 = vadd.f32 %v5278_v43, %v1185_v53  ;;  %v1902_v63 = vmax.f32 %v1374_v8, 0.0 }
 0x1fe   :  { %1828 = vmatmul.mubr.bf16.gmra.mrb[92].mxu1 %v5231_v39  ;;  %v1380_v0 = vadd.f32 %v5280_v45, %v1187_v58  ;;  %v1903_v5 = vmax.f32 %v1376_v57, 0.0 }
 0x1ff   :  { %v1906_v3 = vmax.f32 %v1378_v61, 0.0 }
 0x200   :  { %v1907_v11 = vmax.f32 %v1380_v0, 0.0  ;;  %v1190_v15 = vpop.f32.mrb[36].mxu0 }
 0x201   :  { %v1191_v42 = vadd.f32 %v1190_v15, %v5365_v17  ;;  %v1192_v21 = vpop.f32.mrb[37].mxu0  ;;  %v5383_v23 = vpack.c.bf16 %v1906_v3, %v1902_v63 }
 0x202   :  { %v1193_v20 = vadd.f32 %v1192_v21, %v5370_v2  ;;  %v1194_v33 = vpop.f32.mrb[38].mxu0  ;;  %v5386_v34 = vpack.c.bf16 %v1907_v11, %v1903_v5 }
 0x203   :  { %v1384_v43 = vadd.f32 %v5284_v24, %v1191_v42  ;;  %v1195_v39 = vadd.f32 %v1194_v33, %v5365_v17  ;;  %v1196_v45 = vpop.f32.mrb[39].mxu0 }
 0x204   :  { %v1386_v10 = vadd.f32 %v5286_v26, %v1193_v20  ;;  %v1197_v16 = vadd.f32 %v1196_v45, %v5370_v2 }
 0x205   :  { %v1388_v40 = vadd.f32 %v5288_v28, %v1195_v39  ;;  %v1910_v47 = vmax.f32 %v1384_v43, 0.0 }
 0x206   :  { %v1390_v41 = vadd.f32 %v5290_v50, %v1197_v16  ;;  %v1911_v49 = vmax.f32 %v1386_v10, 0.0 }
 0x207   :  { %v1914_v48 = vmax.f32 %v1388_v40, 0.0 }
 0x208   :  { %v1915_v30 = vmax.f32 %v1390_v41, 0.0  ;;  %v1200_v51 = vpop.f32.mrb[40].mxu0 }
 0x209   :  { %v1201_v8 = vadd.f32 %v1200_v51, %v5365_v17  ;;  %v1202_v53 = vpop.f32.mrb[41].mxu0  ;;  %v5395_v24 = vpack.c.bf16 %v1914_v48, %v1910_v47 }
 0x20a   :  { %v1203_v55 = vadd.f32 %v1202_v53, %v5370_v2  ;;  %v1204_v57 = vpop.f32.mrb[42].mxu0  ;;  %v5398_v26 = vpack.c.bf16 %v1915_v30, %v1911_v49 }
 0x20b   :  { %v1394_v58 = vadd.f32 %v5293_v52, %v1201_v8  ;;  %v1205_v28 = vadd.f32 %v1204_v57, %v5365_v17  ;;  %v1206_v50 = vpop.f32.mrb[43].mxu0 }
 0x20c   :  { %v1396_v61 = vadd.f32 %v5295_v32, %v1203_v55  ;;  %v1207_v0 = vadd.f32 %v1206_v50, %v5370_v2 }
 0x20d   :  { %v1398_v63 = vadd.f32 %v5297_v54, %v1205_v28  ;;  %v1918_v5 = vmax.f32 %v1394_v58, 0.0 }
 0x20e   :  { %v1400_v3 = vadd.f32 %v5299_v56, %v1207_v0  ;;  %v1919_v15 = vmax.f32 %v1396_v61, 0.0 }
 0x20f   :  { %v1922_v11 = vmax.f32 %v1398_v63, 0.0 }
 0x210   :  { %v1923_v42 = vmax.f32 %v1400_v3, 0.0  ;;  %v1210_v21 = vpop.f32.mrb[44].mxu0 }
 0x211   :  { %v1211_v20 = vadd.f32 %v1210_v21, %v5365_v17  ;;  %v1212_v33 = vpop.f32.mrb[45].mxu0  ;;  %v5407_v52 = vpack.c.bf16 %v1922_v11, %v1918_v5 }
 0x212   :  { %v1213_v43 = vadd.f32 %v1212_v33, %v5370_v2  ;;  %v1214_v39 = vpop.f32.mrb[46].mxu0  ;;  %v5410_v32 = vpack.c.bf16 %v1923_v42, %v1919_v15 }
 0x213   :  { %v1404_v45 = vadd.f32 %v5303_v59, %v1211_v20  ;;  %v1215_v54 = vadd.f32 %v1214_v39, %v5365_v17  ;;  %v1216_v56 = vpop.f32.mrb[47].mxu0 }
 0x214   :  { %v1406_v10 = vadd.f32 %v5305_v60, %v1213_v43  ;;  %v1217_v16 = vadd.f32 %v1216_v56, %v5370_v2 }
 0x215   :  { %v1408_v40 = vadd.f32 %v5307_v62, %v1215_v54  ;;  %v1926_v47 = vmax.f32 %v1404_v45, 0.0 }
 0x216   :  { %v1410_v41 = vadd.f32 %v5309_v1, %v1217_v16  ;;  %v1927_v49 = vmax.f32 %v1406_v10, 0.0 }
 0x217   :  { %v1930_v48 = vmax.f32 %v1408_v40, 0.0 }
 0x218   :  { %v1931_v30 = vmax.f32 %v1410_v41, 0.0  ;;  %v1220_v51 = vpop.f32.mrb[48].mxu0 }
 0x219   :  { %v1221_v8 = vadd.f32 %v1220_v51, %v5365_v17  ;;  %v1222_v53 = vpop.f32.mrb[49].mxu0  ;;  %v5419_v59 = vpack.c.bf16 %v1930_v48, %v1926_v47 }
 0x21a   :  { %v1223_v55 = vadd.f32 %v1222_v53, %v5370_v2  ;;  %v1224_v57 = vpop.f32.mrb[50].mxu0  ;;  %v5422_v60 = vpack.c.bf16 %v1931_v30, %v1927_v49 }
 0x21b   :  { %v1414_v58 = vadd.f32 %v5313_v7, %v1221_v8  ;;  %v1225_v62 = vadd.f32 %v1224_v57, %v5365_v17  ;;  %v1226_v1 = vpop.f32.mrb[51].mxu0 }
 0x21c   :  { %v1416_v28 = vadd.f32 %v5315_v9, %v1223_v55  ;;  %v1227_v50 = vadd.f32 %v1226_v1, %v5370_v2 }
 0x21d   :  { %v1418_v61 = vadd.f32 %v5317_v13, %v1225_v62  ;;  %v1934_v63 = vmax.f32 %v1414_v58, 0.0 }
 0x21e   :  { %v1420_v0 = vadd.f32 %v5319_v19, %v1227_v50  ;;  %v1935_v5 = vmax.f32 %v1416_v28, 0.0 }
 0x21f   :  { %v1938_v3 = vmax.f32 %v1418_v61, 0.0 }
 0x220   :  { %v1939_v11 = vmax.f32 %v1420_v0, 0.0  ;;  %v1230_v15 = vpop.f32.mrb[52].mxu0 }
 0x221   :  { %v1231_v42 = vadd.f32 %v1230_v15, %v5365_v17  ;;  %v1232_v21 = vpop.f32.mrb[53].mxu0  ;;  %v5431_v7 = vpack.c.bf16 %v1938_v3, %v1934_v63 }
 0x222   :  { %v1233_v20 = vadd.f32 %v1232_v21, %v5370_v2  ;;  %v1234_v33 = vpop.f32.mrb[54].mxu0  ;;  %v5434_v9 = vpack.c.bf16 %v1939_v11, %v1935_v5 }
 0x223   :  { %v1424_v43 = vadd.f32 %v5323_v25, %v1231_v42  ;;  %v1235_v13 = vadd.f32 %v1234_v33, %v5365_v17  ;;  %v1236_v19 = vpop.f32.mrb[55].mxu0 }
 0x224   :  { %v1426_v39 = vadd.f32 %v5325_v27, %v1233_v20  ;;  %v1237_v45 = vadd.f32 %v1236_v19, %v5370_v2 }
 0x225   :  { %v1428_v54 = vadd.f32 %v5327_v29, %v1235_v13  ;;  %v1942_v10 = vmax.f32 %v1424_v43, 0.0 }
 0x226   :  { %v1430_v56 = vadd.f32 %v5329_v31, %v1237_v45  ;;  %v1943_v40 = vmax.f32 %v1426_v39, 0.0 }
 0x227   :  { %v1946_v16 = vmax.f32 %v1428_v54, 0.0 }
 0x228   :  { %v1947_v41 = vmax.f32 %v1430_v56, 0.0  ;;  %v1240_v47 = vpop.f32.mrb[56].mxu0 }
 0x229   :  { %v1241_v48 = vadd.f32 %v1240_v47, %v5365_v17  ;;  %v1242_v49 = vpop.f32.mrb[57].mxu0  ;;  %v5443_v25 = vpack.c.bf16 %v1946_v16, %v1942_v10 }
 0x22a   :  { %v1243_v30 = vadd.f32 %v1242_v49, %v5370_v2  ;;  %v1244_v51 = vpop.f32.mrb[58].mxu0  ;;  %v5446_v27 = vpack.c.bf16 %v1947_v41, %v1943_v40 }
 0x22b   :  { %v1434_v8 = vadd.f32 %v5332_v4, %v1241_v48  ;;  %v1245_v29 = vadd.f32 %v1244_v51, %v5365_v17  ;;  %v1246_v31 = vpop.f32.mrb[59].mxu0 }
 0x22c   :  { %v1436_v53 = vadd.f32 %v5334_v6, %v1243_v30  ;;  %v1247_v55 = vadd.f32 %v1246_v31, %v5370_v2 }
 0x22d   :  { %v1438_v57 = vadd.f32 %v5336_v35, %v1245_v29  ;;  %v1950_v62 = vmax.f32 %v1434_v8, 0.0  ;;  %v4646_v8 = vld [vmem:[#allocation8 + $0x100] ss:$8 sps:$4 sm:$0xff]  }
 0x22e   :  { %v1440_v58 = vadd.f32 %v5338_v36, %v1247_v55  ;;  %v1951_v28 = vmax.f32 %v1436_v53, 0.0  ;;  %v4651_v53 = vld [vmem:[#allocation8 + $0x114] ss:$8 sps:$4 sm:$0xff]  }
 0x22f   :  { %v1954_v1 = vmax.f32 %v1438_v57, 0.0 }
 0x230   :  { %v1955_v50 = vmax.f32 %v1440_v58, 0.0  ;;  %v1250_v61 = vpop.f32.mrb[60].mxu0 }
 0x231   :  { %v1251_v0 = vadd.f32 %v1250_v61, %v5365_v17  ;;  %v1252_v63 = vpop.f32.mrb[61].mxu0  ;;  %v5455_v4 = vpack.c.bf16 %v1954_v1, %v1950_v62 }
 0x232   :  { %v1253_v3 = vadd.f32 %v1252_v63, %v5370_v2  ;;  %v1254_v5 = vpop.f32.mrb[62].mxu0  ;;  %v5458_v6 = vpack.c.bf16 %v1955_v50, %v1951_v28  ;;  %v4649_v28 = vld [vmem:[#allocation8 + $0x110] ss:$8 sps:$4 sm:$0xff]  }
 0x233   :  { %v1444_v11 = vadd.f32 %v5341_v37, %v1251_v0  ;;  %v1255_v35 = vadd.f32 %v1254_v5, %v5365_v17  ;;  %v1256_v36 = vpop.f32.mrb[63].mxu0  ;;  %v4654_v0 = vld [vmem:[#allocation8 + $0x124] ss:$8 sps:$4 sm:$0xff]  }
 0x234   :  { %v1446_v15 = vadd.f32 %v5343_v38, %v1253_v3  ;;  %v1257_v42 = vadd.f32 %v1256_v36, %v5370_v2  ;;  %v4652_v36 = vld [vmem:[#allocation8 + $0x120] ss:$8 sps:$4 sm:$0xff]  }
 0x235   :  { %v1448_v21 = vadd.f32 %v5345_v12, %v1255_v35  ;;  %v1958_v33 = vmax.f32 %v1444_v11, 0.0 }
 0x236   :  { %v1450_v20 = vadd.f32 %v5347_v14, %v1257_v42  ;;  %v1959_v13 = vmax.f32 %v1446_v15, 0.0 }
 0x237   :  { %v1962_v43 = vmax.f32 %v1448_v21, 0.0  ;;  %v4657_v21 = vld [vmem:[#allocation8 + $0x134] ss:$8 sps:$4 sm:$0xff]  }
 0x238   :  { %v1963_v19 = vmax.f32 %v1450_v20, 0.0  ;;  %v1293_v39 = vpop.f32.mrb[0].mxu0 }
 0x239   :  { %v3987_v45 = vadd.f32 %v1293_v39, %v5365_v17  ;;  %v1295_v54 = vpop.f32.mrb[1].mxu0  ;;  %v5467_v37 = vpack.c.bf16 %v1962_v43, %v1958_v33  ;;  %v4655_v39 = vld [vmem:[#allocation8 + $0x130] ss:$8 sps:$4 sm:$0xff]  }
 0x23a   :  { %v3988_v56 = vadd.f32 %v1295_v54, %v5370_v2  ;;  %v1297_v10 = vpop.f32.mrb[2].mxu0  ;;  %v5470_v38 = vpack.c.bf16 %v1963_v19, %v1959_v13 }
 0x23b   :  { %v3989_v16 = vadd.f32 %v1297_v10, %v5365_v17  ;;  %v1299_v12 = vpop.f32.mrb[3].mxu0  ;;  %v1838_v40 = vmax.f32 %v3987_v45, 0.0 }
 0x23c   :  { %v3990_v14 = vadd.f32 %v1299_v12, %v5370_v2  ;;  %v1839_v47 = vmax.f32 %v3988_v56, 0.0  ;;  %v4660_v56 = vld [vmem:[#allocation8 + $0x144] ss:$8 sps:$4 sm:$0xff]  }
 0x23d   :  { %v1842_v41 = vmax.f32 %v3989_v16, 0.0 }
 0x23e   :  { %v1843_v48 = vmax.f32 %v3990_v14, 0.0 }
 0x23f   :  { %v1966_v49 = vpack.c.bf16 %v1842_v41, %v1838_v40  ;;  %v4658_v41 = vld [vmem:[#allocation8 + $0x140] ss:$8 sps:$4 sm:$0xff]  }
 0x240   :  { %v1967_v30 = vpack.c.bf16 %v1843_v48, %v1839_v47  ;;  %v1303_v51 = vpop.f32.mrb[4].mxu0 }
 0x241   :  { %v3991_v29 = vadd.f32 %v1303_v51, %v5365_v17  ;;  %v1305_v31 = vpop.f32.mrb[5].mxu0 }
 0x242   :  { %v3992_v55 = vadd.f32 %v1305_v31, %v5370_v2  ;;  %v1307_v57 = vpop.f32.mrb[6].mxu0  ;;  %2458 = vmatprep.mubr.bf16.mxu0 %v1967_v30  ;;  %v4663_v30 = vld [vmem:[#allocation8 + $0x154] ss:$8 sps:$4 sm:$0xff]  }
 0x243   :  { %v3993_v58 = vadd.f32 %v1307_v57, %v5365_v17  ;;  %v1309_v62 = vpop.f32.mrb[7].mxu0  ;;  %2459 = vmatmul.mubr.bf16.vlgmr.msra.gmra.mrb[64].mxu0 %v1966_v49  ;;  %v1846_v50 = vmax.f32 %v3991_v29, 0.0  ;;  %v320_v49 = vsub.s32 2, %v5354_v18  ;;  %v324_v29 = vsub.s32 3, %v5354_v18  ;;  %v4661_v57 = vld [vmem:[#allocation8 + $0x150] ss:$8 sps:$4 sm:$0xff]  }
 0x244   :  { %v3994_v1 = vadd.f32 %v1309_v62, %v5370_v2  ;;  %2620 = vmatpush1.bf16.msra.mxu0 %v4646_v8  ;;  %v1847_v63 = vmax.f32 %v3992_v55, 0.0 }
 0x245   :  { %v1850_v61 = vmax.f32 %v3993_v58, 0.0  ;;  %2621 = vmatprep.subr.bf16.mxu0 %v4651_v53 }
 0x246   :  { %v1851_v3 = vmax.f32 %v3994_v1, 0.0  ;;  %v5489_v1 = vrot.slane %v5358_v44, %v320_v49 }
 0x247   :  { %v1970_v5 = vpack.c.bf16 %v1850_v61, %v1846_v50 }
 0x248   :  { %v1971_v11 = vpack.c.bf16 %v1851_v3, %v1847_v63  ;;  %v1313_v35 = vpop.f32.mrb[8].mxu0  ;;  %2622 = vmatpush1.bf16.msra.mxu0 %v4649_v28  ;;  %v4666_v28 = vld [vmem:[#allocation8 + $0x164] ss:$8 sps:$4 sm:$0xff]  }
 0x249   :  { %v3995_v15 = vadd.f32 %v1313_v35, %v5365_v17  ;;  %v1315_v42 = vpop.f32.mrb[9].mxu0  ;;  %2623 = vmatprep.subr.bf16.mxu0 %v4654_v0  ;;  %v5492_v0 = vrot.slane %v5358_v44, %v324_v29  ;;  %v4664_v35 = vld [vmem:[#allocation8 + $0x160] ss:$8 sps:$4 sm:$0xff]  }
 0x24a   :  { %v3996_v20 = vadd.f32 %v1315_v42, %v5370_v2  ;;  %v1317_v33 = vpop.f32.mrb[10].mxu0  ;;  %2468 = vmatprep.mubr.bf16.mxu0 %v1971_v11 }
 0x24b   :  { %v3997_v43 = vadd.f32 %v1317_v33, %v5365_v17  ;;  %v1319_v13 = vpop.f32.mrb[11].mxu0  ;;  %2469 = vmatmul.mubr.bf16.gmra.mrb[68].mxu0 %v1970_v5  ;;  %v1854_v45 = vmax.f32 %v3995_v15, 0.0 }
 0x24c   :  { %v3998_v19 = vadd.f32 %v1319_v13, %v5370_v2  ;;  %2624 = vmatpush1.bf16.msra.mxu0 %v4652_v36  ;;  %v1855_v10 = vmax.f32 %v3996_v20, 0.0  ;;  %v4669_v20 = vld [vmem:[#allocation8 + $0x174] ss:$8 sps:$4 sm:$0xff]  }
 0x24d   :  { %v1858_v54 = vmax.f32 %v3997_v43, 0.0  ;;  %2625 = vmatprep.subr.bf16.mxu0 %v4657_v21 }
 0x24e   :  { %v1859_v16 = vmax.f32 %v3998_v19, 0.0 }
 0x24f   :  { %v1974_v12 = vpack.c.bf16 %v1858_v54, %v1854_v45 }
 0x250   :  { %v1975_v14 = vpack.c.bf16 %v1859_v16, %v1855_v10  ;;  %v1323_v40 = vpop.f32.mrb[12].mxu0  ;;  %2626 = vmatpush1.bf16.msra.mxu0 %v4655_v39  ;;  %v4667_v16 = vld [vmem:[#allocation8 + $0x170] ss:$8 sps:$4 sm:$0xff]  }
 0x251   :  { %v3999_v47 = vadd.f32 %v1323_v40, %v5365_v17  ;;  %v1325_v48 = vpop.f32.mrb[13].mxu0  ;;  %2627 = vmatprep.subr.bf16.mxu0 %v4660_v56 }
 0x252   :  { %v4000_v51 = vadd.f32 %v1325_v48, %v5370_v2  ;;  %v1327_v8 = vpop.f32.mrb[14].mxu0  ;;  %2478 = vmatprep.mubr.bf16.mxu0 %v1975_v14 }
 0x253   :  { %v4001_v31 = vadd.f32 %v1327_v8, %v5365_v17  ;;  %v1329_v53 = vpop.f32.mrb[15].mxu0  ;;  %2479 = vmatmul.mubr.bf16.gmra.mrb[72].mxu0 %v1974_v12  ;;  %v1862_v58 = vmax.f32 %v3999_v47, 0.0  ;;  %v4672_v47 = vld [vmem:[#allocation8 + $0x184] ss:$8 sps:$4 sm:$0xff]  }
 0x254   :  { %v4002_v55 = vadd.f32 %v1329_v53, %v5370_v2  ;;  %2628 = vmatpush1.bf16.msra.mxu0 %v4658_v41  ;;  %v1863_v50 = vmax.f32 %v4000_v51, 0.0 }
 0x255   :  { %v1866_v62 = vmax.f32 %v4001_v31, 0.0  ;;  %2629 = vmatprep.subr.bf16.mxu0 %v4663_v30 }
 0x256   :  { %v1867_v61 = vmax.f32 %v4002_v55, 0.0 }
 0x257   :  { %v1978_v63 = vpack.c.bf16 %v1866_v62, %v1862_v58  ;;  %v4670_v58 = vld [vmem:[#allocation8 + $0x180] ss:$8 sps:$4 sm:$0xff]  }
 0x258   :  { %v1979_v3 = vpack.c.bf16 %v1867_v61, %v1863_v50  ;;  %v1333_v5 = vpop.f32.mrb[16].mxu0  ;;  %2630 = vmatpush1.bf16.msra.mxu0 %v4661_v57 }
 0x259   :  { %v1679_v11 = vpop.f32.mrb[32].mxu1  ;;  %v4003_v36 = vadd.f32 %v1333_v5, %v5365_v17  ;;  %v1335_v42 = vpop.f32.mrb[17].mxu0  ;;  %2631 = vmatprep.subr.bf16.mxu0 %v4666_v28 }
 0x25a   :  { %v4083_v15 = vadd.f32 %v1679_v11, %v5489_v1  ;;  %v1681_v21 = vpop.f32.mrb[33].mxu1  ;;  %v4004_v33 = vadd.f32 %v1335_v42, %v5370_v2  ;;  %v1337_v44 = vpop.f32.mrb[18].mxu0  ;;  %2488 = vmatprep.mubr.bf16.mxu0 %v1979_v3 }
 0x25b   :  { %v4084_v43 = vadd.f32 %v1681_v21, %v5492_v0  ;;  %v1683_v13 = vpop.f32.mrb[34].mxu1  ;;  %v4005_v19 = vadd.f32 %v1337_v44, %v5365_v17  ;;  %v1339_v45 = vpop.f32.mrb[19].mxu0  ;;  %2489 = vmatmul.mubr.bf16.gmra.mrb[76].mxu0 %v1978_v63  ;;  %v1870_v12 = vmax.f32 %v4003_v36, 0.0  ;;  %v4675_v63 = vld [vmem:[#allocation8 + $0x194] ss:$8 sps:$4 sm:$0xff]  }
 0x25c   :  { %v4085_v39 = vadd.f32 %v1683_v13, %v5489_v1  ;;  %v1685_v54 = vpop.f32.mrb[35].mxu1  ;;  %v4006_v56 = vadd.f32 %v1339_v45, %v5370_v2  ;;  %2632 = vmatpush1.bf16.msra.mxu0 %v4664_v35  ;;  %v1840_v14 = vmax.f32 %v4083_v15, 0.0  ;;  %v1871_v48 = vmax.f32 %v4004_v33, 0.0  ;;  %v4678_v45 = vld [vmem:[#allocation8 + $0x1a4] ss:$8 sps:$4 sm:$0xff]  }
 0x25d   :  { %v4086_v10 = vadd.f32 %v1685_v54, %v5492_v0  ;;  %v1874_v40 = vmax.f32 %v4005_v19, 0.0  ;;  %2633 = vmatprep.subr.bf16.mxu0 %v4669_v20  ;;  %v1841_v49 = vmax.f32 %v4084_v43, 0.0  ;;  %v4673_v43 = vld [vmem:[#allocation8 + $0x190] ss:$8 sps:$4 sm:$0xff]  }
 0x25e   :  { %v1844_v41 = vmax.f32 %v4085_v39, 0.0  ;;  %v1875_v30 = vmax.f32 %v4006_v56, 0.0 }
 0x25f   :  { %v1845_v51 = vmax.f32 %v4086_v10, 0.0  ;;  %v1982_v8 = vpack.c.bf16 %v1874_v40, %v1870_v12 }
 0x260   :  { %v5502_v29 = vpack.c.bf16 %v1844_v41, %v1840_v14  ;;  %v1983_v31 = vpack.c.bf16 %v1875_v30, %v1871_v48  ;;  %v1343_v55 = vpop.f32.mrb[20].mxu0  ;;  %2634 = vmatpush1.bf16.msra.mxu0 %v4667_v16 }
 0x261   :  { %v5504_v53 = vpack.c.bf16 %v1845_v51, %v1841_v49  ;;  %v1689_v57 = vpop.f32.mrb[36].mxu1  ;;  %v4007_v62 = vadd.f32 %v1343_v55, %v5365_v17  ;;  %v1345_v50 = vpop.f32.mrb[21].mxu0  ;;  %2635 = vmatprep.subr.bf16.mxu0 %v4672_v47  ;;  %v4676_v49 = vld [vmem:[#allocation8 + $0x1a0] ss:$8 sps:$4 sm:$0xff]   ;;  %v4681_v55 = vld [vmem:[#allocation8 + $0x1b4] ss:$8 sps:$4 sm:$0xff]  }
 0x262   :  { %v4087_v28 = vadd.f32 %v1689_v57, %v5489_v1  ;;  %v1691_v61 = vpop.f32.mrb[37].mxu1  ;;  %v4008_v3 = vadd.f32 %v1345_v50, %v5370_v2  ;;  %v1347_v11 = vpop.f32.mrb[22].mxu0  ;;  %2498 = vmatprep.mubr.bf16.mxu0 %v1983_v31 }
 0x263   :  { %v4088_v5 = vadd.f32 %v1691_v61, %v5492_v0  ;;  %v1693_v35 = vpop.f32.mrb[38].mxu1  ;;  %v4009_v36 = vadd.f32 %v1347_v11, %v5365_v17  ;;  %v1349_v42 = vpop.f32.mrb[23].mxu0  ;;  %2499 = vmatmul.mubr.bf16.gmra.mrb[80].mxu0 %v1982_v8  ;;  %v1878_v44 = vmax.f32 %v4007_v62, 0.0 }
 0x264   :  { %v4089_v15 = vadd.f32 %v1693_v35, %v5489_v1  ;;  %v1695_v21 = vpop.f32.mrb[39].mxu1  ;;  %v4010_v20 = vadd.f32 %v1349_v42, %v5370_v2  ;;  %2636 = vmatpush1.bf16.msra.mxu0 %v4670_v58  ;;  %v1848_v13 = vmax.f32 %v4087_v28, 0.0  ;;  %v1879_v54 = vmax.f32 %v4008_v3, 0.0  ;;  %v4679_v35 = vld [vmem:[#allocation8 + $0x1b0] ss:$8 sps:$4 sm:$0xff]  }
 0x265   :  { %v4090_v33 = vadd.f32 %v1695_v21, %v5492_v0  ;;  %v1882_v19 = vmax.f32 %v4009_v36, 0.0  ;;  %2637 = vmatprep.subr.bf16.mxu0 %v4675_v63  ;;  %v1849_v56 = vmax.f32 %v4088_v5, 0.0 }
 0x266   :  { %v1852_v39 = vmax.f32 %v4089_v15, 0.0  ;;  %v1883_v10 = vmax.f32 %v4010_v20, 0.0  ;;  %v4684_v20 = vld [vmem:[#allocation8 + $0x1c4] ss:$8 sps:$4 sm:$0xff]  }
 0x267   :  { %v1853_v16 = vmax.f32 %v4090_v33, 0.0  ;;  %v1986_v12 = vpack.c.bf16 %v1882_v19, %v1878_v44 }
 0x268   :  { %v5514_v14 = vpack.c.bf16 %v1852_v39, %v1848_v13  ;;  %v1987_v40 = vpack.c.bf16 %v1883_v10, %v1879_v54  ;;  %v1353_v47 = vpop.f32.mrb[24].mxu0  ;;  %2638 = vmatpush1.bf16.msra.mxu0 %v4673_v43 }
 0x269   :  { %v5516_v41 = vpack.c.bf16 %v1853_v16, %v1849_v56  ;;  %v1699_v48 = vpop.f32.mrb[40].mxu1  ;;  %v4011_v30 = vadd.f32 %v1353_v47, %v5365_v17  ;;  %v1355_v8 = vpop.f32.mrb[25].mxu0  ;;  %2639 = vmatprep.subr.bf16.mxu0 %v4678_v45  ;;  %v4682_v16 = vld [vmem:[#allocation8 + $0x1c0] ss:$8 sps:$4 sm:$0xff]  }
 0x26a   :  { %v4091_v51 = vadd.f32 %v1699_v48, %v5489_v1  ;;  %v1701_v31 = vpop.f32.mrb[41].mxu1  ;;  %v4012_v57 = vadd.f32 %v1355_v8, %v5370_v2  ;;  %v1357_v62 = vpop.f32.mrb[26].mxu0  ;;  %2508 = vmatprep.mubr.bf16.mxu0 %v1987_v40 }
 0x26b   :  { %v4092_v58 = vadd.f32 %v1701_v31, %v5492_v0  ;;  %v1703_v28 = vpop.f32.mrb[42].mxu1  ;;  %v4013_v50 = vadd.f32 %v1357_v62, %v5365_v17  ;;  %v1359_v63 = vpop.f32.mrb[27].mxu0  ;;  %2509 = vmatmul.mubr.bf16.gmra.mrb[84].mxu0 %v1986_v12  ;;  %v1886_v36 = vmax.f32 %v4011_v30, 0.0 }
 0x26c   :  { %v4093_v61 = vadd.f32 %v1703_v28, %v5489_v1  ;;  %v1705_v3 = vpop.f32.mrb[43].mxu1  ;;  %v4014_v5 = vadd.f32 %v1359_v63, %v5370_v2  ;;  %2640 = vmatpush1.bf16.msra.mxu0 %v4676_v49  ;;  %v1856_v15 = vmax.f32 %v4091_v51, 0.0  ;;  %v1887_v33 = vmax.f32 %v4012_v57, 0.0  ;;  %v4687_v49 = vld [vmem:[#allocation8 + $0x1d4] ss:$8 sps:$4 sm:$0xff]  }
 0x26d   :  { %v4094_v11 = vadd.f32 %v1705_v3, %v5492_v0  ;;  %v1890_v42 = vmax.f32 %v4013_v50, 0.0  ;;  %2641 = vmatprep.subr.bf16.mxu0 %v4681_v55  ;;  %v1857_v43 = vmax.f32 %v4092_v58, 0.0 }
 0x26e   :  { %v1860_v21 = vmax.f32 %v4093_v61, 0.0  ;;  %v1891_v44 = vmax.f32 %v4014_v5, 0.0  ;;  %v4685_v61 = vld [vmem:[#allocation8 + $0x1d0] ss:$8 sps:$4 sm:$0xff]  }
 0x26f   :  { %v1861_v13 = vmax.f32 %v4094_v11, 0.0  ;;  %v1990_v19 = vpack.c.bf16 %v1890_v42, %v1886_v36 }
 0x270   :  { %v5526_v39 = vpack.c.bf16 %v1860_v21, %v1856_v15  ;;  %v1991_v45 = vpack.c.bf16 %v1891_v44, %v1887_v33  ;;  %v1363_v56 = vpop.f32.mrb[28].mxu0  ;;  %2642 = vmatpush1.bf16.msra.mxu0 %v4679_v35  ;;  %v4690_v35 = vld [vmem:[#allocation8 + $0x1e4] ss:$8 sps:$4 sm:$0xff]   ;;  %v4688_v44 = vld [vmem:[#allocation8 + $0x1e0] ss:$8 sps:$4 sm:$0xff]  }
 0x271   :  { %v5528_v54 = vpack.c.bf16 %v1861_v13, %v1857_v43  ;;  %v1709_v10 = vpop.f32.mrb[44].mxu1  ;;  %v4015_v12 = vadd.f32 %v1363_v56, %v5365_v17  ;;  %v1365_v47 = vpop.f32.mrb[29].mxu0  ;;  %2643 = vmatprep.subr.bf16.mxu0 %v4684_v20 }
 0x272   :  { %v4095_v40 = vadd.f32 %v1709_v10, %v5489_v1  ;;  %v1711_v48 = vpop.f32.mrb[45].mxu1  ;;  %v4016_v30 = vadd.f32 %v1365_v47, %v5370_v2  ;;  %v1367_v8 = vpop.f32.mrb[30].mxu0  ;;  %2518 = vmatprep.mubr.bf16.mxu0 %v1991_v45  ;;  %v4693_v45 = vld [vmem:[#allocation8 + $0x1f4] ss:$8 sps:$4 sm:$0xff]   ;;  %v4691_v47 = vld [vmem:[#allocation8 + $0x1f0] ss:$8 sps:$4 sm:$0xff]  }
 0x273   :  { %v4096_v51 = vadd.f32 %v1711_v48, %v5492_v0  ;;  %v1713_v31 = vpop.f32.mrb[46].mxu1  ;;  %v4017_v55 = vadd.f32 %v1367_v8, %v5365_v17  ;;  %v1369_v58 = vpop.f32.mrb[31].mxu0  ;;  %2519 = vmatmul.mubr.bf16.gmra.mrb[88].mxu0 %v1990_v19  ;;  %v1894_v63 = vmax.f32 %v4015_v12, 0.0 }
 0x274   :  { %v4097_v57 = vadd.f32 %v1713_v31, %v5489_v1  ;;  %v1715_v62 = vpop.f32.mrb[47].mxu1  ;;  %v4018_v28 = vadd.f32 %v1369_v58, %v5370_v2  ;;  %2644 = vmatpush1.bf16.msra.mxu0 %v4682_v16  ;;  %v1864_v3 = vmax.f32 %v4095_v40, 0.0  ;;  %v1895_v36 = vmax.f32 %v4016_v30, 0.0 }
 0x275   :  { %v4098_v50 = vadd.f32 %v1715_v62, %v5492_v0  ;;  %v1898_v5 = vmax.f32 %v4017_v55, 0.0  ;;  %2645 = vmatprep.subr.bf16.mxu0 %v4687_v49  ;;  %v1865_v15 = vmax.f32 %v4096_v51, 0.0 }
 0x276   :  { %v1868_v11 = vmax.f32 %v4097_v57, 0.0  ;;  %v1899_v17 = vmax.f32 %v4018_v28, 0.0 }
 0x277   :  { %v1869_v42 = vmax.f32 %v4098_v50, 0.0  ;;  %v1994_v21 = vpack.c.bf16 %v1898_v5, %v1894_v63 }
 0x278   :  { %v5538_v20 = vpack.c.bf16 %v1868_v11, %v1864_v3  ;;  %v1995_v33 = vpack.c.bf16 %v1899_v17, %v1895_v36  ;;  %2646 = vmatpush1.bf16.msra.mxu0 %v4685_v61 }
 0x279   :  { %v5540_v43 = vpack.c.bf16 %v1869_v42, %v1865_v15  ;;  %v1719_v2 = vpop.f32.mrb[48].mxu1  ;;  %2647 = vmatprep.subr.bf16.mxu0 %v4690_v35 }
 0x27a   :  { %v4099_v13 = vadd.f32 %v1719_v2, %v5489_v1  ;;  %v1721_v19 = vpop.f32.mrb[49].mxu1  ;;  %2528 = vmatprep.mubr.bf16.mxu0 %v1995_v33 }
 0x27b   :  { %v4100_v56 = vadd.f32 %v1721_v19, %v5492_v0  ;;  %v1723_v10 = vpop.f32.mrb[50].mxu1  ;;  %2529 = vmatmul.mubr.bf16.gmra.mrb[92].mxu0 %v1994_v21 }
 0x27c   :  { %v4101_v16 = vadd.f32 %v1723_v10, %v5489_v1  ;;  %v1725_v12 = vpop.f32.mrb[51].mxu1  ;;  %2538 = vmatprep.mubr.bf16.mxu0 %v5386_v34  ;;  %2648 = vmatpush1.bf16.msra.mxu0 %v4688_v44  ;;  %v1872_v48 = vmax.f32 %v4099_v13, 0.0 }
 0x27d   :  { %v4102_v40 = vadd.f32 %v1725_v12, %v5492_v0  ;;  %2649 = vmatprep.subr.bf16.mxu0 %v4693_v45  ;;  %v1873_v30 = vmax.f32 %v4100_v56, 0.0 }
 0x27e   :  { %v1876_v49 = vmax.f32 %v4101_v16, 0.0 }
 0x27f   :  { %v1877_v51 = vmax.f32 %v4102_v40, 0.0 }
 0x280   :  { %v5547_v8 = vpack.c.bf16 %v1876_v49, %v1872_v48  ;;  %2650 = vmatpush1.bf16.msra.mxu0 %v4691_v47 }
 0x281   :  { %v5549_v31 = vpack.c.bf16 %v1877_v51, %v1873_v30  ;;  %v1729_v55 = vpop.f32.mrb[52].mxu1 }
 0x282   :  { %v4103_v57 = vadd.f32 %v1729_v55, %v5489_v1  ;;  %v1731_v58 = vpop.f32.mrb[53].mxu1 }
 0x283   :  { %v4104_v62 = vadd.f32 %v1731_v58, %v5492_v0  ;;  %v1733_v28 = vpop.f32.mrb[54].mxu1  ;;  %2539 = vmatmul.mubr.bf16.gmra.mrb[96].mxu0 %v5383_v23 }
 0x284   :  { %v4105_v34 = vadd.f32 %v1733_v28, %v5489_v1  ;;  %v1735_v50 = vpop.f32.mrb[55].mxu1  ;;  %2548 = vmatprep.mubr.bf16.mxu0 %v5398_v26  ;;  %v1880_v63 = vmax.f32 %v4103_v57, 0.0 }
 0x285   :  { %v4106_v61 = vadd.f32 %v1735_v50, %v5492_v0  ;;  %v1881_v5 = vmax.f32 %v4104_v62, 0.0 }
 0x286   :  { %v1884_v3 = vmax.f32 %v4105_v34, 0.0 }
 0x287   :  { %v1885_v11 = vmax.f32 %v4106_v61, 0.0 }
 0x288   :  { %v5557_v35 = vpack.c.bf16 %v1884_v3, %v1880_v63 }
 0x289   :  { %v5559_v36 = vpack.c.bf16 %v1885_v11, %v1881_v5  ;;  %v1739_v15 = vpop.f32.mrb[56].mxu1 }
 0x28a   :  { %v4107_v17 = vadd.f32 %v1739_v15, %v5489_v1  ;;  %v1741_v42 = vpop.f32.mrb[57].mxu1 }
 0x28b   :  { %v4108_v21 = vadd.f32 %v1741_v42, %v5492_v0  ;;  %v1743_v33 = vpop.f32.mrb[58].mxu1  ;;  %2549 = vmatmul.mubr.bf16.gmra.mrb[100].mxu0 %v5395_v24 }
 0x28c   :  { %v4109_v23 = vadd.f32 %v1743_v33, %v5489_v1  ;;  %v1745_v2 = vpop.f32.mrb[59].mxu1  ;;  %2558 = vmatprep.mubr.bf16.mxu0 %v5410_v32  ;;  %v1888_v44 = vmax.f32 %v4107_v17, 0.0 }
 0x28d   :  { %v4110_v26 = vadd.f32 %v1745_v2, %v5492_v0  ;;  %v1889_v19 = vmax.f32 %v4108_v21, 0.0 }
 0x28e   :  { %v1892_v13 = vmax.f32 %v4109_v23, 0.0 }
 0x28f   :  { %v1893_v45 = vmax.f32 %v4110_v26, 0.0 }
 0x290   :  { %v5567_v56 = vpack.c.bf16 %v1892_v13, %v1888_v44 }
 0x291   :  { %v5569_v10 = vpack.c.bf16 %v1893_v45, %v1889_v19  ;;  %v1749_v16 = vpop.f32.mrb[60].mxu1 }
 0x292   :  { %v4111_v12 = vadd.f32 %v1749_v16, %v5489_v1  ;;  %v1751_v40 = vpop.f32.mrb[61].mxu1 }
 0x293   :  { %v4112_v47 = vadd.f32 %v1751_v40, %v5492_v0  ;;  %v1753_v48 = vpop.f32.mrb[62].mxu1  ;;  %2559 = vmatmul.mubr.bf16.gmra.mrb[104].mxu0 %v5407_v52 }
 0x294   :  { %v4113_v24 = vadd.f32 %v1753_v48, %v5489_v1  ;;  %v1755_v49 = vpop.f32.mrb[63].mxu1  ;;  %2568 = vmatprep.mubr.bf16.mxu0 %v5422_v60  ;;  %v1896_v30 = vmax.f32 %v4111_v12, 0.0 }
 0x295   :  { %v4114_v32 = vadd.f32 %v1755_v49, %v5492_v0  ;;  %v1897_v55 = vmax.f32 %v4112_v47, 0.0 }
 0x296   :  { %v1900_v51 = vmax.f32 %v4113_v24, 0.0 }
 0x297   :  { %v1901_v57 = vmax.f32 %v4114_v32, 0.0 }
 0x298   :  { %v5577_v58 = vpack.c.bf16 %v1900_v51, %v1896_v30 }
 0x299   :  { %v5579_v62 = vpack.c.bf16 %v1901_v57, %v1897_v55  ;;  %v1759_v28 = vpop.f32.mrb[64].mxu1  ;;  %v4694_v55 = vld [vmem:[#allocation11 + $0x40] sm:$0xff]  }
 0x29a   :  { %v4115_v34 = vadd.f32 %v1759_v28, %v5489_v1  ;;  %v1761_v50 = vpop.f32.mrb[65].mxu1  ;;  %3971 = vmatprep.subr.bf16.mxu1 %v4694_v55  ;;  %3771 = vmatprep.subr.bf16.mxu0 %v4694_v55 }
 0x29b   :  { %v4116_v61 = vadd.f32 %v1761_v50, %v5492_v0  ;;  %v1763_v63 = vpop.f32.mrb[66].mxu1  ;;  %2569 = vmatmul.mubr.bf16.gmra.mrb[108].mxu0 %v5419_v59 }
 0x29c   :  { %v4117_v52 = vadd.f32 %v1763_v63, %v5489_v1  ;;  %v1765_v3 = vpop.f32.mrb[67].mxu1  ;;  %2578 = vmatprep.mubr.bf16.mxu0 %v5434_v9  ;;  %v1904_v5 = vmax.f32 %v4115_v34, 0.0  ;;  %v4695_v34 = vld [vmem:[#allocation11] sm:$0xff]  }
 0x29d   :  { %v4118_v60 = vadd.f32 %v1765_v3, %v5492_v0  ;;  %v1905_v15 = vmax.f32 %v4116_v61, 0.0  ;;  %3979 = vmatpush3.bf16.msra.mxu1 %v4695_v34 }
 0x29e   :  { %v1908_v11 = vmax.f32 %v4117_v52, 0.0 }
 0x29f   :  { %v1909_v17 = vmax.f32 %v4118_v60, 0.0 }
 0x2a0   :  { %v5587_v42 = vpack.c.bf16 %v1908_v11, %v1904_v5 }
 0x2a1   :  { %v5589_v21 = vpack.c.bf16 %v1909_v17, %v1905_v15  ;;  %v1769_v33 = vpop.f32.mrb[68].mxu1 }
 0x2a2   :  { %v4119_v23 = vadd.f32 %v1769_v33, %v5489_v1  ;;  %v1771_v2 = vpop.f32.mrb[69].mxu1 }
 0x2a3   :  { %v4120_v26 = vadd.f32 %v1771_v2, %v5492_v0  ;;  %v1773_v44 = vpop.f32.mrb[70].mxu1  ;;  %2579 = vmatmul.mubr.bf16.gmra.mrb[112].mxu0 %v5431_v7 }
 0x2a4   :  { %v4121_v59 = vadd.f32 %v1773_v44, %v5489_v1  ;;  %v1775_v13 = vpop.f32.mrb[71].mxu1  ;;  %2588 = vmatprep.mubr.bf16.mxu0 %v5446_v27  ;;  %v1912_v19 = vmax.f32 %v4119_v23, 0.0 }
 0x2a5   :  { %v4122_v9 = vadd.f32 %v1775_v13, %v5492_v0  ;;  %v1913_v16 = vmax.f32 %v4120_v26, 0.0 }
 0x2a6   :  { %v1916_v45 = vmax.f32 %v4121_v59, 0.0 }
 0x2a7   :  { %v1917_v12 = vmax.f32 %v4122_v9, 0.0 }
 0x2a8   :  { %v5597_v40 = vpack.c.bf16 %v1916_v45, %v1912_v19 }
 0x2a9   :  { %v5599_v47 = vpack.c.bf16 %v1917_v12, %v1913_v16  ;;  %v1779_v48 = vpop.f32.mrb[72].mxu1 }
 0x2aa   :  { %v4123_v24 = vadd.f32 %v1779_v48, %v5489_v1  ;;  %v1781_v49 = vpop.f32.mrb[73].mxu1 }
 0x2ab   :  { %v4124_v32 = vadd.f32 %v1781_v49, %v5492_v0  ;;  %v1783_v30 = vpop.f32.mrb[74].mxu1  ;;  %2589 = vmatmul.mubr.bf16.gmra.mrb[116].mxu0 %v5443_v25 }
 0x2ac   :  { %v4125_v7 = vadd.f32 %v1783_v30, %v5489_v1  ;;  %v1785_v51 = vpop.f32.mrb[75].mxu1  ;;  %2598 = vmatprep.mubr.bf16.mxu0 %v5458_v6  ;;  %v1920_v57 = vmax.f32 %v4123_v24, 0.0  ;;  %v4697_v24 = vld [vmem:[#allocation11 + $0x8] sm:$0xff]   ;;  %v4698_v30 = vld [vmem:[#allocation11 + $0x50] sm:$0xff]  }
 0x2ad   :  { %v4126_v27 = vadd.f32 %v1785_v51, %v5492_v0  ;;  %v1921_v50 = vmax.f32 %v4124_v32, 0.0 }
 0x2ae   :  { %v1924_v28 = vmax.f32 %v4125_v7, 0.0 }
 0x2af   :  { %v1925_v61 = vmax.f32 %v4126_v27, 0.0 }
 0x2b0   :  { %v5607_v63 = vpack.c.bf16 %v1924_v28, %v1920_v57 }
 0x2b1   :  { %v5609_v52 = vpack.c.bf16 %v1925_v61, %v1921_v50  ;;  %v1789_v3 = vpop.f32.mrb[76].mxu1  ;;  %v4700_v61 = vld [vmem:[#allocation11 + $0x58] sm:$0xff]  }
 0x2b2   :  { %v4127_v25 = vadd.f32 %v1789_v3, %v5489_v1  ;;  %v1791_v60 = vpop.f32.mrb[77].mxu1 }
 0x2b3   :  { %v4128_v5 = vadd.f32 %v1791_v60, %v5492_v0  ;;  %v1793_v6 = vpop.f32.mrb[78].mxu1  ;;  %2599 = vmatmul.mubr.bf16.gmra.mrb[120].mxu0 %v5455_v4 }
 0x2b4   :  { %v4129_v11 = vadd.f32 %v1793_v6, %v5489_v1  ;;  %v1795_v15 = vpop.f32.mrb[79].mxu1  ;;  %2608 = vmatprep.mubr.bf16.mxu0 %v5470_v38  ;;  %v1928_v33 = vmax.f32 %v4127_v25, 0.0  ;;  %v4696_v38 = vld [vmem:[#allocation11 + $0x48] sm:$0xff]   ;;  %v4701_v6 = vld [vmem:[#allocation11 + $0x18] sm:$0xff]  }
 0x2b5   :  { %v4130_v17 = vadd.f32 %v1795_v15, %v5492_v0  ;;  %v1929_v2 = vmax.f32 %v4128_v5, 0.0  ;;  %3972 = vmatprep.subr.bf16.mxu1 %v4696_v38 }
 0x2b6   :  { %v1932_v23 = vmax.f32 %v4129_v11, 0.0  ;;  %3980 = vmatpush3.bf16.msra.mxu1 %v4697_v24 }
 0x2b7   :  { %v1933_v26 = vmax.f32 %v4130_v17, 0.0  ;;  %3973 = vmatprep.subr.bf16.mxu1 %v4698_v30  ;;  %v4702_v17 = vld [vmem:[#allocation11 + $0x60] sm:$0xff]  }
 0x2b8   :  { %v5617_v44 = vpack.c.bf16 %v1932_v23, %v1928_v33 }
 0x2b9   :  { %v5619_v59 = vpack.c.bf16 %v1933_v26, %v1929_v2  ;;  %v1799_v13 = vpop.f32.mrb[80].mxu1 }
 0x2ba   :  { %v4131_v9 = vadd.f32 %v1799_v13, %v5489_v1  ;;  %v1801_v19 = vpop.f32.mrb[81].mxu1  ;;  %v4703_v13 = vld [vmem:[#allocation11 + $0x20] sm:$0xff]  }
 0x2bb   :  { %v4132_v45 = vadd.f32 %v1801_v19, %v5492_v0  ;;  %v1803_v16 = vpop.f32.mrb[82].mxu1  ;;  %2609 = vmatmul.mubr.bf16.gmra.mrb[124].mxu0 %v5467_v37  ;;  %v4699_v37 = vld [vmem:[#allocation11 + $0x10] sm:$0xff]  }
 0x2bc   :  { %v4133_v4 = vadd.f32 %v1803_v16, %v5489_v1  ;;  %v1805_v12 = vpop.f32.mrb[83].mxu1  ;;  %2651 = vmatprep.mubr.bf16.mxu0 %v5504_v53  ;;  %v1936_v49 = vmax.f32 %v4131_v9, 0.0  ;;  %3981 = vmatpush3.bf16.msra.mxu1 %v4699_v37 }
 0x2bd   :  { %v4134_v48 = vadd.f32 %v1805_v12, %v5492_v0  ;;  %v1937_v7 = vmax.f32 %v4132_v45, 0.0  ;;  %3974 = vmatprep.subr.bf16.mxu1 %v4700_v61 }
 0x2be   :  { %v1940_v32 = vmax.f32 %v4133_v4, 0.0 }
 0x2bf   :  { %v1941_v51 = vmax.f32 %v4134_v48, 0.0 }
 0x2c0   :  { %v5627_v27 = vpack.c.bf16 %v1940_v32, %v1936_v49  ;;  %3982 = vmatpush3.bf16.msra.mxu1 %v4701_v6  ;;  %v4706_v49 = vld [vmem:[#allocation11 + $0x70] sm:$0xff]  }
 0x2c1   :  { %v5629_v55 = vpack.c.bf16 %v1941_v51, %v1937_v7  ;;  %v1809_v57 = vpop.f32.mrb[84].mxu1  ;;  %3975 = vmatprep.subr.bf16.mxu1 %v4702_v17 }
 0x2c2   :  { %v4135_v28 = vadd.f32 %v1809_v57, %v5489_v1  ;;  %v1811_v50 = vpop.f32.mrb[85].mxu1 }
 0x2c3   :  { %v4136_v53 = vadd.f32 %v1811_v50, %v5492_v0  ;;  %v1813_v3 = vpop.f32.mrb[86].mxu1  ;;  %2652 = vmatmul.mubr.bf16.vlgmr.msra.gmra.mrb[64].mxu0 %v5502_v29 }
 0x2c4   :  { %v4137_v25 = vadd.f32 %v1813_v3, %v5489_v1  ;;  %v1815_v60 = vpop.f32.mrb[87].mxu1  ;;  %2661 = vmatprep.mubr.bf16.mxu0 %v5516_v41  ;;  %3772 = vmatpush3.bf16.msra.mxu0 %v4695_v34  ;;  %v1944_v11 = vmax.f32 %v4135_v28, 0.0  ;;  %v4704_v34 = vld [vmem:[#allocation11 + $0x68] sm:$0xff]  }
 0x2c5   :  { %v4138_v5 = vadd.f32 %v1815_v60, %v5492_v0  ;;  %3773 = vmatprep.subr.bf16.mxu0 %v4696_v38  ;;  %v1945_v33 = vmax.f32 %v4136_v53, 0.0  ;;  %3983 = vmatpush3.bf16.msra.mxu1 %v4703_v13  ;;  %v4705_v38 = vld [vmem:[#allocation11 + $0x28] sm:$0xff]  }
 0x2c6   :  { %v1948_v15 = vmax.f32 %v4137_v25, 0.0  ;;  %3976 = vmatprep.subr.bf16.mxu1 %v4704_v34 }
 0x2c7   :  { %v1949_v23 = vmax.f32 %v4138_v5, 0.0 }
 0x2c8   :  { %v5637_v2 = vpack.c.bf16 %v1948_v15, %v1944_v11  ;;  %3774 = vmatpush3.bf16.msra.mxu0 %v4697_v24 }
 0x2c9   :  { %v5639_v26 = vpack.c.bf16 %v1949_v23, %v1945_v33  ;;  %v1819_v29 = vpop.f32.mrb[88].mxu1  ;;  %3775 = vmatprep.subr.bf16.mxu0 %v4698_v30  ;;  %3984 = vmatpush3.bf16.msra.mxu1 %v4705_v38 }
 0x2ca   :  { %v4139_v9 = vadd.f32 %v1819_v29, %v5489_v1  ;;  %v1821_v41 = vpop.f32.mrb[89].mxu1  ;;  %3977 = vmatprep.subr.bf16.mxu1 %v4706_v49 }
 0x2cb   :  { %v4140_v19 = vadd.f32 %v1821_v41, %v5492_v0  ;;  %v1823_v45 = vpop.f32.mrb[90].mxu1  ;;  %2662 = vmatmul.mubr.bf16.gmra.mrb[68].mxu0 %v5514_v14  ;;  %v4707_v14 = vld [vmem:[#allocation11 + $0x30] sm:$0xff]  }
 0x2cc   :  { %v4141_v16 = vadd.f32 %v1823_v45, %v5489_v1  ;;  %v1825_v4 = vpop.f32.mrb[91].mxu1  ;;  %2671 = vmatprep.mubr.bf16.mxu0 %v5528_v54  ;;  %3776 = vmatpush3.bf16.msra.mxu0 %v4699_v37  ;;  %v1952_v48 = vmax.f32 %v4139_v9, 0.0 }
 0x2cd   :  { %v4142_v12 = vadd.f32 %v1825_v4, %v5492_v0  ;;  %3777 = vmatprep.subr.bf16.mxu0 %v4700_v61  ;;  %v1953_v32 = vmax.f32 %v4140_v19, 0.0  ;;  %3985 = vmatpush3.bf16.msra.mxu1 %v4707_v14 }
 0x2ce   :  { %v1956_v24 = vmax.f32 %v4141_v16, 0.0 }
 0x2cf   :  { %v1957_v30 = vmax.f32 %v4142_v12, 0.0 }
 0x2d0   :  { %v2024_v7 = vpack.c.bf16 %v1956_v24, %v1952_v48  ;;  %3778 = vmatpush3.bf16.msra.mxu0 %v4701_v6 }
 0x2d1   :  { %v2025_v51 = vpack.c.bf16 %v1957_v30, %v1953_v32  ;;  %v1829_v57 = vpop.f32.mrb[92].mxu1  ;;  %3779 = vmatprep.subr.bf16.mxu0 %v4702_v17 }
 0x2d2   :  { %v4143_v28 = vadd.f32 %v1829_v57, %v5489_v1  ;;  %v1831_v50 = vpop.f32.mrb[93].mxu1 }
 0x2d3   :  { %v4144_v54 = vadd.f32 %v1831_v50, %v5492_v0  ;;  %v1833_v37 = vpop.f32.mrb[94].mxu1  ;;  %2672 = vmatmul.mubr.bf16.gmra.mrb[72].mxu0 %v5526_v39  ;;  %v2094_v39 = vld [vmem:[#allocation10] sm:$0x3] }
 0x2d4   :  { %v4145_v61 = vadd.f32 %v1833_v37, %v5489_v1  ;;  %v1835_v53 = vpop.f32.mrb[95].mxu1  ;;  %2681 = vmatprep.mubr.bf16.mxu0 %v5540_v43  ;;  %3780 = vmatpush3.bf16.msra.mxu0 %v4703_v13  ;;  %v1960_v25 = vmax.f32 %v4143_v28, 0.0  ;;  %v4708_v1 = vld [vmem:[#allocation11 + $0x78] sm:$0xff]   ;;  %v5680_v43 = vrot.slane %v2094_v39, %v316_v46  ;;  %v4711_v28 = vld [vmem:[#allocation14 + $0x8] sm:$0xff]  }
 0x2d5   :  { %v4146_v3 = vadd.f32 %v1835_v53, %v5492_v0  ;;  %3781 = vmatprep.subr.bf16.mxu0 %v4704_v34  ;;  %v1961_v5 = vmax.f32 %v4144_v54, 0.0  ;;  %v4709_v0 = vld [vmem:[#allocation11 + $0x38] sm:$0xff]   ;;  %3978 = vmatprep.subr.bf16.mxu1 %v4708_v1 }
 0x2d6   :  { %v1964_v60 = vmax.f32 %v4145_v61, 0.0  ;;  %3986 = vmatpush3.bf16.msra.mxu1 %v4709_v0 }
 0x2d7   :  { %v1965_v6 = vmax.f32 %v4146_v3, 0.0 }
 0x2d8   :  { %v2028_v11 = vpack.c.bf16 %v1964_v60, %v1960_v25  ;;  %3782 = vmatpush3.bf16.msra.mxu0 %v4705_v38  ;;  %v4712_v60 = vld [vmem:[#allocation14 + $0x10] sm:$0xff]  }
 0x2d9   :  { %v2029_v15 = vpack.c.bf16 %v1965_v6, %v1961_v5  ;;  %3783 = vmatprep.subr.bf16.mxu0 %v4706_v49 }
 0x2db   :  { %2682 = vmatmul.mubr.bf16.gmra.mrb[76].mxu0 %v5538_v20  ;;  %v5676_v20 = vrot.slane %v2094_v39, %v312_v22 }
 0x2dc   :  { %2691 = vmatprep.mubr.bf16.mxu0 %v5549_v31  ;;  %3784 = vmatpush3.bf16.msra.mxu0 %v4707_v14 }
 0x2dd   :  { %3785 = vmatprep.subr.bf16.mxu0 %v4708_v1 }
 0x2e0   :  { %3786 = vmatpush3.bf16.msra.mxu0 %v4709_v0 }
 0x2e3   :  { %2692 = vmatmul.mubr.bf16.gmra.mrb[80].mxu0 %v5547_v8 }
 0x2e4   :  { %2701 = vmatprep.mubr.bf16.mxu0 %v5559_v36 }
 0x2eb   :  { %2702 = vmatmul.mubr.bf16.gmra.mrb[84].mxu0 %v5557_v35 }
 0x2ec   :  { %2711 = vmatprep.mubr.bf16.mxu0 %v5569_v10 }
 0x2f3   :  { %2712 = vmatmul.mubr.bf16.gmra.mrb[88].mxu0 %v5567_v56 }
 0x2f4   :  { %2721 = vmatprep.mubr.bf16.mxu0 %v5579_v62  ;;  %v4710_v62 = vld [vmem:[#allocation14] sm:$0xff]  }
 0x2f5   :  { %3907 = vmatprep.subr.bf16.mxu1 %v4710_v62 }
 0x2fb   :  { %2722 = vmatmul.mubr.bf16.gmra.mrb[92].mxu0 %v5577_v58 }
 0x2fc   :  { %2731 = vmatprep.mubr.bf16.mxu0 %v5589_v21 }
 0x303   :  { %2732 = vmatmul.mubr.bf16.gmra.mrb[96].mxu0 %v5587_v42 }
 0x304   :  { %2741 = vmatprep.mubr.bf16.mxu0 %v5599_v47 }
 0x30b   :  { %2742 = vmatmul.mubr.bf16.gmra.mrb[100].mxu0 %v5597_v40 }
 0x30c   :  { %2751 = vmatprep.mubr.bf16.mxu0 %v5609_v52 }
 0x313   :  { %2752 = vmatmul.mubr.bf16.gmra.mrb[104].mxu0 %v5607_v63 }
 0x314   :  { %2761 = vmatprep.mubr.bf16.mxu0 %v5619_v59 }
 0x31b   :  { %2762 = vmatmul.mubr.bf16.gmra.mrb[108].mxu0 %v5617_v44 }
 0x31c   :  { %2771 = vmatprep.mubr.bf16.mxu0 %v5629_v55 }
 0x323   :  { %2772 = vmatmul.mubr.bf16.gmra.mrb[112].mxu0 %v5627_v27 }
 0x324   :  { %2781 = vmatprep.mubr.bf16.mxu0 %v5639_v26 }
 0x32b   :  { %2782 = vmatmul.mubr.bf16.gmra.mrb[116].mxu0 %v5637_v2 }
 0x32c   :  { %2791 = vmatprep.mubr.bf16.mxu0 %v2025_v51 }
 0x333   :  { %2792 = vmatmul.mubr.bf16.gmra.mrb[120].mxu0 %v2024_v7 }
 0x334   :  { %2801 = vmatprep.mubr.bf16.mxu0 %v2029_v15 }
 0x33b   :  { %2802 = vmatmul.mubr.bf16.gmra.mrb[124].mxu0 %v2028_v11 }
 0x396   :  { %v2653_v8 = vpop.f32.mrb[64].mxu0 }
 0x397   :  { %v4147_v31 = vadd.f32 %v2653_v8, %v5676_v20  ;;  %v2655_v35 = vpop.f32.mrb[65].mxu0 }
 0x398   :  { %v4148_v36 = vadd.f32 %v2655_v35, %v5680_v43  ;;  %v2657_v56 = vpop.f32.mrb[66].mxu0 }
 0x399   :  { %v4149_v10 = vadd.f32 %v2657_v56, %v5676_v20  ;;  %v2659_v58 = vpop.f32.mrb[67].mxu0  ;;  %v2812_v21 = vmax.f32 %v4147_v31, 0.0 }
 0x39a   :  { %v4150_v42 = vadd.f32 %v2659_v58, %v5680_v43  ;;  %v2813_v40 = vmax.f32 %v4148_v36, 0.0 }
 0x39b   :  { %v2814_v22 = vmax.f32 %v4149_v10, 0.0 }
 0x39c   :  { %v2815_v18 = vmax.f32 %v4150_v42, 0.0 }
 0x39d   :  { %v2876_v46 = vpack.c.bf16 %v2814_v22, %v2812_v21 }
 0x39e   :  { %v2877_v47 = vpack.c.bf16 %v2815_v18, %v2813_v40  ;;  %v2663_v63 = vpop.f32.mrb[68].mxu0 }
 0x39f   :  { %v4151_v52 = vadd.f32 %v2663_v63, %v5676_v20  ;;  %v2665_v44 = vpop.f32.mrb[69].mxu0 }
 0x3a0   :  { %v4152_v59 = vadd.f32 %v2665_v44, %v5680_v43  ;;  %v2667_v27 = vpop.f32.mrb[70].mxu0  ;;  %3075 = vmatprep.mubr.bf16.mxu0 %v2877_v47 }
 0x3a1   :  { %v4153_v55 = vadd.f32 %v2667_v27, %v5676_v20  ;;  %v2669_v17 = vpop.f32.mrb[71].mxu0  ;;  %3076 = vmatmul.mubr.bf16.vlgmr.msra.gmra.mrb[128].mxu0 %v2876_v46  ;;  %v2816_v23 = vmax.f32 %v4151_v52, 0.0 }
 0x3a2   :  { %v4154_v33 = vadd.f32 %v2669_v17, %v5680_v43  ;;  %v2817_v26 = vmax.f32 %v4152_v59, 0.0 }
 0x3a3   :  { %v2818_v2 = vmax.f32 %v4153_v55, 0.0 }
 0x3a4   :  { %v2819_v29 = vmax.f32 %v4154_v33, 0.0 }
 0x3a5   :  { %v2878_v13 = vpack.c.bf16 %v2818_v2, %v2816_v23 }
 0x3a6   :  { %v2879_v9 = vpack.c.bf16 %v2819_v29, %v2817_v26  ;;  %v2673_v41 = vpop.f32.mrb[72].mxu0 }
 0x3a7   :  { %v4155_v34 = vadd.f32 %v2673_v41, %v5676_v20  ;;  %v2675_v19 = vpop.f32.mrb[73].mxu0 }
 0x3a8   :  { %v4156_v45 = vadd.f32 %v2675_v19, %v5680_v43  ;;  %v2677_v16 = vpop.f32.mrb[74].mxu0  ;;  %3083 = vmatprep.mubr.bf16.mxu0 %v2879_v9 }
 0x3a9   :  { %v4157_v4 = vadd.f32 %v2677_v16, %v5676_v20  ;;  %v2679_v12 = vpop.f32.mrb[75].mxu0  ;;  %3084 = vmatmul.mubr.bf16.gmra.mrb[132].mxu0 %v2878_v13  ;;  %v2820_v48 = vmax.f32 %v4155_v34, 0.0 }
 0x3aa   :  { %v4158_v38 = vadd.f32 %v2679_v12, %v5680_v43  ;;  %v2821_v49 = vmax.f32 %v4156_v45, 0.0 }
 0x3ab   :  { %v2822_v24 = vmax.f32 %v4157_v4, 0.0 }
 0x3ac   :  { %v2823_v32 = vmax.f32 %v4158_v38, 0.0 }
 0x3ad   :  { %v2880_v30 = vpack.c.bf16 %v2822_v24, %v2820_v48 }
 0x3ae   :  { %v2881_v7 = vpack.c.bf16 %v2823_v32, %v2821_v49  ;;  %v2683_v51 = vpop.f32.mrb[76].mxu0 }
 0x3af   :  { %v4159_v57 = vadd.f32 %v2683_v51, %v5676_v20  ;;  %v2685_v14 = vpop.f32.mrb[77].mxu0 }
 0x3b0   :  { %v4160_v50 = vadd.f32 %v2685_v14, %v5680_v43  ;;  %v2687_v54 = vpop.f32.mrb[78].mxu0  ;;  %3091 = vmatprep.mubr.bf16.mxu1 %v2881_v7 }
 0x3b1   :  { %v4161_v37 = vadd.f32 %v2687_v54, %v5676_v20  ;;  %v2689_v61 = vpop.f32.mrb[79].mxu0  ;;  %3092 = vmatmul.mubr.bf16.vlgmr.msra.gmra.mrb[96].mxu1 %v2880_v30  ;;  %v2824_v3 = vmax.f32 %v4159_v57, 0.0 }
 0x3b2   :  { %v4162_v53 = vadd.f32 %v2689_v61, %v5680_v43  ;;  %3908 = vmatpush3.bf16.msra.mxu1 %v4710_v62  ;;  %v2825_v5 = vmax.f32 %v4160_v50, 0.0 }
 0x3b3   :  { %v2826_v25 = vmax.f32 %v4161_v37, 0.0  ;;  %3909 = vmatprep.subr.bf16.mxu1 %v4711_v28 }
 0x3b4   :  { %v2827_v6 = vmax.f32 %v4162_v53, 0.0 }
 0x3b5   :  { %v2882_v11 = vpack.c.bf16 %v2826_v25, %v2824_v3 }
 0x3b6   :  { %v2883_v15 = vpack.c.bf16 %v2827_v6, %v2825_v5  ;;  %v2693_v1 = vpop.f32.mrb[80].mxu0  ;;  %3910 = vmatpush3.bf16.msra.mxu1 %v4711_v28 }
 0x3b7   :  { %v4163_v0 = vadd.f32 %v2693_v1, %v5676_v20  ;;  %v2695_v39 = vpop.f32.mrb[81].mxu0  ;;  %3911 = vmatprep.subr.bf16.mxu1 %v4712_v60 }
 0x3b8   :  { %v4164_v8 = vadd.f32 %v2695_v39, %v5680_v43  ;;  %v2697_v31 = vpop.f32.mrb[82].mxu0  ;;  %3099 = vmatprep.mubr.bf16.mxu1 %v2883_v15 }
 0x3b9   :  { %v4165_v35 = vadd.f32 %v2697_v31, %v5676_v20  ;;  %v2699_v36 = vpop.f32.mrb[83].mxu0  ;;  %3100 = vmatmul.mubr.bf16.gmra.mrb[100].mxu1 %v2882_v11  ;;  %v2828_v10 = vmax.f32 %v4163_v0, 0.0 }
 0x3ba   :  { %v4166_v56 = vadd.f32 %v2699_v36, %v5680_v43  ;;  %3912 = vmatpush3.bf16.msra.mxu1 %v4712_v60  ;;  %v2829_v62 = vmax.f32 %v4164_v8, 0.0 }
 0x3bb   :  { %v2830_v58 = vmax.f32 %v4165_v35, 0.0 }
 0x3bc   :  { %v2831_v42 = vmax.f32 %v4166_v56, 0.0 }
 0x3bd   :  { %v2884_v21 = vpack.c.bf16 %v2830_v58, %v2828_v10 }
 0x3be   :  { %v2885_v22 = vpack.c.bf16 %v2831_v42, %v2829_v62  ;;  %v2703_v40 = vpop.f32.mrb[84].mxu0 }
 0x3bf   :  { %v4167_v18 = vadd.f32 %v2703_v40, %v5676_v20  ;;  %v2705_v46 = vpop.f32.mrb[85].mxu0 }
 0x3c0   :  { %v4168_v47 = vadd.f32 %v2705_v46, %v5680_v43  ;;  %v2707_v63 = vpop.f32.mrb[86].mxu0  ;;  %3107 = vmatprep.mubr.bf16.mxu1 %v2885_v22 }
 0x3c1   :  { %v4169_v52 = vadd.f32 %v2707_v63, %v5676_v20  ;;  %v2709_v44 = vpop.f32.mrb[87].mxu0  ;;  %3108 = vmatmul.mubr.bf16.gmra.mrb[104].mxu1 %v2884_v21  ;;  %v2832_v27 = vmax.f32 %v4167_v18, 0.0 }
 0x3c2   :  { %v4170_v59 = vadd.f32 %v2709_v44, %v5680_v43  ;;  %v2833_v17 = vmax.f32 %v4168_v47, 0.0 }
 0x3c3   :  { %v2834_v55 = vmax.f32 %v4169_v52, 0.0 }
 0x3c4   :  { %v2835_v33 = vmax.f32 %v4170_v59, 0.0 }
 0x3c5   :  { %v2886_v23 = vpack.c.bf16 %v2834_v55, %v2832_v27 }
 0x3c6   :  { %v2887_v2 = vpack.c.bf16 %v2835_v33, %v2833_v17  ;;  %v2713_v26 = vpop.f32.mrb[88].mxu0 }
 0x3c7   :  { %v4171_v29 = vadd.f32 %v2713_v26, %v5676_v20  ;;  %v2715_v13 = vpop.f32.mrb[89].mxu0 }
 0x3c8   :  { %v4172_v9 = vadd.f32 %v2715_v13, %v5680_v43  ;;  %v2717_v41 = vpop.f32.mrb[90].mxu0  ;;  %3115 = vmatprep.mubr.bf16.mxu1 %v2887_v2 }
 0x3c9   :  { %v4173_v34 = vadd.f32 %v2717_v41, %v5676_v20  ;;  %v2719_v19 = vpop.f32.mrb[91].mxu0  ;;  %3116 = vmatmul.mubr.bf16.gmra.mrb[108].mxu1 %v2886_v23  ;;  %v2836_v16 = vmax.f32 %v4171_v29, 0.0 }
 0x3ca   :  { %v4174_v45 = vadd.f32 %v2719_v19, %v5680_v43  ;;  %v2837_v12 = vmax.f32 %v4172_v9, 0.0 }
 0x3cb   :  { %v2838_v4 = vmax.f32 %v4173_v34, 0.0 }
 0x3cc   :  { %v2839_v38 = vmax.f32 %v4174_v45, 0.0 }
 0x3cd   :  { %v2888_v48 = vpack.c.bf16 %v2838_v4, %v2836_v16 }
 0x3ce   :  { %v2889_v24 = vpack.c.bf16 %v2839_v38, %v2837_v12  ;;  %v2723_v49 = vpop.f32.mrb[92].mxu0 }
 0x3cf   :  { %v4175_v32 = vadd.f32 %v2723_v49, %v5676_v20  ;;  %v2725_v30 = vpop.f32.mrb[93].mxu0 }
 0x3d0   :  { %v4176_v7 = vadd.f32 %v2725_v30, %v5680_v43  ;;  %v2727_v51 = vpop.f32.mrb[94].mxu0  ;;  %3123 = vmatprep.mubr.bf16.mxu1 %v2889_v24  ;;  %v4713_v30 = vld [vmem:[#allocation14 + $0x18] sm:$0xff]  }
 0x3d1   :  { %v4177_v57 = vadd.f32 %v2727_v51, %v5676_v20  ;;  %v2729_v14 = vpop.f32.mrb[95].mxu0  ;;  %3124 = vmatmul.mubr.bf16.gmra.mrb[112].mxu1 %v2888_v48  ;;  %v2840_v50 = vmax.f32 %v4175_v32, 0.0  ;;  %3913 = vmatprep.subr.bf16.mxu1 %v4713_v30 }
 0x3d2   :  { %v4178_v28 = vadd.f32 %v2729_v14, %v5680_v43  ;;  %v2841_v37 = vmax.f32 %v4176_v7, 0.0  ;;  %3914 = vmatpush3.bf16.msra.mxu1 %v4713_v30 }
 0x3d3   :  { %v2842_v54 = vmax.f32 %v4177_v57, 0.0 }
 0x3d4   :  { %v2843_v61 = vmax.f32 %v4178_v28, 0.0 }
 0x3d5   :  { %v2890_v53 = vpack.c.bf16 %v2842_v54, %v2840_v50 }
 0x3d6   :  { %v2891_v3 = vpack.c.bf16 %v2843_v61, %v2841_v37  ;;  %v2733_v25 = vpop.f32.mrb[96].mxu0  ;;  %v4714_v37 = vld [vmem:[#allocation14 + $0x20] sm:$0xff]  }
 0x3d7   :  { %v4179_v60 = vadd.f32 %v2733_v25, %v5676_v20  ;;  %v2735_v5 = vpop.f32.mrb[97].mxu0  ;;  %3915 = vmatprep.subr.bf16.mxu1 %v4714_v37 }
 0x3d8   :  { %v4180_v6 = vadd.f32 %v2735_v5, %v5680_v43  ;;  %v2737_v11 = vpop.f32.mrb[98].mxu0  ;;  %3131 = vmatprep.mubr.bf16.mxu1 %v2891_v3  ;;  %3916 = vmatpush3.bf16.msra.mxu1 %v4714_v37 }
 0x3d9   :  { %v4181_v15 = vadd.f32 %v2737_v11, %v5676_v20  ;;  %v2739_v1 = vpop.f32.mrb[99].mxu0  ;;  %3132 = vmatmul.mubr.bf16.gmra.mrb[116].mxu1 %v2890_v53  ;;  %v2844_v39 = vmax.f32 %v4179_v60, 0.0  ;;  %v4715_v11 = vld [vmem:[#allocation14 + $0x28] sm:$0xff]  }
 0x3da   :  { %v4182_v0 = vadd.f32 %v2739_v1, %v5680_v43  ;;  %v2845_v31 = vmax.f32 %v4180_v6, 0.0  ;;  %3917 = vmatprep.subr.bf16.mxu1 %v4715_v11 }
 0x3db   :  { %v2846_v8 = vmax.f32 %v4181_v15, 0.0 }
 0x3dc   :  { %v2847_v35 = vmax.f32 %v4182_v0, 0.0  ;;  %3918 = vmatpush3.bf16.msra.mxu1 %v4715_v11 }
 0x3dd   :  { %v2892_v36 = vpack.c.bf16 %v2846_v8, %v2844_v39 }
 0x3de   :  { %v2893_v56 = vpack.c.bf16 %v2847_v35, %v2845_v31  ;;  %v2743_v10 = vpop.f32.mrb[100].mxu0 }
 0x3df   :  { %v4183_v58 = vadd.f32 %v2743_v10, %v5676_v20  ;;  %v2745_v62 = vpop.f32.mrb[101].mxu0 }
 0x3e0   :  { %v4184_v42 = vadd.f32 %v2745_v62, %v5680_v43  ;;  %v2747_v21 = vpop.f32.mrb[102].mxu0  ;;  %3139 = vmatprep.mubr.bf16.mxu1 %v2893_v56 }
 0x3e1   :  { %v4185_v22 = vadd.f32 %v2747_v21, %v5676_v20  ;;  %v2749_v40 = vpop.f32.mrb[103].mxu0  ;;  %3140 = vmatmul.mubr.bf16.gmra.mrb[120].mxu1 %v2892_v36  ;;  %v2848_v46 = vmax.f32 %v4183_v58, 0.0  ;;  %v4716_v36 = vld [vmem:[#allocation14 + $0x30] sm:$0xff]  }
 0x3e2   :  { %v4186_v18 = vadd.f32 %v2749_v40, %v5680_v43  ;;  %v2849_v63 = vmax.f32 %v4184_v42, 0.0  ;;  %3919 = vmatprep.subr.bf16.mxu1 %v4716_v36  ;;  %v4717_v40 = vld [vmem:[#allocation14 + $0x38] sm:$0xff]  }
 0x3e3   :  { %v2850_v47 = vmax.f32 %v4185_v22, 0.0  ;;  %3920 = vmatpush3.bf16.msra.mxu1 %v4716_v36 }
 0x3e4   :  { %v2851_v52 = vmax.f32 %v4186_v18, 0.0  ;;  %3921 = vmatprep.subr.bf16.mxu1 %v4717_v40 }
 0x3e5   :  { %v2894_v44 = vpack.c.bf16 %v2850_v47, %v2848_v46 }
 0x3e6   :  { %v2895_v59 = vpack.c.bf16 %v2851_v52, %v2849_v63  ;;  %v2753_v27 = vpop.f32.mrb[104].mxu0 }
 0x3e7   :  { %v4187_v55 = vadd.f32 %v2753_v27, %v5676_v20  ;;  %v2755_v17 = vpop.f32.mrb[105].mxu0  ;;  %3922 = vmatpush3.bf16.msra.mxu1 %v4717_v40 }
 0x3e8   :  { %v4188_v33 = vadd.f32 %v2755_v17, %v5680_v43  ;;  %v2757_v23 = vpop.f32.mrb[106].mxu0  ;;  %3147 = vmatprep.mubr.bf16.mxu1 %v2895_v59 }
 0x3e9   :  { %v4189_v2 = vadd.f32 %v2757_v23, %v5676_v20  ;;  %v2759_v26 = vpop.f32.mrb[107].mxu0  ;;  %3148 = vmatmul.mubr.bf16.gmra.mrb[124].mxu1 %v2894_v44  ;;  %v2852_v13 = vmax.f32 %v4187_v55, 0.0 }
 0x3ea   :  { %v4190_v29 = vadd.f32 %v2759_v26, %v5680_v43  ;;  %v2853_v41 = vmax.f32 %v4188_v33, 0.0 }
 0x3eb   :  { %v2854_v9 = vmax.f32 %v4189_v2, 0.0 }
 0x3ec   :  { %v2855_v34 = vmax.f32 %v4190_v29, 0.0 }
 0x3ed   :  { %v2896_v19 = vpack.c.bf16 %v2854_v9, %v2852_v13 }
 0x3ee   :  { %v2897_v45 = vpack.c.bf16 %v2855_v34, %v2853_v41  ;;  %v2763_v16 = vpop.f32.mrb[108].mxu0 }
 0x3ef   :  { %v4191_v4 = vadd.f32 %v2763_v16, %v5676_v20  ;;  %v2765_v12 = vpop.f32.mrb[109].mxu0 }
 0x3f0   :  { %v4192_v38 = vadd.f32 %v2765_v12, %v5680_v43  ;;  %v2767_v48 = vpop.f32.mrb[110].mxu0  ;;  %3155 = vmatprep.mubr.bf16.mxu1 %v2897_v45 }
 0x3f1   :  { %v4193_v24 = vadd.f32 %v2767_v48, %v5676_v20  ;;  %v2769_v49 = vpop.f32.mrb[111].mxu0  ;;  %3156 = vmatmul.mubr.bf16.gmra.mrb[128].mxu1 %v2896_v19  ;;  %v2856_v7 = vmax.f32 %v4191_v4, 0.0 }
 0x3f2   :  { %v4194_v32 = vadd.f32 %v2769_v49, %v5680_v43  ;;  %v2857_v57 = vmax.f32 %v4192_v38, 0.0 }
 0x3f3   :  { %v2858_v51 = vmax.f32 %v4193_v24, 0.0 }
 0x3f4   :  { %v2859_v14 = vmax.f32 %v4194_v32, 0.0 }
 0x3f5   :  { %v2898_v28 = vpack.c.bf16 %v2858_v51, %v2856_v7 }
 0x3f6   :  { %v2899_v50 = vpack.c.bf16 %v2859_v14, %v2857_v57  ;;  %v2773_v54 = vpop.f32.mrb[112].mxu0 }
 0x3f7   :  { %v4195_v61 = vadd.f32 %v2773_v54, %v5676_v20  ;;  %v2775_v53 = vpop.f32.mrb[113].mxu0 }
 0x3f8   :  { %v4196_v3 = vadd.f32 %v2775_v53, %v5680_v43  ;;  %v2777_v25 = vpop.f32.mrb[114].mxu0  ;;  %3163 = vmatprep.mubr.bf16.mxu1 %v2899_v50  ;;  %v5746_v50 = vld [vmem:[#allocation13] ss:$0 sm:$0xff] }
 0x3f9   :  { %v4197_v60 = vadd.f32 %v2777_v25, %v5676_v20  ;;  %v2779_v5 = vpop.f32.mrb[115].mxu0  ;;  %3164 = vmatmul.mubr.bf16.gmra.mrb[132].mxu1 %v2898_v28  ;;  %v2860_v15 = vmax.f32 %v4195_v61, 0.0 }
 0x3fa   :  { %v4198_v6 = vadd.f32 %v2779_v5, %v5680_v43  ;;  %v2861_v0 = vmax.f32 %v4196_v3, 0.0 }
 0x3fb   :  { %v2862_v1 = vmax.f32 %v4197_v60, 0.0 }
 0x3fc   :  { %v2863_v39 = vmax.f32 %v4198_v6, 0.0 }
 0x3fd   :  { %v2900_v8 = vpack.c.bf16 %v2862_v1, %v2860_v15 }
 0x3fe   :  { %v2901_v31 = vpack.c.bf16 %v2863_v39, %v2861_v0  ;;  %v2783_v35 = vpop.f32.mrb[116].mxu0 }
 0x3ff   :  { %v4199_v56 = vadd.f32 %v2783_v35, %v5676_v20  ;;  %v2785_v10 = vpop.f32.mrb[117].mxu0 }
 0x400   :  { %v4200_v58 = vadd.f32 %v2785_v10, %v5680_v43  ;;  %v2787_v62 = vpop.f32.mrb[118].mxu0  ;;  %3171 = vmatprep.mubr.bf16.mxu1 %v2901_v31 }
 0x401   :  { %v4201_v42 = vadd.f32 %v2787_v62, %v5676_v20  ;;  %v2789_v21 = vpop.f32.mrb[119].mxu0  ;;  %3172 = vmatmul.mubr.bf16.gmra.mrb[136].mxu1 %v2900_v8  ;;  %v2864_v18 = vmax.f32 %v4199_v56, 0.0 }
 0x402   :  { %v4202_v22 = vadd.f32 %v2789_v21, %v5680_v43  ;;  %v2865_v47 = vmax.f32 %v4200_v58, 0.0 }
 0x403   :  { %v2866_v46 = vmax.f32 %v4201_v42, 0.0 }
 0x404   :  { %v2867_v63 = vmax.f32 %v4202_v22, 0.0 }
 0x405   :  { %v2902_v52 = vpack.c.bf16 %v2866_v46, %v2864_v18 }
 0x406   :  { %v2903_v44 = vpack.c.bf16 %v2867_v63, %v2865_v47  ;;  %v2793_v59 = vpop.f32.mrb[120].mxu0 }
 0x407   :  { %v4203_v27 = vadd.f32 %v2793_v59, %v5676_v20  ;;  %v2795_v55 = vpop.f32.mrb[121].mxu0 }
 0x408   :  { %v4204_v17 = vadd.f32 %v2795_v55, %v5680_v43  ;;  %v2797_v33 = vpop.f32.mrb[122].mxu0  ;;  %3179 = vmatprep.mubr.bf16.mxu1 %v2903_v44 }
 0x409   :  { %v4205_v23 = vadd.f32 %v2797_v33, %v5676_v20  ;;  %v2799_v2 = vpop.f32.mrb[123].mxu0  ;;  %3180 = vmatmul.mubr.bf16.gmra.mrb[140].mxu1 %v2902_v52  ;;  %v2868_v29 = vmax.f32 %v4203_v27, 0.0 }
 0x40a   :  { %v4206_v26 = vadd.f32 %v2799_v2, %v5680_v43  ;;  %v2869_v9 = vmax.f32 %v4204_v17, 0.0 }
 0x40b   :  { %v2870_v13 = vmax.f32 %v4205_v23, 0.0 }
 0x40c   :  { %v2871_v41 = vmax.f32 %v4206_v26, 0.0 }
 0x40d   :  { %v2904_v34 = vpack.c.bf16 %v2870_v13, %v2868_v29 }
 0x40e   :  { %v2905_v19 = vpack.c.bf16 %v2871_v41, %v2869_v9  ;;  %v2803_v45 = vpop.f32.mrb[124].mxu0 }
 0x40f   :  { %v4207_v16 = vadd.f32 %v2803_v45, %v5676_v20  ;;  %v2805_v4 = vpop.f32.mrb[125].mxu0 }
 0x410   :  { %v4208_v12 = vadd.f32 %v2805_v4, %v5680_v43  ;;  %v2807_v38 = vpop.f32.mrb[126].mxu0  ;;  %3187 = vmatprep.mubr.bf16.mxu1 %v2905_v19 }
 0x411   :  { %v4209_v48 = vadd.f32 %v2807_v38, %v5676_v20  ;;  %v2809_v24 = vpop.f32.mrb[127].mxu0  ;;  %3188 = vmatmul.mubr.bf16.gmra.mrb[144].mxu1 %v2904_v34  ;;  %v2872_v32 = vmax.f32 %v4207_v16, 0.0 }
 0x412   :  { %v4210_v49 = vadd.f32 %v2809_v24, %v5680_v43  ;;  %v2873_v7 = vmax.f32 %v4208_v12, 0.0 }
 0x413   :  { %v2874_v30 = vmax.f32 %v4209_v48, 0.0 }
 0x414   :  { %v2875_v51 = vmax.f32 %v4210_v49, 0.0 }
 0x415   :  { %v2906_v57 = vpack.c.bf16 %v2874_v30, %v2872_v32 }
 0x416   :  { %v2907_v14 = vpack.c.bf16 %v2875_v51, %v2873_v7 }
 0x418   :  { %3195 = vmatprep.mubr.bf16.mxu1 %v2907_v14 }
 0x419   :  { %3196 = vmatmul.mubr.bf16.gmra.mrb[148].mxu1 %v2906_v57 }
 0x474   :  { %v3787_v28 = vpop.f32.mrb[128].mxu0 }
 0x475   :  { %v3788_v54 = vpop.f32.mrb[129].mxu0 }
 0x476   :  { %v3789_v37 = vadd.f32 %v3788_v54, %v3787_v28  ;;  %v3790_v61 = vpop.f32.mrb[130].mxu0 }
 0x477   :  { %v3791_v53 = vpop.f32.mrb[131].mxu0 }
 0x478   :  { %v3078_v20 = vadd.f32 %v3789_v37, %v5746_v50  ;;  %v3792_v3 = vadd.f32 %v3791_v53, %v3790_v61 }
 0x47a   :  { %v3081_v43 = vadd.f32 %v3792_v3, %v5746_v50  ;;  %v3204_v25 = vmax.f32 %v3078_v20, 0.0 }
 0x47c   :  { %v3205_v60 = vmax.f32 %v3081_v43, 0.0  ;;  %v3793_v5 = vpop.f32.mrb[132].mxu0 }
 0x47d   :  { %v3794_v6 = vpop.f32.mrb[133].mxu0 }
 0x47e   :  { %v3795_v11 = vadd.f32 %v3794_v6, %v3793_v5  ;;  %v3796_v15 = vpop.f32.mrb[134].mxu0  ;;  %v3236_v1 = vpack.c.bf16 %v3205_v60, %v3204_v25 }
 0x47f   :  { %v3797_v0 = vpop.f32.mrb[135].mxu0 }
 0x480   :  { %v3086_v39 = vadd.f32 %v3795_v11, %v5746_v50  ;;  %v3798_v8 = vadd.f32 %v3797_v0, %v3796_v15  ;;  %3923 = vmatprep.mubr.bf16.mxu1 %v3236_v1 }
 0x482   :  { %v3089_v31 = vadd.f32 %v3798_v8, %v5746_v50  ;;  %v3206_v35 = vmax.f32 %v3086_v39, 0.0 }
 0x484   :  { %v3207_v36 = vmax.f32 %v3089_v31, 0.0  ;;  %v3799_v56 = vpop.f32.mrb[96].mxu1 }
 0x485   :  { %v3800_v10 = vpop.f32.mrb[97].mxu1 }
 0x486   :  { %v3237_v58 = vpack.c.bf16 %v3207_v36, %v3206_v35  ;;  %v3801_v62 = vadd.f32 %v3800_v10, %v3799_v56  ;;  %v3802_v42 = vpop.f32.mrb[98].mxu1 }
 0x487   :  { %v3803_v21 = vpop.f32.mrb[99].mxu1 }
 0x488   :  { %v3094_v22 = vadd.f32 %v3801_v62, %v5746_v50  ;;  %v3804_v40 = vadd.f32 %v3803_v21, %v3802_v42  ;;  %3924 = vmatmul.mubr.bf16.vlgmr.msra.gmra.mrb[152].mxu1 %v3237_v58 }
 0x48a   :  { %v3097_v18 = vadd.f32 %v3804_v40, %v5746_v50  ;;  %v3208_v46 = vmax.f32 %v3094_v22, 0.0 }
 0x48c   :  { %v3209_v47 = vmax.f32 %v3097_v18, 0.0  ;;  %v3805_v63 = vpop.f32.mrb[100].mxu1 }
 0x48d   :  { %v3806_v52 = vpop.f32.mrb[101].mxu1 }
 0x48e   :  { %v3807_v44 = vadd.f32 %v3806_v52, %v3805_v63  ;;  %v3808_v59 = vpop.f32.mrb[102].mxu1  ;;  %v3238_v27 = vpack.c.bf16 %v3209_v47, %v3208_v46 }
 0x48f   :  { %v3809_v55 = vpop.f32.mrb[103].mxu1 }
 0x490   :  { %v3102_v17 = vadd.f32 %v3807_v44, %v5746_v50  ;;  %v3810_v33 = vadd.f32 %v3809_v55, %v3808_v59  ;;  %3927 = vmatprep.mubr.bf16.mxu1 %v3238_v27 }
 0x492   :  { %v3105_v23 = vadd.f32 %v3810_v33, %v5746_v50  ;;  %v3210_v2 = vmax.f32 %v3102_v17, 0.0 }
 0x494   :  { %v3211_v26 = vmax.f32 %v3105_v23, 0.0  ;;  %v3811_v29 = vpop.f32.mrb[104].mxu1 }
 0x495   :  { %v3812_v13 = vpop.f32.mrb[105].mxu1 }
 0x496   :  { %v3813_v9 = vadd.f32 %v3812_v13, %v3811_v29  ;;  %v3814_v41 = vpop.f32.mrb[106].mxu1  ;;  %v3239_v34 = vpack.c.bf16 %v3211_v26, %v3210_v2 }
 0x497   :  { %v3815_v19 = vpop.f32.mrb[107].mxu1 }
 0x498   :  { %v3110_v45 = vadd.f32 %v3813_v9, %v5746_v50  ;;  %v3816_v16 = vadd.f32 %v3815_v19, %v3814_v41  ;;  %3928 = vmatmul.mubr.bf16.gmra.mrb[156].mxu1 %v3239_v34 }
 0x49a   :  { %v3113_v4 = vadd.f32 %v3816_v16, %v5746_v50  ;;  %v3212_v12 = vmax.f32 %v3110_v45, 0.0 }
 0x49c   :  { %v3213_v38 = vmax.f32 %v3113_v4, 0.0  ;;  %v3817_v48 = vpop.f32.mrb[108].mxu1 }
 0x49d   :  { %v3818_v24 = vpop.f32.mrb[109].mxu1 }
 0x49e   :  { %v3819_v49 = vadd.f32 %v3818_v24, %v3817_v48  ;;  %v3820_v32 = vpop.f32.mrb[110].mxu1  ;;  %v3240_v30 = vpack.c.bf16 %v3213_v38, %v3212_v12 }
 0x49f   :  { %v3821_v7 = vpop.f32.mrb[111].mxu1 }
 0x4a0   :  { %v3118_v51 = vadd.f32 %v3819_v49, %v5746_v50  ;;  %v3822_v57 = vadd.f32 %v3821_v7, %v3820_v32  ;;  %3931 = vmatprep.mubr.bf16.mxu1 %v3240_v30 }
 0x4a2   :  { %v3121_v14 = vadd.f32 %v3822_v57, %v5746_v50  ;;  %v3214_v28 = vmax.f32 %v3118_v51, 0.0 }
 0x4a4   :  { %v3215_v54 = vmax.f32 %v3121_v14, 0.0  ;;  %v3823_v37 = vpop.f32.mrb[112].mxu1 }
 0x4a5   :  { %v3824_v61 = vpop.f32.mrb[113].mxu1 }
 0x4a6   :  { %v3825_v53 = vadd.f32 %v3824_v61, %v3823_v37  ;;  %v3826_v20 = vpop.f32.mrb[114].mxu1  ;;  %v3241_v3 = vpack.c.bf16 %v3215_v54, %v3214_v28 }
 0x4a7   :  { %v3827_v43 = vpop.f32.mrb[115].mxu1 }
 0x4a8   :  { %v3126_v25 = vadd.f32 %v3825_v53, %v5746_v50  ;;  %v3828_v60 = vadd.f32 %v3827_v43, %v3826_v20  ;;  %3932 = vmatmul.mubr.bf16.gmra.mrb[160].mxu1 %v3241_v3 }
 0x4aa   :  { %v3129_v5 = vadd.f32 %v3828_v60, %v5746_v50  ;;  %v3216_v6 = vmax.f32 %v3126_v25, 0.0 }
 0x4ac   :  { %v3217_v11 = vmax.f32 %v3129_v5, 0.0  ;;  %v3829_v15 = vpop.f32.mrb[116].mxu1 }
 0x4ad   :  { %v3830_v1 = vpop.f32.mrb[117].mxu1 }
 0x4ae   :  { %v3831_v0 = vadd.f32 %v3830_v1, %v3829_v15  ;;  %v3832_v39 = vpop.f32.mrb[118].mxu1  ;;  %v3242_v8 = vpack.c.bf16 %v3217_v11, %v3216_v6 }
 0x4af   :  { %v3833_v31 = vpop.f32.mrb[119].mxu1 }
 0x4b0   :  { %v3134_v35 = vadd.f32 %v3831_v0, %v5746_v50  ;;  %v3834_v36 = vadd.f32 %v3833_v31, %v3832_v39  ;;  %3935 = vmatprep.mubr.bf16.mxu1 %v3242_v8 }
 0x4b2   :  { %v3137_v56 = vadd.f32 %v3834_v36, %v5746_v50  ;;  %v3218_v10 = vmax.f32 %v3134_v35, 0.0 }
 0x4b4   :  { %v3219_v58 = vmax.f32 %v3137_v56, 0.0  ;;  %v3835_v62 = vpop.f32.mrb[120].mxu1 }
 0x4b5   :  { %v3836_v42 = vpop.f32.mrb[121].mxu1 }
 0x4b6   :  { %v3837_v21 = vadd.f32 %v3836_v42, %v3835_v62  ;;  %v3838_v22 = vpop.f32.mrb[122].mxu1  ;;  %v3243_v40 = vpack.c.bf16 %v3219_v58, %v3218_v10 }
 0x4b7   :  { %v3839_v18 = vpop.f32.mrb[123].mxu1 }
 0x4b8   :  { %v3142_v46 = vadd.f32 %v3837_v21, %v5746_v50  ;;  %v3840_v47 = vadd.f32 %v3839_v18, %v3838_v22  ;;  %3936 = vmatmul.mubr.bf16.gmra.mrb[164].mxu1 %v3243_v40 }
 0x4ba   :  { %v3145_v63 = vadd.f32 %v3840_v47, %v5746_v50  ;;  %v3220_v52 = vmax.f32 %v3142_v46, 0.0 }
 0x4bc   :  { %v3221_v44 = vmax.f32 %v3145_v63, 0.0  ;;  %v3841_v59 = vpop.f32.mrb[124].mxu1 }
 0x4bd   :  { %v3842_v27 = vpop.f32.mrb[125].mxu1 }
 0x4be   :  { %v3843_v55 = vadd.f32 %v3842_v27, %v3841_v59  ;;  %v3844_v17 = vpop.f32.mrb[126].mxu1  ;;  %v3244_v33 = vpack.c.bf16 %v3221_v44, %v3220_v52 }
 0x4bf   :  { %v3845_v23 = vpop.f32.mrb[127].mxu1 }
 0x4c0   :  { %v3150_v2 = vadd.f32 %v3843_v55, %v5746_v50  ;;  %v3846_v26 = vadd.f32 %v3845_v23, %v3844_v17  ;;  %3939 = vmatprep.mubr.bf16.mxu1 %v3244_v33 }
 0x4c2   :  { %v3153_v29 = vadd.f32 %v3846_v26, %v5746_v50  ;;  %v3222_v13 = vmax.f32 %v3150_v2, 0.0 }
 0x4c4   :  { %v3223_v9 = vmax.f32 %v3153_v29, 0.0  ;;  %v3847_v41 = vpop.f32.mrb[128].mxu1 }
 0x4c5   :  { %v3848_v34 = vpop.f32.mrb[129].mxu1 }
 0x4c6   :  { %v3849_v19 = vadd.f32 %v3848_v34, %v3847_v41  ;;  %v3850_v45 = vpop.f32.mrb[130].mxu1  ;;  %v3245_v16 = vpack.c.bf16 %v3223_v9, %v3222_v13 }
 0x4c7   :  { %v3851_v4 = vpop.f32.mrb[131].mxu1 }
 0x4c8   :  { %v3158_v12 = vadd.f32 %v3849_v19, %v5746_v50  ;;  %v3852_v38 = vadd.f32 %v3851_v4, %v3850_v45  ;;  %3940 = vmatmul.mubr.bf16.gmra.mrb[168].mxu1 %v3245_v16  ;;  %v5780_v16 = vld [vmem:[#allocation16] ss:$0 sm:$0xff] }
 0x4ca   :  { %v3161_v48 = vadd.f32 %v3852_v38, %v5746_v50  ;;  %v3224_v24 = vmax.f32 %v3158_v12, 0.0 }
 0x4cc   :  { %v3225_v49 = vmax.f32 %v3161_v48, 0.0  ;;  %v3853_v32 = vpop.f32.mrb[132].mxu1 }
 0x4cd   :  { %v3854_v30 = vpop.f32.mrb[133].mxu1 }
 0x4ce   :  { %v3855_v7 = vadd.f32 %v3854_v30, %v3853_v32  ;;  %v3856_v51 = vpop.f32.mrb[134].mxu1  ;;  %v3246_v57 = vpack.c.bf16 %v3225_v49, %v3224_v24 }
 0x4cf   :  { %v3857_v14 = vpop.f32.mrb[135].mxu1 }
 0x4d0   :  { %v3166_v28 = vadd.f32 %v3855_v7, %v5746_v50  ;;  %v3858_v54 = vadd.f32 %v3857_v14, %v3856_v51  ;;  %3943 = vmatprep.mubr.bf16.mxu1 %v3246_v57 }
 0x4d2   :  { %v3169_v37 = vadd.f32 %v3858_v54, %v5746_v50  ;;  %v3226_v61 = vmax.f32 %v3166_v28, 0.0 }
 0x4d4   :  { %v3227_v53 = vmax.f32 %v3169_v37, 0.0  ;;  %v3859_v20 = vpop.f32.mrb[136].mxu1 }
 0x4d5   :  { %v3860_v3 = vpop.f32.mrb[137].mxu1 }
 0x4d6   :  { %v3861_v43 = vadd.f32 %v3860_v3, %v3859_v20  ;;  %v3862_v25 = vpop.f32.mrb[138].mxu1  ;;  %v3247_v60 = vpack.c.bf16 %v3227_v53, %v3226_v61 }
 0x4d7   :  { %v3863_v5 = vpop.f32.mrb[139].mxu1 }
 0x4d8   :  { %v3174_v6 = vadd.f32 %v3861_v43, %v5746_v50  ;;  %v3864_v11 = vadd.f32 %v3863_v5, %v3862_v25  ;;  %3944 = vmatmul.mubr.bf16.gmra.mrb[172].mxu1 %v3247_v60 }
 0x4da   :  { %v3177_v15 = vadd.f32 %v3864_v11, %v5746_v50  ;;  %v3228_v1 = vmax.f32 %v3174_v6, 0.0 }
 0x4dc   :  { %v3229_v0 = vmax.f32 %v3177_v15, 0.0  ;;  %v3865_v39 = vpop.f32.mrb[140].mxu1 }
 0x4dd   :  { %v3866_v8 = vpop.f32.mrb[141].mxu1 }
 0x4de   :  { %v3867_v31 = vadd.f32 %v3866_v8, %v3865_v39  ;;  %v3868_v35 = vpop.f32.mrb[142].mxu1  ;;  %v3248_v36 = vpack.c.bf16 %v3229_v0, %v3228_v1 }
 0x4df   :  { %v3869_v56 = vpop.f32.mrb[143].mxu1 }
 0x4e0   :  { %v3182_v10 = vadd.f32 %v3867_v31, %v5746_v50  ;;  %v3870_v58 = vadd.f32 %v3869_v56, %v3868_v35  ;;  %3947 = vmatprep.mubr.bf16.mxu1 %v3248_v36 }
 0x4e2   :  { %v3185_v62 = vadd.f32 %v3870_v58, %v5746_v50  ;;  %v3230_v42 = vmax.f32 %v3182_v10, 0.0 }
 0x4e4   :  { %v3231_v21 = vmax.f32 %v3185_v62, 0.0  ;;  %v3871_v22 = vpop.f32.mrb[144].mxu1 }
 0x4e5   :  { %v3872_v40 = vpop.f32.mrb[145].mxu1 }
 0x4e6   :  { %v3873_v18 = vadd.f32 %v3872_v40, %v3871_v22  ;;  %v3874_v46 = vpop.f32.mrb[146].mxu1  ;;  %v3249_v47 = vpack.c.bf16 %v3231_v21, %v3230_v42 }
 0x4e7   :  { %v3875_v63 = vpop.f32.mrb[147].mxu1 }
 0x4e8   :  { %v3190_v52 = vadd.f32 %v3873_v18, %v5746_v50  ;;  %v3876_v44 = vadd.f32 %v3875_v63, %v3874_v46  ;;  %3948 = vmatmul.mubr.bf16.gmra.mrb[176].mxu1 %v3249_v47 }
 0x4ea   :  { %v3193_v59 = vadd.f32 %v3876_v44, %v5746_v50  ;;  %v3232_v27 = vmax.f32 %v3190_v52, 0.0 }
 0x4ec   :  { %v3233_v55 = vmax.f32 %v3193_v59, 0.0  ;;  %v3877_v17 = vpop.f32.mrb[148].mxu1 }
 0x4ed   :  { %v3878_v33 = vpop.f32.mrb[149].mxu1 }
 0x4ee   :  { %v3879_v23 = vadd.f32 %v3878_v33, %v3877_v17  ;;  %v3880_v2 = vpop.f32.mrb[150].mxu1  ;;  %v3250_v26 = vpack.c.bf16 %v3233_v55, %v3232_v27 }
 0x4ef   :  { %v3881_v29 = vpop.f32.mrb[151].mxu1 }
 0x4f0   :  { %v3198_v13 = vadd.f32 %v3879_v23, %v5746_v50  ;;  %v3882_v9 = vadd.f32 %v3881_v29, %v3880_v2  ;;  %3951 = vmatprep.mubr.bf16.mxu1 %v3250_v26 }
 0x4f2   :  { %v3201_v41 = vadd.f32 %v3882_v9, %v5746_v50  ;;  %v3234_v34 = vmax.f32 %v3198_v13, 0.0 }
 0x4f4   :  { %v3235_v19 = vmax.f32 %v3201_v41, 0.0 }
 0x4f6   :  { %v3251_v45 = vpack.c.bf16 %v3235_v19, %v3234_v34 }
 0x4f8   :  { %3952 = vmatmul.mubr.bf16.gmra.mrb[180].mxu1 %v3251_v45 }
 0x55b   :  { %v3925_v4 = vpop.f32.mrb[152].mxu1 }
 0x55c   :  { %v3366_v12 = vadd.f32 %v3925_v4, %v5780_v16  ;;  %v3357_v38 = vpop.f32.mrb[153].mxu1 }
 0x55d   :  { %v3358_v48 = vadd.f32 %v5780_v16, %v3357_v38  ;;  %v3926_v24 = vpop.f32.mrb[154].mxu1 }
 0x55e   :  { %3486 = vst [vmem:[#allocation17 + $0x10] sm:$0xff] %v3366_v12  ;;  %v3369_v49 = vadd.f32 %v3926_v24, %v5780_v16  ;;  %v3360_v32 = vpop.f32.mrb[155].mxu1 }
 0x55f   :  { %3484 = vst [vmem:[#allocation17] sm:$0xff] %v3358_v48  ;;  %v3361_v50 = vadd.f32 %v5780_v16, %v3360_v32 }
 0x560   :  { %3487 = vst [vmem:[#allocation17 + $0x18] sm:$0xff] %v3369_v49 }
 0x561   :  { %3485 = vst [vmem:[#allocation17 + $0x8] sm:$0xff] %v3361_v50 }
 0x56b   :  { %v3929_v30 = vpop.f32.mrb[156].mxu1 }
 0x56c   :  { %v3382_v7 = vadd.f32 %v3929_v30, %v5780_v16  ;;  %v3373_v51 = vpop.f32.mrb[157].mxu1 }
 0x56d   :  { %v3374_v57 = vadd.f32 %v5780_v16, %v3373_v51  ;;  %v3930_v14 = vpop.f32.mrb[158].mxu1 }
 0x56e   :  { %3490 = vst [vmem:[#allocation17 + $0x30] sm:$0xff] %v3382_v7  ;;  %v3385_v28 = vadd.f32 %v3930_v14, %v5780_v16  ;;  %v3376_v54 = vpop.f32.mrb[159].mxu1 }
 0x56f   :  { %3488 = vst [vmem:[#allocation17 + $0x20] sm:$0xff] %v3374_v57  ;;  %v3377_v37 = vadd.f32 %v5780_v16, %v3376_v54 }
 0x570   :  { %3491 = vst [vmem:[#allocation17 + $0x38] sm:$0xff] %v3385_v28 }
 0x571   :  { %3489 = vst [vmem:[#allocation17 + $0x28] sm:$0xff] %v3377_v37 }
 0x57b   :  { %v3933_v61 = vpop.f32.mrb[160].mxu1 }
 0x57c   :  { %v3398_v53 = vadd.f32 %v3933_v61, %v5780_v16  ;;  %v3389_v20 = vpop.f32.mrb[161].mxu1 }
 0x57d   :  { %v3390_v3 = vadd.f32 %v5780_v16, %v3389_v20  ;;  %v3934_v43 = vpop.f32.mrb[162].mxu1 }
 0x57e   :  { %3494 = vst [vmem:[#allocation17 + $0x50] sm:$0xff] %v3398_v53  ;;  %v3401_v25 = vadd.f32 %v3934_v43, %v5780_v16  ;;  %v3392_v60 = vpop.f32.mrb[163].mxu1 }
 0x57f   :  { %3492 = vst [vmem:[#allocation17 + $0x40] sm:$0xff] %v3390_v3  ;;  %v3393_v5 = vadd.f32 %v5780_v16, %v3392_v60 }
 0x580   :  { %3495 = vst [vmem:[#allocation17 + $0x58] sm:$0xff] %v3401_v25 }
 0x581   :  { %3493 = vst [vmem:[#allocation17 + $0x48] sm:$0xff] %v3393_v5 }
 0x58b   :  { %v3937_v6 = vpop.f32.mrb[164].mxu1 }
 0x58c   :  { %v3414_v11 = vadd.f32 %v3937_v6, %v5780_v16  ;;  %v3405_v15 = vpop.f32.mrb[165].mxu1 }
 0x58d   :  { %v3406_v1 = vadd.f32 %v5780_v16, %v3405_v15  ;;  %v3938_v0 = vpop.f32.mrb[166].mxu1 }
 0x58e   :  { %3498 = vst [vmem:[#allocation17 + $0x70] sm:$0xff] %v3414_v11  ;;  %v3417_v39 = vadd.f32 %v3938_v0, %v5780_v16  ;;  %v3408_v8 = vpop.f32.mrb[167].mxu1 }
 0x58f   :  { %3496 = vst [vmem:[#allocation17 + $0x60] sm:$0xff] %v3406_v1  ;;  %v3409_v31 = vadd.f32 %v5780_v16, %v3408_v8 }
 0x590   :  { %3499 = vst [vmem:[#allocation17 + $0x78] sm:$0xff] %v3417_v39 }
 0x591   :  { %3497 = vst [vmem:[#allocation17 + $0x68] sm:$0xff] %v3409_v31 }
 0x59b   :  { %v3941_v35 = vpop.f32.mrb[168].mxu1 }
 0x59c   :  { %v3430_v36 = vadd.f32 %v3941_v35, %v5780_v16  ;;  %v3421_v56 = vpop.f32.mrb[169].mxu1 }
 0x59d   :  { %v3422_v10 = vadd.f32 %v5780_v16, %v3421_v56  ;;  %v3942_v58 = vpop.f32.mrb[170].mxu1 }
 0x59e   :  { %3502 = vst [vmem:[#allocation17 + $0x90] sm:$0xff] %v3430_v36  ;;  %v3433_v62 = vadd.f32 %v3942_v58, %v5780_v16  ;;  %v3424_v42 = vpop.f32.mrb[171].mxu1 }
 0x59f   :  { %3500 = vst [vmem:[#allocation17 + $0x80] sm:$0xff] %v3422_v10  ;;  %v3425_v21 = vadd.f32 %v5780_v16, %v3424_v42 }
 0x5a0   :  { %3503 = vst [vmem:[#allocation17 + $0x98] sm:$0xff] %v3433_v62 }
 0x5a1   :  { %3501 = vst [vmem:[#allocation17 + $0x88] sm:$0xff] %v3425_v21 }
 0x5ab   :  { %v3945_v22 = vpop.f32.mrb[172].mxu1 }
 0x5ac   :  { %v3446_v40 = vadd.f32 %v3945_v22, %v5780_v16  ;;  %v3437_v18 = vpop.f32.mrb[173].mxu1 }
 0x5ad   :  { %v3438_v46 = vadd.f32 %v5780_v16, %v3437_v18  ;;  %v3946_v47 = vpop.f32.mrb[174].mxu1 }
 0x5ae   :  { %3506 = vst [vmem:[#allocation17 + $0xb0] sm:$0xff] %v3446_v40  ;;  %v3449_v63 = vadd.f32 %v3946_v47, %v5780_v16  ;;  %v3440_v52 = vpop.f32.mrb[175].mxu1 }
 0x5af   :  { %3504 = vst [vmem:[#allocation17 + $0xa0] sm:$0xff] %v3438_v46  ;;  %v3441_v44 = vadd.f32 %v5780_v16, %v3440_v52 }
 0x5b0   :  { %3507 = vst [vmem:[#allocation17 + $0xb8] sm:$0xff] %v3449_v63 }
 0x5b1   :  { %3505 = vst [vmem:[#allocation17 + $0xa8] sm:$0xff] %v3441_v44 }
 0x5bb   :  { %v3949_v59 = vpop.f32.mrb[176].mxu1 }
 0x5bc   :  { %v3462_v27 = vadd.f32 %v3949_v59, %v5780_v16  ;;  %v3453_v55 = vpop.f32.mrb[177].mxu1 }
 0x5bd   :  { %v3454_v17 = vadd.f32 %v5780_v16, %v3453_v55  ;;  %v3950_v33 = vpop.f32.mrb[178].mxu1 }
 0x5be   :  { %3510 = vst [vmem:[#allocation17 + $0xd0] sm:$0xff] %v3462_v27  ;;  %v3465_v23 = vadd.f32 %v3950_v33, %v5780_v16  ;;  %v3456_v2 = vpop.f32.mrb[179].mxu1 }
 0x5bf   :  { %3508 = vst [vmem:[#allocation17 + $0xc0] sm:$0xff] %v3454_v17  ;;  %v3457_v26 = vadd.f32 %v5780_v16, %v3456_v2 }
 0x5c0   :  { %3511 = vst [vmem:[#allocation17 + $0xd8] sm:$0xff] %v3465_v23 }
 0x5c1   :  { %3509 = vst [vmem:[#allocation17 + $0xc8] sm:$0xff] %v3457_v26 }
 0x5cb   :  { %v3953_v29 = vpop.f32.mrb[180].mxu1 }
 0x5cc   :  { %v3478_v13 = vadd.f32 %v3953_v29, %v5780_v16  ;;  %v3469_v9 = vpop.f32.mrb[181].mxu1 }
 0x5cd   :  { %v3470_v41 = vadd.f32 %v5780_v16, %v3469_v9  ;;  %v3954_v34 = vpop.f32.mrb[182].mxu1 }
 0x5ce   :  { %3514 = vst [vmem:[#allocation17 + $0xf0] sm:$0xff] %v3478_v13  ;;  %v3481_v19 = vadd.f32 %v3954_v34, %v5780_v16  ;;  %v3472_v45 = vpop.f32.mrb[183].mxu1 }
 0x5cf   :  { %3512 = vst [vmem:[#allocation17 + $0xe0] sm:$0xff] %v3470_v41  ;;  %v3473_v4 = vadd.f32 %v5780_v16, %v3472_v45 }
 0x5d0   :  { %3515 = vst [vmem:[#allocation17 + $0xf8] sm:$0xff] %v3481_v19 }
 0x5d1   :  { %3513 = vst [vmem:[#allocation17 + $0xe8] sm:$0xff] %v3473_v4 }
 0x5d2   :  { %4931 = shalt.err (!%p4928_p6)
}
 0x5d3   :  { %s4932_s14 = scalar_lea.hbm %s5838_s9, 4096 }
 0x5d4   :  { %p4933_p7 = scmp.ne.s32.totalorder %s5838_s9, %s4932_s14  ;;  %p4936_p8 = scmp.lt.u32.totalorder %s4932_s14, %s5838_s9 }
 0x5d6   :  { %p4938_p9 = pnand %p4936_p8, %p4933_p7 }
 0x5d8   :  { %4941 = shalt.err (!%p4938_p9)
}
 0x5d9   :  { %3527 = dma.vmem_to_hbm [thread:$0]  %s3522_s24, 4096, %s5838_s9, [#allocation4], %s4958_s1, %s4958_s1, %s4959_s10  }
 0x5da   :  { %4952 = dma.done.wait [#allocation4], 4096  }
 0x5db   :  { %4953 = vsyncadd [#allocation4], 4294963200 }
 0x5dc   :  { %3531 = vsyncpa [#allocation3], 1 }
 0x5dd   :  { %3532 = vsyncpa [#allocation6], 1 }
 0x5de   :  { %3533 = vsyncpa [#allocation9], 1 }
 0x5df   :  { %3534 = vsyncpa [#allocation12], 1 }
 0x5e0   :  { %3535 = vsyncpa [#allocation15], 1 }
 0x5e1   :  { %3536 = vsyncpa [#allocation4], 1 }

</bundles_post_ra>
